<compile_context>
chip_gen: v5e
topology: v5e:2x2
jax: 0.10.0
libtpu: 0.0.40
codegen_flags: <defaults>
</compile_context>

<pallas_src>
import numpy as np
import jax
import jax.numpy as jnp
from jax import lax
from jax.experimental import pallas as pl
from jax.experimental.pallas import tpu as pltpu


_LANE = 128     # output-channel dims inside the kernel are padded to this
_PADL = 8       # sublane-aligned left offset of the image interior in scratch


def _round_up(n, m):
    return ((n + m - 1) // m) * m


# --------------------------- parameter handling ---------------------------- #
def init_down_conv_params(key, in_channels, out_channels):
    """Torch-layout params, init mimicking nn.Conv2d default (U(+-1/sqrt(fan)))."""
    k1, k2, k3, k4 = jax.random.split(key, 4)
    b1_ = 1.0 / np.sqrt(in_channels * 9)
    b2_ = 1.0 / np.sqrt(out_channels * 9)
    return {
        "w1": jax.random.uniform(k1, (out_channels, in_channels, 3, 3),
                                 jnp.float32, -b1_, b1_),
        "b1": jax.random.uniform(k2, (out_channels,), jnp.float32, -b1_, b1_),
        "w2": jax.random.uniform(k3, (out_channels, out_channels, 3, 3),
                                 jnp.float32, -b2_, b2_),
        "b2": jax.random.uniform(k4, (out_channels,), jnp.float32, -b2_, b2_),
    }


def prepare_down_conv_params(params, *, input_padded=False,
                             compute_dtype=jnp.float32):
    """One-time transform of torch OIHW weights into the kernel layout.

    Weights become (9, Cin_k, Cout_p): tap-major (dy*3+dx), K = Cin_k rows,
    Cout zero-padded to a multiple of 128 so every output store is lane-dense.
    Cin is left UNPADDED for the stem block; pass input_padded=True for chained
    blocks that consume the previous block's Cout_p-padded NHWC output directly
    (the extra input lanes get zero weight rows). Bias stays f32 (f32 VALU
    epilogue even when compute_dtype is bf16).
    """
    w1, b1, w2, b2 = params["w1"], params["b1"], params["w2"], params["b2"]
    cout, cin = w1.shape[0], w1.shape[1]
    cout_p = _round_up(cout, _LANE)
    cin_k = _round_up(cin, _LANE) if input_padded else cin

    def taps(w, ci_pad, co_pad):
        t = jnp.transpose(w, (2, 3, 1, 0))                  # (3, 3, ci, co)
        t = jnp.pad(t, ((0, 0), (0, 0),
                        (0, ci_pad - t.shape[2]), (0, co_pad - t.shape[3])))
        return t.reshape(9, ci_pad, co_pad).astype(compute_dtype)

    def bias(b):
        return jnp.pad(b, (0, cout_p - cout)).reshape(1, cout_p).astype(jnp.float32)

    return {
        "w1k": taps(w1, cin_k, cout_p), "b1k": bias(b1),
        "w2k": taps(w2, cout_p, cout_p), "b2k": bias(b2),
        "cin": cin, "cin_k": cin_k, "cout": cout, "cout_p": cout_p,
        "compute_dtype": compute_dtype,
    }


# ------------------------------ fused kernel ------------------------------- #
def _make_down_conv_kernel(H, W, Ck, Cp, has_pool, cdt):
    HW = H * W

    def conv3x3_relu(src_sc, w_ref, b_ref, C):
        # 9 accumulated per-tap matmuls (no (HW, 9C) im2col patch buffer):
        # each tap is one (HW, C) @ (C, Cp) MXU matmul with f32 accumulation.
        acc = None
        for dy in range(3):
            for dx in range(3):
                win = src_sc[pl.ds(dy, H), pl.ds(_PADL - 1 + dx, W), :]
                t = jnp.dot(win.reshape(HW, C), w_ref[dy * 3 + dx],
                            preferred_element_type=jnp.float32)
                acc = t if acc is None else acc + t
        return jnp.maximum(acc + b_ref[...], 0.0)            # (HW, Cp), f32

    def zero_halo(sc, C):
        # Zero ONLY the halo the 3x3 windows read (top/bottom rows and the
        # single left/right halo columns).  The interior is fully overwritten
        # every grid step, so no full-scratch zero fill (>90% fewer stores).
        sc[pl.ds(0, 1), :, :] = jnp.zeros((1, W + 2 * _PADL, C), cdt)
        sc[pl.ds(H + 1, 1), :, :] = jnp.zeros((1, W + 2 * _PADL, C), cdt)
        sc[pl.ds(1, H), pl.ds(_PADL - 1, 1), :] = jnp.zeros((H, 1, C), cdt)
        sc[pl.ds(1, H), pl.ds(_PADL + W, 1), :] = jnp.zeros((H, 1, C), cdt)

    def kernel(x_ref, w1_ref, b1_ref, w2_ref, b2_ref, *rest):
        if has_pool:
            pooled_ref, short_ref, xp_sc, y1p_sc = rest
        else:
            short_ref, xp_sc, y1p_sc = rest

        # Re-zero the halo every step so correctness holds under any megacore
        # partitioning of the (parallel) grid; this is cheap (halo only).
        zero_halo(xp_sc, Ck)
        zero_halo(y1p_sc, Cp)

        # In-VMEM zero padding: write the tile interior at a sublane-aligned
        # offset inside the halo'd scratch (no HBM-side jnp.pad).
        xp_sc[pl.ds(1, H), pl.ds(_PADL, W), :] = x_ref[0].astype(cdt)

        # conv1 + ReLU (K = Ck per tap), then park in the halo'd scratch.
        h1 = conv3x3_relu(xp_sc, w1_ref, b1_ref, Ck)
        y1p_sc[pl.ds(1, H), pl.ds(_PADL, W), :] = h1.reshape(H, W, Cp).astype(cdt)

        # conv2 + ReLU (K = Cp per tap).
        h2 = conv3x3_relu(y1p_sc, w2_ref, b2_ref, Cp)
        y2 = h2.reshape(H, W, Cp)
        short_ref[0] = y2.astype(short_ref.dtype)

        if has_pool:
            Hh, Wh = H // 2, W // 2
            # 2x2/2 max-pool: reduce H first (major-axis slabs, no relayout),
            # then reduce W via the lane-repack trick on the halved rows.
            yr = y2.reshape(Hh, 2, W, Cp)
            vh = jnp.maximum(yr[:, 0], yr[:, 1])             # (H/2, W, Cp)
            vw = vh.reshape(Hh, Wh, 2 * Cp)
            pooled = jnp.maximum(vw[:, :, :Cp], vw[:, :, Cp:])
            pooled_ref[0] = pooled.astype(pooled_ref.dtype)

    return kernel


def _vmem_limit_bytes(H, W, Ck, Cp, cdt_bytes, io_bytes, has_pool):
    """Scoped-VMEM limit derived from actual block sizes (with headroom)."""
    x_blk = H * W * Ck * io_bytes                       # input block
    w_bytes = 9 * (Ck + Cp) * Cp * cdt_bytes + 2 * Cp * 4
    out_blk = H * W * Cp * io_bytes
    if has_pool:
        out_blk += (H // 2) * (W // 2) * Cp * io_bytes
    scr = (H + 2) * (W + 2 * _PADL) * (Ck + Cp) * cdt_bytes
    est = 2 * x_blk + 2 * w_bytes + 2 * out_blk + scr   # 2x = double buffers
    est = int(est * 1.25) + (1 << 20)
    cap = 100 * 1024 * 1024                             # v5e/v6e: 128 MiB phys
    try:
        # v7x has only 64 MiB/TC: stay well below physical.
        cap = min(cap, int(pltpu.get_tpu_info().vmem_capacity_bytes * 0.8))
    except Exception:
        pass
    return max(32 * 1024 * 1024, min(cap, est))


def down_conv_nhwc(x_nhwc, prep, has_pool=True):
    """Fused DownConv on NHWC activations.

    Returns (pooled, shortcut) with the channel axis padded to prep['cout_p'].
    Chain blocks on this padded form (prepare the next block with
    input_padded=True); slice to prep['cout'] only at the network boundary.
    """
    N, H, W, Ck = x_nhwc.shape
    assert Ck == prep["cin_k"], (
        f"input channels must match the prepared layout "
        f"(expected {prep['cin_k']}, got {Ck})")
    if has_pool:
        assert H % 2 == 0 and W % 2 == 0, "2x2 max-pool requires even H and W"
    Cp = prep["cout_p"]
    cdt = prep["compute_dtype"]
    dt = x_nhwc.dtype

    kernel = _make_down_conv_kernel(H, W, Ck, Cp, has_pool, cdt)

    out_shapes, out_specs = [], []
    if has_pool:
        out_shapes.append(jax.ShapeDtypeStruct((N, H // 2, W // 2, Cp), dt))
        out_specs.append(pl.BlockSpec((1, H // 2, W // 2, Cp),
                                      lambda n: (n, 0, 0, 0)))
    out_shapes.append(jax.ShapeDtypeStruct((N, H, W, Cp), dt))
    out_specs.append(pl.BlockSpec((1, H, W, Cp), lambda n: (n, 0, 0, 0)))

    vmem_limit = _vmem_limit_bytes(H, W, Ck, Cp,
                                   jnp.dtype(cdt).itemsize,
                                   jnp.dtype(dt).itemsize, has_pool)

    outs = pl.pallas_call(
        kernel,
        out_shape=tuple(out_shapes),
        grid_spec=pltpu.PrefetchScalarGridSpec(
            num_scalar_prefetch=0,
            grid=(N,),
            in_specs=[
                pl.BlockSpec((1, H, W, Ck), lambda n: (n, 0, 0, 0)),
                # Weights / bias: constant index_map -> fetched once, resident.
                pl.BlockSpec(prep["w1k"].shape, lambda n: (0, 0, 0)),
                pl.BlockSpec(prep["b1k"].shape, lambda n: (0, 0)),
                pl.BlockSpec(prep["w2k"].shape, lambda n: (0, 0, 0)),
                pl.BlockSpec(prep["b2k"].shape, lambda n: (0, 0)),
            ],
            out_specs=tuple(out_specs),
            scratch_shapes=[
                # Halo'd activation scratches (in-VMEM zero padding).
                pltpu.VMEM((H + 2, W + 2 * _PADL, Ck), cdt),
                pltpu.VMEM((H + 2, W + 2 * _PADL, Cp), cdt),
            ],
        ),
        compiler_params=pltpu.CompilerParams(
            dimension_semantics=("parallel",),       # batch axis feeds both TCs
            vmem_limit_bytes=vmem_limit,
        ),
    )(x_nhwc, prep["w1k"], prep["b1k"], prep["w2k"], prep["b2k"])

    if has_pool:
        pooled_p, short_p = outs
        return pooled_p, short_p
    (short_p,) = outs
    return short_p, short_p


def down_conv(x_nchw, prep, has_pool=True):
    """DownConv.forward with torch's NCHW in/out convention (module boundary)."""
    x = jnp.transpose(x_nchw, (0, 2, 3, 1))                  # NCHW -> NHWC
    pooled, shortcut = down_conv_nhwc(x, prep, has_pool)
    cout = prep["cout"]
    pooled, shortcut = pooled[..., :cout], shortcut[..., :cout]
    return (jnp.transpose(pooled, (0, 3, 1, 2)),             # NHWC -> NCHW
            jnp.transpose(shortcut, (0, 3, 1, 2)))


# --------------------------- pure-JAX reference ----------------------------- #
def _ref_down_conv(x_nchw, params, has_pool=True):
    def conv(x, w, b):
        y = lax.conv_general_dilated(
            x, w, window_strides=(1, 1), padding=((1, 1), (1, 1)),
            dimension_numbers=("NCHW", "OIHW", "NCHW"))
        return jax.nn.relu(y + b[None, :, None, None])

    x = conv(x_nchw, params["w1"], params["b1"])
    x = conv(x, params["w2"], params["b2"])
    shortcut = x
    if has_pool:
        x = lax.reduce_window(x, -jnp.inf, lax.max,
                              window_dimensions=(1, 1, 2, 2),
                              window_strides=(1, 1, 2, 2),
                              padding="VALID")
    return x, shortcut


if __name__ == "__main__":
    key = jax.random.PRNGKey(0)
    kx, kp1, kp2 = jax.random.split(key, 3)

    N, Cin, C1, C2, H, W = 2, 4, 8, 16, 16, 16
    x = jax.random.normal(kx, (N, Cin, H, W), jnp.float32)    # NCHW like torch
    params1 = init_down_conv_params(kp1, Cin, C1)
    params2 = init_down_conv_params(kp2, C1, C2)

    prep1 = prepare_down_conv_params(params1)                          # stem
    prep2 = prepare_down_conv_params(params2, input_padded=True)       # chained

    # --- block 1, has_pool=True (NCHW module boundary) ---
    pooled, shortcut = down_conv(x, prep1, has_pool=True)
    pooled = jax.block_until_ready(pooled)
    shortcut = jax.block_until_ready(shortcut)
    ref_pooled, ref_shortcut = _ref_down_conv(x, params1, has_pool=True)
    np.testing.assert_allclose(np.asarray(pooled), np.asarray(ref_pooled),
                               rtol=1e-4, atol=1e-5)
    np.testing.assert_allclose(np.asarray(shortcut), np.asarray(ref_shortcut),
                               rtol=1e-4, atol=1e-5)
    assert pooled.shape == (N, C1, H // 2, W // 2)
    assert shortcut.shape == (N, C1, H, W)

    # --- has_pool=False (forward returns (x, shortcut) where x is shortcut) ---
    out_np, _ = down_conv(x, prep1, has_pool=False)
    out_np = jax.block_until_ready(out_np)
    ref_out_np, _ = _ref_down_conv(x, params1, has_pool=False)
    np.testing.assert_allclose(np.asarray(out_np), np.asarray(ref_out_np),
                               rtol=1e-4, atol=1e-5)
    assert out_np.shape == (N, C1, H, W)

    # --- chained blocks in NHWC: padded channels carried between blocks,
    #     no HBM channel-slice pass in between ---
    x_nhwc = jnp.transpose(x, (0, 2, 3, 1))
    p1_pad, _ = down_conv_nhwc(x_nhwc, prep1, has_pool=True)   # (N, 8, 8, 128)
    p2_pad, s2_pad = down_conv_nhwc(p1_pad, prep2, has_pool=True)
    p2_pad = jax.block_until_ready(p2_pad)
    p2 = jnp.transpose(p2_pad[..., :C2], (0, 3, 1, 2))
    s2 = jnp.transpose(s2_pad[..., :C2], (0, 3, 1, 2))
    ref_p1, _ = _ref_down_conv(x, params1, has_pool=True)
    ref_p2, ref_s2 = _ref_down_conv(ref_p1, params2, has_pool=True)
    np.testing.assert_allclose(np.asarray(p2), np.asarray(ref_p2),
                               rtol=1e-4, atol=1e-5)
    np.testing.assert_allclose(np.asarray(s2), np.asarray(ref_s2),
                               rtol=1e-4, atol=1e-5)

    # --- bf16 MXU-operand variant (v6e/v7x fast path), loose tolerance ---
    prep1_bf16 = prepare_down_conv_params(params1, compute_dtype=jnp.bfloat16)
    pooled_bf, shortcut_bf = down_conv(x, prep1_bf16, has_pool=True)
    pooled_bf = jax.block_until_ready(pooled_bf)
    np.testing.assert_allclose(np.asarray(pooled_bf), np.asarray(ref_pooled),
                               rtol=5e-2, atol=5e-2)
    np.testing.assert_allclose(np.asarray(shortcut_bf), np.asarray(ref_shortcut),
                               rtol=5e-2, atol=5e-2)

    print("KERNEL_OK")
</pallas_src>

<mosaic_0001>
module attributes {stable_mosaic.version = 11 : i64} {
  func.func @kernel(%arg0: i32, %arg1: memref<1x16x16x4xf32, #tpu.memory_space<vmem>>, %arg2: memref<9x4x128xf32, #tpu.memory_space<vmem>>, %arg3: memref<1x128xf32, #tpu.memory_space<vmem>>, %arg4: memref<9x128x128xf32, #tpu.memory_space<vmem>>, %arg5: memref<1x128xf32, #tpu.memory_space<vmem>>, %arg6: memref<1x8x8x128xf32, #tpu.memory_space<vmem>>, %arg7: memref<1x16x16x128xf32, #tpu.memory_space<vmem>>, %arg8: memref<18x32x4xf32, #tpu.memory_space<vmem>>, %arg9: memref<18x32x128xf32, #tpu.memory_space<vmem>>) attributes {dimension_semantics = [#tpu.dimension_semantics<parallel>], iteration_bounds = array<i64: 2>, scalar_prefetch = 0 : i64, scratch_operands = 2 : i64, tpu.core_type = #tpu.core_type<tc>, window_params = [{transform_indices = @transform_0, window_bounds = array<i64: 1, 16, 16, 4>}, {pipeline_mode = #tpu.pipeline_mode<synchronous>, transform_indices = @transform_1, window_bounds = array<i64: 9, 4, 128>}, {pipeline_mode = #tpu.pipeline_mode<synchronous>, transform_indices = @transform_2, window_bounds = array<i64: 1, 128>}, {pipeline_mode = #tpu.pipeline_mode<synchronous>, transform_indices = @transform_3, window_bounds = array<i64: 9, 128, 128>}, {pipeline_mode = #tpu.pipeline_mode<synchronous>, transform_indices = @transform_4, window_bounds = array<i64: 1, 128>}, {transform_indices = @transform_5, window_bounds = array<i64: 1, 8, 8, 128>}, {transform_indices = @transform_6, window_bounds = array<i64: 1, 16, 16, 128>}]} {
    %cst = arith.constant 0.000000e+00 : f32
    %0 = vector.broadcast %cst : f32 to vector<1x32x4xf32>
    %c0 = arith.constant 0 : index
    %c0_0 = arith.constant 0 : index
    %c0_1 = arith.constant 0 : index
    %1 = vector.load %arg8[%c0, %c0_0, %c0_1] : memref<18x32x4xf32, #tpu.memory_space<vmem>>, vector<1x32x4xf32>
    tpu.vector_store %arg8[%c0, %c0_0, %c0_1], %0 {strides = array<i32>} : memref<18x32x4xf32, #tpu.memory_space<vmem>>, vector<1x32x4xf32>,
    %cst_2 = arith.constant 0.000000e+00 : f32
    %2 = vector.broadcast %cst_2 : f32 to vector<1x32x4xf32>
    %c17 = arith.constant 17 : index
    %c0_3 = arith.constant 0 : index
    %c0_4 = arith.constant 0 : index
    %3 = vector.load %arg8[%c17, %c0_3, %c0_4] : memref<18x32x4xf32, #tpu.memory_space<vmem>>, vector<1x32x4xf32>
    tpu.vector_store %arg8[%c17, %c0_3, %c0_4], %2 {strides = array<i32>} : memref<18x32x4xf32, #tpu.memory_space<vmem>>, vector<1x32x4xf32>,
    %cst_5 = arith.constant 0.000000e+00 : f32
    %4 = vector.broadcast %cst_5 : f32 to vector<16x1x4xf32>
    %c1 = arith.constant 1 : index
    %c7 = arith.constant 7 : index
    %c0_6 = arith.constant 0 : index
    %5 = vector.load %arg8[%c1, %c7, %c0_6] : memref<18x32x4xf32, #tpu.memory_space<vmem>>, vector<16x1x4xf32>
    tpu.vector_store %arg8[%c1, %c7, %c0_6], %4 {strides = array<i32>} : memref<18x32x4xf32, #tpu.memory_space<vmem>>, vector<16x1x4xf32>,
    %cst_7 = arith.constant 0.000000e+00 : f32
    %6 = vector.broadcast %cst_7 : f32 to vector<16x1x4xf32>
    %c1_8 = arith.constant 1 : index
    %c24 = arith.constant 24 : index
    %c0_9 = arith.constant 0 : index
    %7 = vector.load %arg8[%c1_8, %c24, %c0_9] : memref<18x32x4xf32, #tpu.memory_space<vmem>>, vector<16x1x4xf32>
    tpu.vector_store %arg8[%c1_8, %c24, %c0_9], %6 {strides = array<i32>} : memref<18x32x4xf32, #tpu.memory_space<vmem>>, vector<16x1x4xf32>,
    %cst_10 = arith.constant 0.000000e+00 : f32
    %8 = vector.broadcast %cst_10 : f32 to vector<1x32x128xf32>
    %c0_11 = arith.constant 0 : index
    %c0_12 = arith.constant 0 : index
    %c0_13 = arith.constant 0 : index
    %9 = vector.load %arg9[%c0_11, %c0_12, %c0_13] : memref<18x32x128xf32, #tpu.memory_space<vmem>>, vector<1x32x128xf32>
    tpu.vector_store %arg9[%c0_11, %c0_12, %c0_13], %8 {strides = array<i32>} : memref<18x32x128xf32, #tpu.memory_space<vmem>>, vector<1x32x128xf32>,
    %cst_14 = arith.constant 0.000000e+00 : f32
    %10 = vector.broadcast %cst_14 : f32 to vector<1x32x128xf32>
    %c17_15 = arith.constant 17 : index
    %c0_16 = arith.constant 0 : index
    %c0_17 = arith.constant 0 : index
    %11 = vector.load %arg9[%c17_15, %c0_16, %c0_17] : memref<18x32x128xf32, #tpu.memory_space<vmem>>, vector<1x32x128xf32>
    tpu.vector_store %arg9[%c17_15, %c0_16, %c0_17], %10 {strides = array<i32>} : memref<18x32x128xf32, #tpu.memory_space<vmem>>, vector<1x32x128xf32>,
    %cst_18 = arith.constant 0.000000e+00 : f32
    %12 = vector.broadcast %cst_18 : f32 to vector<16x1x128xf32>
    %c1_19 = arith.constant 1 : index
    %c7_20 = arith.constant 7 : index
    %c0_21 = arith.constant 0 : index
    %13 = vector.load %arg9[%c1_19, %c7_20, %c0_21] : memref<18x32x128xf32, #tpu.memory_space<vmem>>, vector<16x1x128xf32>
    tpu.vector_store %arg9[%c1_19, %c7_20, %c0_21], %12 {strides = array<i32>} : memref<18x32x128xf32, #tpu.memory_space<vmem>>, vector<16x1x128xf32>,
    %cst_22 = arith.constant 0.000000e+00 : f32
    %14 = vector.broadcast %cst_22 : f32 to vector<16x1x128xf32>
    %c1_23 = arith.constant 1 : index
    %c24_24 = arith.constant 24 : index
    %c0_25 = arith.constant 0 : index
    %15 = vector.load %arg9[%c1_23, %c24_24, %c0_25] : memref<18x32x128xf32, #tpu.memory_space<vmem>>, vector<16x1x128xf32>
    tpu.vector_store %arg9[%c1_23, %c24_24, %c0_25], %14 {strides = array<i32>} : memref<18x32x128xf32, #tpu.memory_space<vmem>>, vector<16x1x128xf32>,
    %c0_26 = arith.constant 0 : index
    %c0_27 = arith.constant 0 : index
    %c0_28 = arith.constant 0 : index
    %c0_29 = arith.constant 0 : index
    %16 = vector.load %arg1[%c0_26, %c0_27, %c0_28, %c0_29] : memref<1x16x16x4xf32, #tpu.memory_space<vmem>>, vector<1x16x16x4xf32>
    %17 = vector.shape_cast %16 : vector<1x16x16x4xf32> to vector<16x16x4xf32>
    %c1_30 = arith.constant 1 : index
    %c8 = arith.constant 8 : index
    %c0_31 = arith.constant 0 : index
    %18 = vector.load %arg8[%c1_30, %c8, %c0_31] : memref<18x32x4xf32, #tpu.memory_space<vmem>>, vector<16x16x4xf32>
    tpu.vector_store %arg8[%c1_30, %c8, %c0_31], %17 {strides = array<i32>} : memref<18x32x4xf32, #tpu.memory_space<vmem>>, vector<16x16x4xf32>,
    %c0_32 = arith.constant 0 : index
    %c7_33 = arith.constant 7 : index
    %c0_34 = arith.constant 0 : index
    %19 = vector.load %arg8[%c0_32, %c7_33, %c0_34] : memref<18x32x4xf32, #tpu.memory_space<vmem>>, vector<16x16x4xf32>
    %20 = vector.shape_cast %19 : vector<16x16x4xf32> to vector<256x4xf32>
    %c0_35 = arith.constant 0 : index
    %c0_36 = arith.constant 0 : index
    %c0_37 = arith.constant 0 : index
    %21 = vector.load %arg2[%c0_35, %c0_36, %c0_37] : memref<9x4x128xf32, #tpu.memory_space<vmem>>, vector<1x4x128xf32>
    %22 = vector.shape_cast %21 : vector<1x4x128xf32> to vector<4x128xf32>
    %cst_38 = arith.constant dense<0.000000e+00> : vector<256x128xf32>
    %23 = tpu.matmul %20, %22, %cst_38 {dimension_numbers = #tpu.dot_dimension_numbers<[1], [0], [0], [1], [0, 0, 1, 1], [], []>} : vector<256x4xf32>, vector<4x128xf32>, vector<256x128xf32> -> vector<256x128xf32>
    %c0_39 = arith.constant 0 : index
    %c8_40 = arith.constant 8 : index
    %c0_41 = arith.constant 0 : index
    %24 = vector.load %arg8[%c0_39, %c8_40, %c0_41] : memref<18x32x4xf32, #tpu.memory_space<vmem>>, vector<16x16x4xf32>
    %25 = vector.shape_cast %24 : vector<16x16x4xf32> to vector<256x4xf32>
    %c1_42 = arith.constant 1 : index
    %c0_43 = arith.constant 0 : index
    %c0_44 = arith.constant 0 : index
    %26 = vector.load %arg2[%c1_42, %c0_43, %c0_44] : memref<9x4x128xf32, #tpu.memory_space<vmem>>, vector<1x4x128xf32>
    %27 = vector.shape_cast %26 : vector<1x4x128xf32> to vector<4x128xf32>
    %cst_45 = arith.constant dense<0.000000e+00> : vector<256x128xf32>
    %28 = tpu.matmul %25, %27, %cst_45 {dimension_numbers = #tpu.dot_dimension_numbers<[1], [0], [0], [1], [0, 0, 1, 1], [], []>} : vector<256x4xf32>, vector<4x128xf32>, vector<256x128xf32> -> vector<256x128xf32>
    %29 = arith.addf %23, %28 : vector<256x128xf32>
    %c0_46 = arith.constant 0 : index
    %c9 = arith.constant 9 : index
    %c0_47 = arith.constant 0 : index
    %30 = vector.load %arg8[%c0_46, %c9, %c0_47] : memref<18x32x4xf32, #tpu.memory_space<vmem>>, vector<16x16x4xf32>
    %31 = vector.shape_cast %30 : vector<16x16x4xf32> to vector<256x4xf32>
    %c2 = arith.constant 2 : index
    %c0_48 = arith.constant 0 : index
    %c0_49 = arith.constant 0 : index
    %32 = vector.load %arg2[%c2, %c0_48, %c0_49] : memref<9x4x128xf32, #tpu.memory_space<vmem>>, vector<1x4x128xf32>
    %33 = vector.shape_cast %32 : vector<1x4x128xf32> to vector<4x128xf32>
    %cst_50 = arith.constant dense<0.000000e+00> : vector<256x128xf32>
    %34 = tpu.matmul %31, %33, %cst_50 {dimension_numbers = #tpu.dot_dimension_numbers<[1], [0], [0], [1], [0, 0, 1, 1], [], []>} : vector<256x4xf32>, vector<4x128xf32>, vector<256x128xf32> -> vector<256x128xf32>
    %35 = arith.addf %29, %34 : vector<256x128xf32>
    %c1_51 = arith.constant 1 : index
    %c7_52 = arith.constant 7 : index
    %c0_53 = arith.constant 0 : index
    %36 = vector.load %arg8[%c1_51, %c7_52, %c0_53] : memref<18x32x4xf32, #tpu.memory_space<vmem>>, vector<16x16x4xf32>
    %37 = vector.shape_cast %36 : vector<16x16x4xf32> to vector<256x4xf32>
    %c3 = arith.constant 3 : index
    %c0_54 = arith.constant 0 : index
    %c0_55 = arith.constant 0 : index
    %38 = vector.load %arg2[%c3, %c0_54, %c0_55] : memref<9x4x128xf32, #tpu.memory_space<vmem>>, vector<1x4x128xf32>
    %39 = vector.shape_cast %38 : vector<1x4x128xf32> to vector<4x128xf32>
    %cst_56 = arith.constant dense<0.000000e+00> : vector<256x128xf32>
    %40 = tpu.matmul %37, %39, %cst_56 {dimension_numbers = #tpu.dot_dimension_numbers<[1], [0], [0], [1], [0, 0, 1, 1], [], []>} : vector<256x4xf32>, vector<4x128xf32>, vector<256x128xf32> -> vector<256x128xf32>
    %41 = arith.addf %35, %40 : vector<256x128xf32>
    %c1_57 = arith.constant 1 : index
    %c8_58 = arith.constant 8 : index
    %c0_59 = arith.constant 0 : index
    %42 = vector.load %arg8[%c1_57, %c8_58, %c0_59] : memref<18x32x4xf32, #tpu.memory_space<vmem>>, vector<16x16x4xf32>
    %43 = vector.shape_cast %42 : vector<16x16x4xf32> to vector<256x4xf32>
    %c4 = arith.constant 4 : index
    %c0_60 = arith.constant 0 : index
    %c0_61 = arith.constant 0 : index
    %44 = vector.load %arg2[%c4, %c0_60, %c0_61] : memref<9x4x128xf32, #tpu.memory_space<vmem>>, vector<1x4x128xf32>
    %45 = vector.shape_cast %44 : vector<1x4x128xf32> to vector<4x128xf32>
    %cst_62 = arith.constant dense<0.000000e+00> : vector<256x128xf32>
    %46 = tpu.matmul %43, %45, %cst_62 {dimension_numbers = #tpu.dot_dimension_numbers<[1], [0], [0], [1], [0, 0, 1, 1], [], []>} : vector<256x4xf32>, vector<4x128xf32>, vector<256x128xf32> -> vector<256x128xf32>
    %47 = arith.addf %41, %46 : vector<256x128xf32>
    %c1_63 = arith.constant 1 : index
    %c9_64 = arith.constant 9 : index
    %c0_65 = arith.constant 0 : index
    %48 = vector.load %arg8[%c1_63, %c9_64, %c0_65] : memref<18x32x4xf32, #tpu.memory_space<vmem>>, vector<16x16x4xf32>
    %49 = vector.shape_cast %48 : vector<16x16x4xf32> to vector<256x4xf32>
    %c5 = arith.constant 5 : index
    %c0_66 = arith.constant 0 : index
    %c0_67 = arith.constant 0 : index
    %50 = vector.load %arg2[%c5, %c0_66, %c0_67] : memref<9x4x128xf32, #tpu.memory_space<vmem>>, vector<1x4x128xf32>
    %51 = vector.shape_cast %50 : vector<1x4x128xf32> to vector<4x128xf32>
    %cst_68 = arith.constant dense<0.000000e+00> : vector<256x128xf32>
    %52 = tpu.matmul %49, %51, %cst_68 {dimension_numbers = #tpu.dot_dimension_numbers<[1], [0], [0], [1], [0, 0, 1, 1], [], []>} : vector<256x4xf32>, vector<4x128xf32>, vector<256x128xf32> -> vector<256x128xf32>
    %53 = arith.addf %47, %52 : vector<256x128xf32>
    %c2_69 = arith.constant 2 : index
    %c7_70 = arith.constant 7 : index
    %c0_71 = arith.constant 0 : index
    %54 = vector.load %arg8[%c2_69, %c7_70, %c0_71] : memref<18x32x4xf32, #tpu.memory_space<vmem>>, vector<16x16x4xf32>
    %55 = vector.shape_cast %54 : vector<16x16x4xf32> to vector<256x4xf32>
    %c6 = arith.constant 6 : index
    %c0_72 = arith.constant 0 : index
    %c0_73 = arith.constant 0 : index
    %56 = vector.load %arg2[%c6, %c0_72, %c0_73] : memref<9x4x128xf32, #tpu.memory_space<vmem>>, vector<1x4x128xf32>
    %57 = vector.shape_cast %56 : vector<1x4x128xf32> to vector<4x128xf32>
    %cst_74 = arith.constant dense<0.000000e+00> : vector<256x128xf32>
    %58 = tpu.matmul %55, %57, %cst_74 {dimension_numbers = #tpu.dot_dimension_numbers<[1], [0], [0], [1], [0, 0, 1, 1], [], []>} : vector<256x4xf32>, vector<4x128xf32>, vector<256x128xf32> -> vector<256x128xf32>
    %59 = arith.addf %53, %58 : vector<256x128xf32>
    %c2_75 = arith.constant 2 : index
    %c8_76 = arith.constant 8 : index
    %c0_77 = arith.constant 0 : index
    %60 = vector.load %arg8[%c2_75, %c8_76, %c0_77] : memref<18x32x4xf32, #tpu.memory_space<vmem>>, vector<16x16x4xf32>
    %61 = vector.shape_cast %60 : vector<16x16x4xf32> to vector<256x4xf32>
    %c7_78 = arith.constant 7 : index
    %c0_79 = arith.constant 0 : index
    %c0_80 = arith.constant 0 : index
    %62 = vector.load %arg2[%c7_78, %c0_79, %c0_80] : memref<9x4x128xf32, #tpu.memory_space<vmem>>, vector<1x4x128xf32>
    %63 = vector.shape_cast %62 : vector<1x4x128xf32> to vector<4x128xf32>
    %cst_81 = arith.constant dense<0.000000e+00> : vector<256x128xf32>
    %64 = tpu.matmul %61, %63, %cst_81 {dimension_numbers = #tpu.dot_dimension_numbers<[1], [0], [0], [1], [0, 0, 1, 1], [], []>} : vector<256x4xf32>, vector<4x128xf32>, vector<256x128xf32> -> vector<256x128xf32>
    %65 = arith.addf %59, %64 : vector<256x128xf32>
    %c2_82 = arith.constant 2 : index
    %c9_83 = arith.constant 9 : index
    %c0_84 = arith.constant 0 : index
    %66 = vector.load %arg8[%c2_82, %c9_83, %c0_84] : memref<18x32x4xf32, #tpu.memory_space<vmem>>, vector<16x16x4xf32>
    %67 = vector.shape_cast %66 : vector<16x16x4xf32> to vector<256x4xf32>
    %c8_85 = arith.constant 8 : index
    %c0_86 = arith.constant 0 : index
    %c0_87 = arith.constant 0 : index
    %68 = vector.load %arg2[%c8_85, %c0_86, %c0_87] : memref<9x4x128xf32, #tpu.memory_space<vmem>>, vector<1x4x128xf32>
    %69 = vector.shape_cast %68 : vector<1x4x128xf32> to vector<4x128xf32>
    %cst_88 = arith.constant dense<0.000000e+00> : vector<256x128xf32>
    %70 = tpu.matmul %67, %69, %cst_88 {dimension_numbers = #tpu.dot_dimension_numbers<[1], [0], [0], [1], [0, 0, 1, 1], [], []>} : vector<256x4xf32>, vector<4x128xf32>, vector<256x128xf32> -> vector<256x128xf32>
    %71 = arith.addf %65, %70 : vector<256x128xf32>
    %c0_89 = arith.constant 0 : index
    %c0_90 = arith.constant 0 : index
    %72 = vector.load %arg3[%c0_89, %c0_90] : memref<1x128xf32, #tpu.memory_space<vmem>>, vector<1x128xf32>
    %73 = vector.broadcast %72 : vector<1x128xf32> to vector<256x128xf32>
    %74 = arith.addf %71, %73 : vector<256x128xf32>
    %cst_91 = arith.constant 0.000000e+00 : f32
    %75 = vector.broadcast %cst_91 : f32 to vector<256x128xf32>
    %76 = arith.maximumf %74, %75 : vector<256x128xf32>
    %77 = vector.shape_cast %76 : vector<256x128xf32> to vector<16x16x128xf32>
    %c1_92 = arith.constant 1 : index
    %c8_93 = arith.constant 8 : index
    %c0_94 = arith.constant 0 : index
    %78 = vector.load %arg9[%c1_92, %c8_93, %c0_94] : memref<18x32x128xf32, #tpu.memory_space<vmem>>, vector<16x16x128xf32>
    tpu.vector_store %arg9[%c1_92, %c8_93, %c0_94], %77 {strides = array<i32>} : memref<18x32x128xf32, #tpu.memory_space<vmem>>, vector<16x16x128xf32>,
    %c0_95 = arith.constant 0 : index
    %c7_96 = arith.constant 7 : index
    %c0_97 = arith.constant 0 : index
    %79 = vector.load %arg9[%c0_95, %c7_96, %c0_97] : memref<18x32x128xf32, #tpu.memory_space<vmem>>, vector<16x16x128xf32>
    %80 = vector.shape_cast %79 : vector<16x16x128xf32> to vector<256x128xf32>
    %c0_98 = arith.constant 0 : index
    %c0_99 = arith.constant 0 : index
    %c0_100 = arith.constant 0 : index
    %81 = vector.load %arg4[%c0_98, %c0_99, %c0_100] : memref<9x128x128xf32, #tpu.memory_space<vmem>>, vector<1x128x128xf32>
    %82 = vector.shape_cast %81 : vector<1x128x128xf32> to vector<128x128xf32>
    %cst_101 = arith.constant dense<0.000000e+00> : vector<256x128xf32>
    %83 = tpu.matmul %80, %82, %cst_101 {dimension_numbers = #tpu.dot_dimension_numbers<[1], [0], [0], [1], [0, 0, 1, 1], [], []>} : vector<256x128xf32>, vector<128x128xf32>, vector<256x128xf32> -> vector<256x128xf32>
    %c0_102 = arith.constant 0 : index
    %c8_103 = arith.constant 8 : index
    %c0_104 = arith.constant 0 : index
    %84 = vector.load %arg9[%c0_102, %c8_103, %c0_104] : memref<18x32x128xf32, #tpu.memory_space<vmem>>, vector<16x16x128xf32>
    %85 = vector.shape_cast %84 : vector<16x16x128xf32> to vector<256x128xf32>
    %c1_105 = arith.constant 1 : index
    %c0_106 = arith.constant 0 : index
    %c0_107 = arith.constant 0 : index
    %86 = vector.load %arg4[%c1_105, %c0_106, %c0_107] : memref<9x128x128xf32, #tpu.memory_space<vmem>>, vector<1x128x128xf32>
    %87 = vector.shape_cast %86 : vector<1x128x128xf32> to vector<128x128xf32>
    %cst_108 = arith.constant dense<0.000000e+00> : vector<256x128xf32>
    %88 = tpu.matmul %85, %87, %cst_108 {dimension_numbers = #tpu.dot_dimension_numbers<[1], [0], [0], [1], [0, 0, 1, 1], [], []>} : vector<256x128xf32>, vector<128x128xf32>, vector<256x128xf32> -> vector<256x128xf32>
    %89 = arith.addf %83, %88 : vector<256x128xf32>
    %c0_109 = arith.constant 0 : index
    %c9_110 = arith.constant 9 : index
    %c0_111 = arith.constant 0 : index
    %90 = vector.load %arg9[%c0_109, %c9_110, %c0_111] : memref<18x32x128xf32, #tpu.memory_space<vmem>>, vector<16x16x128xf32>
    %91 = vector.shape_cast %90 : vector<16x16x128xf32> to vector<256x128xf32>
    %c2_112 = arith.constant 2 : index
    %c0_113 = arith.constant 0 : index
    %c0_114 = arith.constant 0 : index
    %92 = vector.load %arg4[%c2_112, %c0_113, %c0_114] : memref<9x128x128xf32, #tpu.memory_space<vmem>>, vector<1x128x128xf32>
    %93 = vector.shape_cast %92 : vector<1x128x128xf32> to vector<128x128xf32>
    %cst_115 = arith.constant dense<0.000000e+00> : vector<256x128xf32>
    %94 = tpu.matmul %91, %93, %cst_115 {dimension_numbers = #tpu.dot_dimension_numbers<[1], [0], [0], [1], [0, 0, 1, 1], [], []>} : vector<256x128xf32>, vector<128x128xf32>, vector<256x128xf32> -> vector<256x128xf32>
    %95 = arith.addf %89, %94 : vector<256x128xf32>
    %c1_116 = arith.constant 1 : index
    %c7_117 = arith.constant 7 : index
    %c0_118 = arith.constant 0 : index
    %96 = vector.load %arg9[%c1_116, %c7_117, %c0_118] : memref<18x32x128xf32, #tpu.memory_space<vmem>>, vector<16x16x128xf32>
    %97 = vector.shape_cast %96 : vector<16x16x128xf32> to vector<256x128xf32>
    %c3_119 = arith.constant 3 : index
    %c0_120 = arith.constant 0 : index
    %c0_121 = arith.constant 0 : index
    %98 = vector.load %arg4[%c3_119, %c0_120, %c0_121] : memref<9x128x128xf32, #tpu.memory_space<vmem>>, vector<1x128x128xf32>
    %99 = vector.shape_cast %98 : vector<1x128x128xf32> to vector<128x128xf32>
    %cst_122 = arith.constant dense<0.000000e+00> : vector<256x128xf32>
    %100 = tpu.matmul %97, %99, %cst_122 {dimension_numbers = #tpu.dot_dimension_numbers<[1], [0], [0], [1], [0, 0, 1, 1], [], []>} : vector<256x128xf32>, vector<128x128xf32>, vector<256x128xf32> -> vector<256x128xf32>
    %101 = arith.addf %95, %100 : vector<256x128xf32>
    %c1_123 = arith.constant 1 : index
    %c8_124 = arith.constant 8 : index
    %c0_125 = arith.constant 0 : index
    %102 = vector.load %arg9[%c1_123, %c8_124, %c0_125] : memref<18x32x128xf32, #tpu.memory_space<vmem>>, vector<16x16x128xf32>
    %103 = vector.shape_cast %102 : vector<16x16x128xf32> to vector<256x128xf32>
    %c4_126 = arith.constant 4 : index
    %c0_127 = arith.constant 0 : index
    %c0_128 = arith.constant 0 : index
    %104 = vector.load %arg4[%c4_126, %c0_127, %c0_128] : memref<9x128x128xf32, #tpu.memory_space<vmem>>, vector<1x128x128xf32>
    %105 = vector.shape_cast %104 : vector<1x128x128xf32> to vector<128x128xf32>
    %cst_129 = arith.constant dense<0.000000e+00> : vector<256x128xf32>
    %106 = tpu.matmul %103, %105, %cst_129 {dimension_numbers = #tpu.dot_dimension_numbers<[1], [0], [0], [1], [0, 0, 1, 1], [], []>} : vector<256x128xf32>, vector<128x128xf32>, vector<256x128xf32> -> vector<256x128xf32>
    %107 = arith.addf %101, %106 : vector<256x128xf32>
    %c1_130 = arith.constant 1 : index
    %c9_131 = arith.constant 9 : index
    %c0_132 = arith.constant 0 : index
    %108 = vector.load %arg9[%c1_130, %c9_131, %c0_132] : memref<18x32x128xf32, #tpu.memory_space<vmem>>, vector<16x16x128xf32>
    %109 = vector.shape_cast %108 : vector<16x16x128xf32> to vector<256x128xf32>
    %c5_133 = arith.constant 5 : index
    %c0_134 = arith.constant 0 : index
    %c0_135 = arith.constant 0 : index
    %110 = vector.load %arg4[%c5_133, %c0_134, %c0_135] : memref<9x128x128xf32, #tpu.memory_space<vmem>>, vector<1x128x128xf32>
    %111 = vector.shape_cast %110 : vector<1x128x128xf32> to vector<128x128xf32>
    %cst_136 = arith.constant dense<0.000000e+00> : vector<256x128xf32>
    %112 = tpu.matmul %109, %111, %cst_136 {dimension_numbers = #tpu.dot_dimension_numbers<[1], [0], [0], [1], [0, 0, 1, 1], [], []>} : vector<256x128xf32>, vector<128x128xf32>, vector<256x128xf32> -> vector<256x128xf32>
    %113 = arith.addf %107, %112 : vector<256x128xf32>
    %c2_137 = arith.constant 2 : index
    %c7_138 = arith.constant 7 : index
    %c0_139 = arith.constant 0 : index
    %114 = vector.load %arg9[%c2_137, %c7_138, %c0_139] : memref<18x32x128xf32, #tpu.memory_space<vmem>>, vector<16x16x128xf32>
    %115 = vector.shape_cast %114 : vector<16x16x128xf32> to vector<256x128xf32>
    %c6_140 = arith.constant 6 : index
    %c0_141 = arith.constant 0 : index
    %c0_142 = arith.constant 0 : index
    %116 = vector.load %arg4[%c6_140, %c0_141, %c0_142] : memref<9x128x128xf32, #tpu.memory_space<vmem>>, vector<1x128x128xf32>
    %117 = vector.shape_cast %116 : vector<1x128x128xf32> to vector<128x128xf32>
    %cst_143 = arith.constant dense<0.000000e+00> : vector<256x128xf32>
    %118 = tpu.matmul %115, %117, %cst_143 {dimension_numbers = #tpu.dot_dimension_numbers<[1], [0], [0], [1], [0, 0, 1, 1], [], []>} : vector<256x128xf32>, vector<128x128xf32>, vector<256x128xf32> -> vector<256x128xf32>
    %119 = arith.addf %113, %118 : vector<256x128xf32>
    %c2_144 = arith.constant 2 : index
    %c8_145 = arith.constant 8 : index
    %c0_146 = arith.constant 0 : index
    %120 = vector.load %arg9[%c2_144, %c8_145, %c0_146] : memref<18x32x128xf32, #tpu.memory_space<vmem>>, vector<16x16x128xf32>
    %121 = vector.shape_cast %120 : vector<16x16x128xf32> to vector<256x128xf32>
    %c7_147 = arith.constant 7 : index
    %c0_148 = arith.constant 0 : index
    %c0_149 = arith.constant 0 : index
    %122 = vector.load %arg4[%c7_147, %c0_148, %c0_149] : memref<9x128x128xf32, #tpu.memory_space<vmem>>, vector<1x128x128xf32>
    %123 = vector.shape_cast %122 : vector<1x128x128xf32> to vector<128x128xf32>
    %cst_150 = arith.constant dense<0.000000e+00> : vector<256x128xf32>
    %124 = tpu.matmul %121, %123, %cst_150 {dimension_numbers = #tpu.dot_dimension_numbers<[1], [0], [0], [1], [0, 0, 1, 1], [], []>} : vector<256x128xf32>, vector<128x128xf32>, vector<256x128xf32> -> vector<256x128xf32>
    %125 = arith.addf %119, %124 : vector<256x128xf32>
    %c2_151 = arith.constant 2 : index
    %c9_152 = arith.constant 9 : index
    %c0_153 = arith.constant 0 : index
    %126 = vector.load %arg9[%c2_151, %c9_152, %c0_153] : memref<18x32x128xf32, #tpu.memory_space<vmem>>, vector<16x16x128xf32>
    %127 = vector.shape_cast %126 : vector<16x16x128xf32> to vector<256x128xf32>
    %c8_154 = arith.constant 8 : index
    %c0_155 = arith.constant 0 : index
    %c0_156 = arith.constant 0 : index
    %128 = vector.load %arg4[%c8_154, %c0_155, %c0_156] : memref<9x128x128xf32, #tpu.memory_space<vmem>>, vector<1x128x128xf32>
    %129 = vector.shape_cast %128 : vector<1x128x128xf32> to vector<128x128xf32>
    %cst_157 = arith.constant dense<0.000000e+00> : vector<256x128xf32>
    %130 = tpu.matmul %127, %129, %cst_157 {dimension_numbers = #tpu.dot_dimension_numbers<[1], [0], [0], [1], [0, 0, 1, 1], [], []>} : vector<256x128xf32>, vector<128x128xf32>, vector<256x128xf32> -> vector<256x128xf32>
    %131 = arith.addf %125, %130 : vector<256x128xf32>
    %c0_158 = arith.constant 0 : index
    %c0_159 = arith.constant 0 : index
    %132 = vector.load %arg5[%c0_158, %c0_159] : memref<1x128xf32, #tpu.memory_space<vmem>>, vector<1x128xf32>
    %133 = vector.broadcast %132 : vector<1x128xf32> to vector<256x128xf32>
    %134 = arith.addf %131, %133 : vector<256x128xf32>
    %cst_160 = arith.constant 0.000000e+00 : f32
    %135 = vector.broadcast %cst_160 : f32 to vector<256x128xf32>
    %136 = arith.maximumf %134, %135 : vector<256x128xf32>
    %137 = vector.shape_cast %136 : vector<256x128xf32> to vector<16x16x128xf32>
    %c0_161 = arith.constant 0 : index
    %c0_162 = arith.constant 0 : index
    %c0_163 = arith.constant 0 : index
    %c0_164 = arith.constant 0 : index
    %138 = vector.load %arg7[%c0_161, %c0_162, %c0_163, %c0_164] : memref<1x16x16x128xf32, #tpu.memory_space<vmem>>, vector<1x16x16x128xf32>
    %139 = vector.shape_cast %138 : vector<1x16x16x128xf32> to vector<16x16x128xf32>
    %140 = vector.shape_cast %137 : vector<16x16x128xf32> to vector<1x16x16x128xf32>
    tpu.vector_store %arg7[%c0_161, %c0_162, %c0_163, %c0_164], %140 {strides = array<i32>} : memref<1x16x16x128xf32, #tpu.memory_space<vmem>>, vector<1x16x16x128xf32>,
    %141 = vector.shape_cast %137 : vector<16x16x128xf32> to vector<8x2x16x128xf32>
    %142 = vector.extract_strided_slice %141 {offsets = [0, 0, 0, 0], sizes = [8, 1, 16, 128], strides = [1, 1, 1, 1]} : vector<8x2x16x128xf32> to vector<8x1x16x128xf32>
    %143 = vector.shape_cast %142 : vector<8x1x16x128xf32> to vector<8x16x128xf32>
    %144 = vector.extract_strided_slice %141 {offsets = [0, 1, 0, 0], sizes = [8, 1, 16, 128], strides = [1, 1, 1, 1]} : vector<8x2x16x128xf32> to vector<8x1x16x128xf32>
    %145 = vector.shape_cast %144 : vector<8x1x16x128xf32> to vector<8x16x128xf32>
    %146 = arith.maximumf %143, %145 : vector<8x16x128xf32>
    %147 = vector.shape_cast %146 : vector<8x16x128xf32> to vector<8x8x256xf32>
    %148 = vector.extract_strided_slice %147 {offsets = [0, 0, 0], sizes = [8, 8, 128], strides = [1, 1, 1]} : vector<8x8x256xf32> to vector<8x8x128xf32>
    %149 = vector.extract_strided_slice %147 {offsets = [0, 0, 128], sizes = [8, 8, 128], strides = [1, 1, 1]} : vector<8x8x256xf32> to vector<8x8x128xf32>
    %150 = arith.maximumf %148, %149 : vector<8x8x128xf32>
    %c0_165 = arith.constant 0 : index
    %c0_166 = arith.constant 0 : index
    %c0_167 = arith.constant 0 : index
    %c0_168 = arith.constant 0 : index
    %151 = vector.load %arg6[%c0_165, %c0_166, %c0_167, %c0_168] : memref<1x8x8x128xf32, #tpu.memory_space<vmem>>, vector<1x8x8x128xf32>
    %152 = vector.shape_cast %151 : vector<1x8x8x128xf32> to vector<8x8x128xf32>
    %153 = vector.shape_cast %150 : vector<8x8x128xf32> to vector<1x8x8x128xf32>
    tpu.vector_store %arg6[%c0_165, %c0_166, %c0_167, %c0_168], %153 {strides = array<i32>} : memref<1x8x8x128xf32, #tpu.memory_space<vmem>>, vector<1x8x8x128xf32>,
    return
  }
  func.func @transform_0(%arg0: i32) -> (i32, i32, i32, i32) {
    %c0_i32 = arith.constant 0 : i32
    %c0_i32_0 = arith.constant 0 : i32
    %c0_i32_1 = arith.constant 0 : i32
    %c0_i32_2 = arith.constant 0 : i32
    return %arg0, %c0_i32, %c0_i32_0, %c0_i32_1 : i32, i32, i32, i32
  }
  func.func @transform_1(%arg0: i32) -> (i32, i32, i32) {
    %c0_i32 = arith.constant 0 : i32
    %c0_i32_0 = arith.constant 0 : i32
    %c0_i32_1 = arith.constant 0 : i32
    %c0_i32_2 = arith.constant 0 : i32
    return %c0_i32, %c0_i32_0, %c0_i32_1 : i32, i32, i32
  }
  func.func @transform_2(%arg0: i32) -> (i32, i32) {
    %c0_i32 = arith.constant 0 : i32
    %c0_i32_0 = arith.constant 0 : i32
    %c0_i32_1 = arith.constant 0 : i32
    return %c0_i32, %c0_i32_0 : i32, i32
  }
  func.func @transform_3(%arg0: i32) -> (i32, i32, i32) {
    %c0_i32 = arith.constant 0 : i32
    %c0_i32_0 = arith.constant 0 : i32
    %c0_i32_1 = arith.constant 0 : i32
    %c0_i32_2 = arith.constant 0 : i32
    return %c0_i32, %c0_i32_0, %c0_i32_1 : i32, i32, i32
  }
  func.func @transform_4(%arg0: i32) -> (i32, i32) {
    %c0_i32 = arith.constant 0 : i32
    %c0_i32_0 = arith.constant 0 : i32
    %c0_i32_1 = arith.constant 0 : i32
    return %c0_i32, %c0_i32_0 : i32, i32
  }
  func.func @transform_5(%arg0: i32) -> (i32, i32, i32, i32) {
    %c0_i32 = arith.constant 0 : i32
    %c0_i32_0 = arith.constant 0 : i32
    %c0_i32_1 = arith.constant 0 : i32
    %c0_i32_2 = arith.constant 0 : i32
    return %arg0, %c0_i32, %c0_i32_0, %c0_i32_1 : i32, i32, i32, i32
  }
  func.func @transform_6(%arg0: i32) -> (i32, i32, i32, i32) {
    %c0_i32 = arith.constant 0 : i32
    %c0_i32_0 = arith.constant 0 : i32
    %c0_i32_1 = arith.constant 0 : i32
    %c0_i32_2 = arith.constant 0 : i32
    return %arg0, %c0_i32, %c0_i32_0, %c0_i32_1 : i32, i32, i32, i32
  }
}

</mosaic_0001>

<bundles_post_ra>
// kernel: tpu_custom_call.1
= control target key start
LH: loop header
LB: loop body
LE: loop exit
PB: predicated region body
PF: predicated region fallthrough
CT: control target
= control target key end

     0   :  { %s7819_s0 = inlined_call_operand.vmem [shape: f32[2,16,16,4], index: 0, kind: input, shape index: {}]   ;;  %s7820_s1 = inlined_call_operand.vmem [shape: f32[9,4,128], index: 1, kind: input, shape index: {}]   ;;  %s7821_s2 = inlined_call_operand.vmem [shape: f32[1,128], index: 2, kind: input, shape index: {}]   ;;  %s7822_s3 = inlined_call_operand.hbm [shape: f32[9,128,128], index: 3, kind: input, shape index: {}]   ;;  %s7823_s4 = inlined_call_operand.vmem [shape: f32[1,128], index: 4, kind: input, shape index: {}]   ;;  %s7824_s5 = inlined_call_operand.hbm [shape: f32[2,8,8,128], index: 5, kind: output, shape index: {0}]   ;;  %s7825_s6 = inlined_call_operand.hbm [shape: f32[2,16,16,128], index: 6, kind: output, shape index: {1}]  }
   0x1   :  { %7849 = sst [smem:[#allocation54_spill]] %s7819_s0 }
   0x2   :  { %12 = vsyncpa [#allocation5], 0 }
   0x3   :  { %13 = vsyncpa [#allocation6], 0 }
   0x4   :  { %15 = vsyncpa [#allocation6 + $0x1], 0 }
   0x5   :  { %16 = vsyncpa [#allocation9], 0 }
   0x6   :  { %18 = vsyncpa [#allocation9 + $0x1], 0  ;;  %s5668_s21 = smov 0   ;;  %s5670_s22 = smov 0  }
   0x7   :  { %s5672_s23 = smov 0   ;;  %s5674_s24 = smov 0  }
   0x8 LB: > { %s5689_s25 = sadd.s32 4294967295, %s5624_s24   ;;  %s5101_s26 = sadd.s32 4294967294, %s5624_s24   ;;  %s5624_s24 = sphi %s5674_s24, %s8008_s24   ;;  %s5620_s23 = sphi %s5672_s23, %s8007_s23   ;;  %s5616_s22 = sphi %s5670_s22, %s8006_s22   ;;  %s5612_s21 = sphi %s5668_s21, %s8005_s21  }
   0x9   : > { %s5693_s27 = sadd.s32 1, %s5624_s24   ;;  %s141_s28 = sadd.s32 1, %s5620_s23 }
   0xa   : > { %s138_s29 = ssub.s32 %s5624_s24, %s5693_s27  ;;  %p151_p0 = scmp.ne.s32.totalorder %s5620_s23, %s5616_s22 }
   0xb   : > { %p139_p1 = scmp.eq.s32.totalorder %s138_s29, 0  ;;  %p152_p2 = scmp.eq.s32.totalorder %s5689_s25, 1 }
   0xc   : > { %p157_p3 = scmp.ne.s32.totalorder %s5616_s22, %s5612_s21  ;;  %p158_p4 = scmp.eq.s32.totalorder %s5101_s26, 1 }
   0xd   : > { %s5704_s30 = scalar_select %p139_p1, %s5620_s23, %s141_s28  }
   0xe   : > { %p5706_p5 = por %p152_p2, %p151_p0  ;;  %p5710_p6 = por %p158_p4, %p157_p3 }
   0xf   : > { %p5102_p7 = scmp.ge.s32.totalorder %s5624_s24, 1  ;;  %p191_p8 = scmp.lt.s32.totalorder %s5624_s24, 3 }
  0x10   : > { %p5448_p9 = scmp.eq.s32.totalorder %s5689_s25, 0  ;;  %s208_s11 = sshll.u32 %s7822_s3, 4  ;;  %s209_s11 = int_to_ptr.hbm [resolvable:$true] %s208_s11 }
  0x11   : > { %p192_p10 = pnand %p5102_p7, %p191_p8  ;;  %s5626_s12 = smov [#allocation4]  }
  0x12   : > { %s210_s13 = sshll.u32 %s5626_s12, 4  ;;  %s5627_s14 = smov 128   ;;  %s211_s13 = int_to_ptr.vmem [resolvable:$true] %s210_s13 }
  0x13   : > { %p5437_p11 = pneg %p192_p10  ;;  %s5628_s15 = smov 8  }
  0x14   : > { %237 = sbr.rel (%p192_p10) target bundleno = 1531 (0x5fb), region = 40 }
  0x15   : > { %p5438_p12 = pnand %p5448_p9, %p5437_p11 }
  0x17   : > { %5440 = dma.hbm_to_vmem [thread:$0]  (!%p5438_p12), %s209_s11, 18432, %s211_s13, [#allocation5], %s5627_s14, %s5627_s14, %s5628_s15  }
  0x19   : > { %5599 = dma.done.wait (%p5448_p9), [#allocation5], 18432  }
  0x1a   : > { %5601 = vsyncadd (%p5448_p9), [#allocation5], 4294948864  ;;  %vm278_vm0 = vcmask 31744   ;;  %v5629_v0 = vmov 0.0   ;;  %vm591_vm1 = vcmask 1043456   ;;  %p273_p13 = scmp.lt.s32.totalorder %s5689_s25, 1 }
  0x1b   : > { %280 = vst.msk [vmem:[#allocation2 + $0x8] sm:$0xff] %vm278_vm0, %v5629_v0  ;;  %v5111_v1 = vld [vmem:[%s7820_s1 + $0x4] sm:$0xf]  ;;  %v460_v2 = vld [vmem:[%s7820_s1] sm:$0xf]  ;;  %s7852_s0 = sld [smem:[#allocation54_spill]] }
  0x1c   : > { %279 = vst.msk [vmem:[#allocation2] sm:$0xff] %vm278_vm0, %v5629_v0  ;;  %5112 = vmatpush.msk.msra.mxu0 %vm591_vm1, %v5111_v1  ;;  %5427 = vmatpush.msk.msra.mxu2 %vm591_vm1, %v5111_v1  ;;  %s274_s20 = scalar_select %p273_p13, %s5689_s25, 1  ;;  %vm289_vm2 = vcmask 24576   ;;  %v5178_v6 = vld [vmem:[%s7820_s1 + $0x8] sm:$0xf] }
  0x1d   : > { %281 = vst.msk [vmem:[#allocation2 + $0x10] sm:$0xff] %vm278_vm0, %v5629_v0  ;;  %5428 = vmatpush.msk.msra.mxu3 %vm591_vm1, %v460_v2  ;;  %5145 = vmatpush.msk.msra.mxu1 %vm591_vm1, %v460_v2  ;;  %v5212_v7 = vld [vmem:[%s7820_s1 + $0xc] sm:$0xf]  ;;  %v5246_v11 = vld [vmem:[%s7820_s1 + $0x10] sm:$0xf]  ;;  %s7514_s13 = sand.u32 1, %s5616_s22  }
  0x1e   : > { %282 = vst.msk [vmem:[#allocation2 + $0x18] sm:$0xff] %vm278_vm0, %v5629_v0  ;;  %s5424_s26 = sshll.u32 %s274_s20, 8  ;;  %5179 = vmatpush.msk.msrb.mxu2 %vm591_vm1, %v5178_v6  ;;  %5247 = vmatpush.msk.msrb.mxu0 %vm591_vm1, %v5246_v11  ;;  %s5108_s16 = sshll.u32 %s7514_s13, 8 }
  0x1f   : > { %284 = vst.msk [vmem:[#allocation2 + $0x220] sm:$0xff] %vm278_vm0, %v5629_v0  ;;  %5213 = vmatpush.msk.msrb.mxu3 %vm591_vm1, %v5212_v7  ;;  %s7527_s17 = scalar_lea.vmem [#allocation8], %s5108_s16  ;;  %s5107_s18 = sshll.u32 %s7514_s13, 6 }
  0x20   : > { %285 = vst.msk [vmem:[#allocation2 + $0x228] sm:$0xff] %vm278_vm0, %v5629_v0  ;;  %s7579_s19 = scalar_lea.vmem [#allocation7], %s5107_s18  ;;  %s5426_s20 = sshll.u32 %s5689_s25, 8 }
  0x21   : > { %286 = vst.msk [vmem:[#allocation2 + $0x230] sm:$0xff] %vm278_vm0, %v5629_v0  ;;  %s5794_s9 = scalar_lea.vmem %s7852_s0, %s5424_s26  ;;  %s4990_s29 = scalar_lea.hbm %s7825_s6, %s5426_s20 }
  0x22   : > { %v461_v3 = vld [vmem:[#allocation2 + $0x8] sm:$0xff]  ;;  %287 = vst.msk [vmem:[#allocation2 + $0x238] sm:$0xff] %vm278_vm0, %v5629_v0  ;;  %v379_v13 = vld [vmem:[%s5794_s9 + $0x78] sm:$0xff]  ;;  %v364_v14 = vld [vmem:[%s5794_s9] sm:$0xff]  ;;  %s4993_s10 = sshll.u32 %s4990_s29, 4  ;;  %s4962_s11 = scalar_lea.sflag [#allocation9], %s7514_s13  ;;  %s4994_s10 = int_to_ptr.hbm [resolvable:$true] %s4993_s10 }
  0x23   : > { %5113 = vmatmul.msk.f32.vlgmr.msra.gmra.mxu0 %vm278_vm0, %v461_v3  ;;  %322 = vst [vmem:[#allocation3] sm:$0xff] %v5629_v0  ;;  %v378_v5 = vld [vmem:[%s5794_s9 + $0x70] sm:$0xff]  ;;  %v380_v15 = vld [vmem:[%s5794_s9 + $0x80] sm:$0xff]  ;;  %v365_v16 = vld [vmem:[%s5794_s9 + $0x8] sm:$0xff]  ;;  %s5540_s12 = sshra.s32 %s4994_s10, 4  ;;  %s5546_s18 = scalar_lea.hbm %s7825_s6, 512  ;;  %s5541_s12 = int_to_ptr.hbm [resolvable:$true] %s5540_s12 }
  0x24   : > { %323 = vst [vmem:[#allocation3 + $0x8] sm:$0xff] %v5629_v0  ;;  %v462_v4 = vld [vmem:[#allocation2 + $0x10] sm:$0xff]  ;;  %v428_v10 = vld [vmem:[#allocation2 + $0x7] sm:$0xff]  ;;  %v368_v22 = vld [vmem:[%s5794_s9 + $0x20] sm:$0xff]  ;;  %s5542_s14 = scalar_lea.hbm %s5541_s12, 256  ;;  %p5547_p3 = scmp.lt.s32.totalorder %s5541_s12, %s7825_s6 }
  0x25   : > { %324 = vst [vmem:[#allocation3 + $0x10] sm:$0xff] %v5629_v0  ;;  %5146 = vmatmul.msk.f32.vlgmr.msra.gmra.mxu1 %vm278_vm0, %v428_v10  ;;  %v429_v12 = vld [vmem:[#allocation2 + $0xf] sm:$0xff]  ;;  %v381_v17 = vld [vmem:[%s5794_s9 + $0x88] sm:$0xff]  ;;  %v384_v25 = vld [vmem:[%s5794_s9 + $0xa0] sm:$0xff]  ;;  %p5543_p0 = scmp.ne.s32.totalorder %s5541_s12, %s5542_s14  ;;  %p5548_p4 = scmp.lt.s32.totalorder %s5546_s18, %s5542_s14 }
  0x26   : > { %325 = vst [vmem:[#allocation3 + $0x18] sm:$0xff] %v5629_v0  ;;  %v366_v18 = vld [vmem:[%s5794_s9 + $0x10] sm:$0xff]  ;;  %v367_v20 = vld [vmem:[%s5794_s9 + $0x18] sm:$0xff]  ;;  %v369_v28 = vld [vmem:[%s5794_s9 + $0x28] sm:$0xff] }
  0x27   : > { %327 = vst [vmem:[#allocation3 + $0x220] sm:$0xff] %v5629_v0  ;;  %v382_v19 = vld [vmem:[%s5794_s9 + $0x90] sm:$0xff]  ;;  %v383_v21 = vld [vmem:[%s5794_s9 + $0x98] sm:$0xff]  ;;  %v385_v33 = vld [vmem:[%s5794_s9 + $0xa8] sm:$0xff]  ;;  %p5544_p1 = pnand %p5543_p0, %p5706_p5  ;;  %p5549_p7 = por %p5548_p4, %p5547_p3 }
  0x28   : > { %328 = vst [vmem:[#allocation3 + $0x228] sm:$0xff] %v5629_v0  ;;  %v370_v34 = vld [vmem:[%s5794_s9 + $0x30] sm:$0xff]  ;;  %v371_v40 = vld [vmem:[%s5794_s9 + $0x38] sm:$0xff]  ;;  %v372_v46 = vld [vmem:[%s5794_s9 + $0x40] sm:$0xff] }
  0x29   : > { %329 = vst [vmem:[#allocation3 + $0x230] sm:$0xff] %v5629_v0  ;;  %v386_v39 = vld [vmem:[%s5794_s9 + $0xb0] sm:$0xff]  ;;  %v387_v45 = vld [vmem:[%s5794_s9 + $0xb8] sm:$0xff]  ;;  %v388_v51 = vld [vmem:[%s5794_s9 + $0xc0] sm:$0xff]  ;;  %p5545_p2 = pneg %p5544_p1 }
  0x2a   : > { %330 = vst [vmem:[#allocation3 + $0x238] sm:$0xff] %v5629_v0  ;;  %v373_v52 = vld [vmem:[%s5794_s9 + $0x48] sm:$0xff]  ;;  %v374_v58 = vld [vmem:[%s5794_s9 + $0x50] sm:$0xff]  ;;  %v376_v6 = vld [vmem:[%s5794_s9 + $0x60] sm:$0xff] }
  0x2b   : > { %332 = vst [vmem:[#allocation3 + $0x27] sm:$0x1] %v5629_v0  ;;  %5114 = vmatmul.msk.f32.gmra.mxu0 %vm278_vm0, %v462_v4  ;;  %v389_v57 = vld [vmem:[%s5794_s9 + $0xc8] sm:$0xff]  ;;  %v390_v63 = vld [vmem:[%s5794_s9 + $0xd0] sm:$0xff]  ;;  %p5550_p8 = pnand %p5549_p7, %p5545_p2 }
  0x2c   : > { %333 = vst [vmem:[#allocation3 + $0x47] sm:$0x1] %v5629_v0 }
  0x2d   : > { %334 = vst [vmem:[#allocation3 + $0x67] sm:$0x1] %v5629_v0  ;;  %5147 = vmatmul.msk.f32.gmra.mxu1 %vm278_vm0, %v429_v12 }
  0x2e   : > { %335 = vst [vmem:[#allocation3 + $0x87] sm:$0x1] %v5629_v0 }
  0x2f   : > { %336 = vst [vmem:[#allocation3 + $0xa7] sm:$0x1] %v5629_v0 }
  0x30   : > { %337 = vst [vmem:[#allocation3 + $0xc7] sm:$0x1] %v5629_v0 }
  0x31   : > { %338 = vst [vmem:[#allocation3 + $0xe7] sm:$0x1] %v5629_v0 }
  0x32   : > { %339 = vst [vmem:[#allocation3 + $0x107] sm:$0x1] %v5629_v0 }
  0x33   : > { %340 = vst [vmem:[#allocation3 + $0x127] sm:$0x1] %v5629_v0 }
  0x34   : > { %341 = vst [vmem:[#allocation3 + $0x147] sm:$0x1] %v5629_v0 }
  0x35   : > { %342 = vst [vmem:[#allocation3 + $0x167] sm:$0x1] %v5629_v0 }
  0x36   : > { %343 = vst [vmem:[#allocation3 + $0x187] sm:$0x1] %v5629_v0 }
  0x37   : > { %344 = vst [vmem:[#allocation3 + $0x1a7] sm:$0x1] %v5629_v0 }
  0x38   : > { %345 = vst [vmem:[#allocation3 + $0x1c7] sm:$0x1] %v5629_v0 }
  0x39   : > { %346 = vst [vmem:[#allocation3 + $0x1e7] sm:$0x1] %v5629_v0 }
  0x3a   : > { %347 = vst [vmem:[#allocation3 + $0x207] sm:$0x1] %v5629_v0 }
  0x3b   : > { %348 = vst [vmem:[#allocation3 + $0x38] sm:$0x1] %v5629_v0 }
  0x3c   : > { %349 = vst [vmem:[#allocation3 + $0x58] sm:$0x1] %v5629_v0 }
  0x3d   : > { %350 = vst [vmem:[#allocation3 + $0x78] sm:$0x1] %v5629_v0 }
  0x3e   : > { %351 = vst [vmem:[#allocation3 + $0x98] sm:$0x1] %v5629_v0 }
  0x3f   : > { %352 = vst [vmem:[#allocation3 + $0xb8] sm:$0x1] %v5629_v0 }
  0x40   : > { %353 = vst [vmem:[#allocation3 + $0xd8] sm:$0x1] %v5629_v0 }
  0x41   : > { %354 = vst [vmem:[#allocation3 + $0xf8] sm:$0x1] %v5629_v0 }
  0x42   : > { %355 = vst [vmem:[#allocation3 + $0x118] sm:$0x1] %v5629_v0 }
  0x43   : > { %356 = vst [vmem:[#allocation3 + $0x138] sm:$0x1] %v5629_v0 }
  0x44   : > { %357 = vst [vmem:[#allocation3 + $0x158] sm:$0x1] %v5629_v0 }
  0x45   : > { %358 = vst [vmem:[#allocation3 + $0x178] sm:$0x1] %v5629_v0 }
  0x46   : > { %359 = vst [vmem:[#allocation3 + $0x198] sm:$0x1] %v5629_v0 }
  0x47   : > { %360 = vst [vmem:[#allocation3 + $0x1b8] sm:$0x1] %v5629_v0 }
  0x48   : > { %361 = vst [vmem:[#allocation3 + $0x1d8] sm:$0x1] %v5629_v0 }
  0x49   : > { %362 = vst [vmem:[#allocation3 + $0x1f8] sm:$0x1] %v5629_v0 }
  0x4a   : > { %363 = vst [vmem:[#allocation3 + $0x218] sm:$0x1] %v5629_v0 }
  0x4b   : > { %410 = vst.msk [vmem:[#allocation2 + $0x108] sm:$0xff] %vm278_vm0, %v378_v5  ;;  %v391_v5 = vld [vmem:[%s5794_s9 + $0xd8] sm:$0xff] }
  0x4c   : > { %297 = vst.msk [vmem:[#allocation2 + $0x107] sm:$0x1] %vm289_vm2, %v5629_v0 }
  0x4d   : > { %290 = vst.msk [vmem:[#allocation2 + $0x27] sm:$0x1] %vm289_vm2, %v5629_v0 }
  0x4e   : > { %291 = vst.msk [vmem:[#allocation2 + $0x47] sm:$0x1] %vm289_vm2, %v5629_v0 }
  0x4f   : > { %292 = vst.msk [vmem:[#allocation2 + $0x67] sm:$0x1] %vm289_vm2, %v5629_v0 }
  0x50   : > { %293 = vst.msk [vmem:[#allocation2 + $0x87] sm:$0x1] %vm289_vm2, %v5629_v0 }
  0x51   : > { %294 = vst.msk [vmem:[#allocation2 + $0xa7] sm:$0x1] %vm289_vm2, %v5629_v0 }
  0x52   : > { %v5823_v8 = vld [vmem:[#allocation2 + $0x108] sm:$0xff]  ;;  %295 = vst.msk [vmem:[#allocation2 + $0xc7] sm:$0x1] %vm289_vm2, %v5629_v0 }
  0x53   : > { %5129 = vmatmul.msk.f32.vlgmr.msra.gmra.mxu2 %vm278_vm0, %v5823_v8  ;;  %v5829_v9 = vld [vmem:[#allocation2 + $0x107] sm:$0xff]  ;;  %296 = vst.msk [vmem:[#allocation2 + $0xe7] sm:$0x1] %vm289_vm2, %v5629_v0 }
  0x54   : > { %5162 = vmatmul.msk.f32.vlgmr.msra.gmra.mxu3 %vm278_vm0, %v5829_v9  ;;  %298 = vst.msk [vmem:[#allocation2 + $0x127] sm:$0x1] %vm289_vm2, %v5629_v0 }
  0x55   : > { %299 = vst.msk [vmem:[#allocation2 + $0x147] sm:$0x1] %vm289_vm2, %v5629_v0 }
  0x56   : > { %300 = vst.msk [vmem:[#allocation2 + $0x167] sm:$0x1] %vm289_vm2, %v5629_v0 }
  0x57   : > { %301 = vst.msk [vmem:[#allocation2 + $0x187] sm:$0x1] %vm289_vm2, %v5629_v0 }
  0x58   : > { %302 = vst.msk [vmem:[#allocation2 + $0x1a7] sm:$0x1] %vm289_vm2, %v5629_v0 }
  0x59   : > { %303 = vst.msk [vmem:[#allocation2 + $0x1c7] sm:$0x1] %vm289_vm2, %v5629_v0 }
  0x5a   : > { %304 = vst.msk [vmem:[#allocation2 + $0x1e7] sm:$0x1] %vm289_vm2, %v5629_v0 }
  0x5b   : > { %305 = vst.msk [vmem:[#allocation2 + $0x207] sm:$0x1] %vm289_vm2, %v5629_v0 }
  0x5c   : > { %306 = vst.msk [vmem:[#allocation2 + $0x38] sm:$0x1] %vm289_vm2, %v5629_v0 }
  0x5d   : > { %307 = vst.msk [vmem:[#allocation2 + $0x58] sm:$0x1] %vm289_vm2, %v5629_v0 }
  0x5e   : > { %308 = vst.msk [vmem:[#allocation2 + $0x78] sm:$0x1] %vm289_vm2, %v5629_v0 }
  0x5f   : > { %309 = vst.msk [vmem:[#allocation2 + $0x98] sm:$0x1] %vm289_vm2, %v5629_v0 }
  0x60   : > { %310 = vst.msk [vmem:[#allocation2 + $0xb8] sm:$0x1] %vm289_vm2, %v5629_v0 }
  0x61   : > { %311 = vst.msk [vmem:[#allocation2 + $0xd8] sm:$0x1] %vm289_vm2, %v5629_v0 }
  0x62   : > { %312 = vst.msk [vmem:[#allocation2 + $0xf8] sm:$0x1] %vm289_vm2, %v5629_v0 }
  0x63   : > { %313 = vst.msk [vmem:[#allocation2 + $0x118] sm:$0x1] %vm289_vm2, %v5629_v0 }
  0x64   : > { %314 = vst.msk [vmem:[#allocation2 + $0x138] sm:$0x1] %vm289_vm2, %v5629_v0 }
  0x65   : > { %315 = vst.msk [vmem:[#allocation2 + $0x158] sm:$0x1] %vm289_vm2, %v5629_v0 }
  0x66   : > { %316 = vst.msk [vmem:[#allocation2 + $0x178] sm:$0x1] %vm289_vm2, %v5629_v0 }
  0x67   : > { %317 = vst.msk [vmem:[#allocation2 + $0x198] sm:$0x1] %vm289_vm2, %v5629_v0 }
  0x68   : > { %318 = vst.msk [vmem:[#allocation2 + $0x1b8] sm:$0x1] %vm289_vm2, %v5629_v0 }
  0x69   : > { %319 = vst.msk [vmem:[#allocation2 + $0x1d8] sm:$0x1] %vm289_vm2, %v5629_v0 }
  0x6a   : > { %320 = vst.msk [vmem:[#allocation2 + $0x1f8] sm:$0x1] %vm289_vm2, %v5629_v0 }
  0x6b   : > { %321 = vst.msk [vmem:[#allocation2 + $0x218] sm:$0x1] %vm289_vm2, %v5629_v0  ;;  %v375_v0 = vld [vmem:[%s5794_s9 + $0x58] sm:$0xff] }
  0x6c   : > { %411 = vst.msk [vmem:[#allocation2 + $0x110] sm:$0xff] %vm278_vm0, %v379_v13  ;;  %v392_v13 = vld [vmem:[%s5794_s9 + $0xe0] sm:$0xff] }
  0x6d   : > { %396 = vst.msk [vmem:[#allocation2 + $0x28] sm:$0xff] %vm278_vm0, %v364_v14  ;;  %v377_v14 = vld [vmem:[%s5794_s9 + $0x68] sm:$0xff] }
  0x6e   : > { %412 = vst.msk [vmem:[#allocation2 + $0x128] sm:$0xff] %vm278_vm0, %v380_v15 }
  0x6f   : > { %397 = vst.msk [vmem:[#allocation2 + $0x30] sm:$0xff] %vm278_vm0, %v365_v16 }
  0x70   : > { %413 = vst.msk [vmem:[#allocation2 + $0x130] sm:$0xff] %vm278_vm0, %v381_v17 }
  0x71   : > { %398 = vst.msk [vmem:[#allocation2 + $0x48] sm:$0xff] %vm278_vm0, %v366_v18 }
  0x72   : > { %414 = vst.msk [vmem:[#allocation2 + $0x148] sm:$0xff] %vm278_vm0, %v382_v19  ;;  %v393_v19 = vld [vmem:[%s5794_s9 + $0xe8] sm:$0xff] }
  0x73   : > { %v5906_v23 = vld [vmem:[#allocation2 + $0x110] sm:$0xff]  ;;  %399 = vst.msk [vmem:[#allocation2 + $0x50] sm:$0xff] %vm278_vm0, %v367_v20 }
  0x74   : > { %v5908_v24 = vld [vmem:[#allocation2 + $0x10f] sm:$0xff]  ;;  %5130 = vmatmul.msk.f32.gmra.mxu2 %vm278_vm0, %v5906_v23  ;;  %v5918_v27 = vld [vmem:[#allocation2 + $0x27] sm:$0xff]  ;;  %415 = vst.msk [vmem:[#allocation2 + $0x150] sm:$0xff] %vm278_vm0, %v383_v21 }
  0x75   : > { %5163 = vmatmul.msk.f32.gmra.mxu3 %vm278_vm0, %v5908_v24  ;;  %v5916_v26 = vld [vmem:[#allocation2 + $0x28] sm:$0xff]  ;;  %5148 = vmatmul.msk.f32.gmra.mxu1 %vm278_vm0, %v5918_v27  ;;  %400 = vst.msk [vmem:[#allocation2 + $0x68] sm:$0xff] %vm278_vm0, %v368_v22 }
  0x76   : > { %5115 = vmatmul.msk.f32.gmra.mxu0 %vm278_vm0, %v5916_v26  ;;  %416 = vst.msk [vmem:[#allocation2 + $0x168] sm:$0xff] %vm278_vm0, %v384_v25  ;;  %v5929_v29 = vld [vmem:[#allocation2 + $0x128] sm:$0xff]  ;;  %v5933_v31 = vld [vmem:[#allocation2 + $0x30] sm:$0xff] }
  0x77   : > { %401 = vst.msk [vmem:[#allocation2 + $0x70] sm:$0xff] %vm278_vm0, %v369_v28  ;;  %v5931_v30 = vld [vmem:[#allocation2 + $0x127] sm:$0xff]  ;;  %v5935_v32 = vld [vmem:[#allocation2 + $0x2f] sm:$0xff] }
  0x78   : > { %417 = vst.msk [vmem:[#allocation2 + $0x170] sm:$0xff] %vm278_vm0, %v385_v33  ;;  %v5949_v35 = vld [vmem:[#allocation2 + $0x130] sm:$0xff]  ;;  %v5953_v37 = vld [vmem:[#allocation2 + $0x48] sm:$0xff] }
  0x79   : > { %402 = vst.msk [vmem:[#allocation2 + $0x88] sm:$0xff] %vm278_vm0, %v370_v34  ;;  %v5951_v36 = vld [vmem:[#allocation2 + $0x12f] sm:$0xff]  ;;  %v5955_v38 = vld [vmem:[#allocation2 + $0x47] sm:$0xff] }
  0x7a   : > { %418 = vst.msk [vmem:[#allocation2 + $0x188] sm:$0xff] %vm278_vm0, %v386_v39  ;;  %v5969_v41 = vld [vmem:[#allocation2 + $0x148] sm:$0xff]  ;;  %v5973_v43 = vld [vmem:[#allocation2 + $0x50] sm:$0xff] }
  0x7b   : > { %403 = vst.msk [vmem:[#allocation2 + $0x90] sm:$0xff] %vm278_vm0, %v371_v40  ;;  %v5971_v42 = vld [vmem:[#allocation2 + $0x147] sm:$0xff]  ;;  %v5975_v44 = vld [vmem:[#allocation2 + $0x4f] sm:$0xff] }
  0x7c   : > { %5131 = vmatmul.msk.f32.gmra.mxu2 %vm278_vm0, %v5929_v29  ;;  %419 = vst.msk [vmem:[#allocation2 + $0x190] sm:$0xff] %vm278_vm0, %v387_v45  ;;  %v5989_v47 = vld [vmem:[#allocation2 + $0x150] sm:$0xff]  ;;  %v5993_v49 = vld [vmem:[#allocation2 + $0x68] sm:$0xff] }
  0x7d   : > { %5164 = vmatmul.msk.f32.gmra.mxu3 %vm278_vm0, %v5931_v30  ;;  %5149 = vmatmul.msk.f32.gmra.mxu1 %vm278_vm0, %v5935_v32  ;;  %404 = vst.msk [vmem:[#allocation2 + $0xa8] sm:$0xff] %vm278_vm0, %v372_v46  ;;  %v5991_v48 = vld [vmem:[#allocation2 + $0x14f] sm:$0xff]  ;;  %v5995_v50 = vld [vmem:[#allocation2 + $0x67] sm:$0xff] }
  0x7e   : > { %5116 = vmatmul.msk.f32.gmra.mxu0 %vm278_vm0, %v5933_v31  ;;  %420 = vst.msk [vmem:[#allocation2 + $0x1a8] sm:$0xff] %vm278_vm0, %v388_v51  ;;  %v6009_v53 = vld [vmem:[#allocation2 + $0x168] sm:$0xff]  ;;  %v6013_v55 = vld [vmem:[#allocation2 + $0x70] sm:$0xff] }
  0x7f   : > { %405 = vst.msk [vmem:[#allocation2 + $0xb0] sm:$0xff] %vm278_vm0, %v373_v52  ;;  %v6011_v54 = vld [vmem:[#allocation2 + $0x167] sm:$0xff]  ;;  %v6015_v56 = vld [vmem:[#allocation2 + $0x6f] sm:$0xff] }
  0x80   : > { %421 = vst.msk [vmem:[#allocation2 + $0x1b0] sm:$0xff] %vm278_vm0, %v389_v57  ;;  %v6029_v59 = vld [vmem:[#allocation2 + $0x170] sm:$0xff]  ;;  %v6033_v61 = vld [vmem:[#allocation2 + $0x88] sm:$0xff] }
  0x81   : > { %406 = vst.msk [vmem:[#allocation2 + $0xc8] sm:$0xff] %vm278_vm0, %v374_v58  ;;  %v6031_v60 = vld [vmem:[#allocation2 + $0x16f] sm:$0xff]  ;;  %v6035_v62 = vld [vmem:[#allocation2 + $0x87] sm:$0xff] }
  0x82   : > { %422 = vst.msk [vmem:[#allocation2 + $0x1c8] sm:$0xff] %vm278_vm0, %v390_v63  ;;  %v6049_v1 = vld [vmem:[#allocation2 + $0x188] sm:$0xff]  ;;  %v6053_v3 = vld [vmem:[#allocation2 + $0x90] sm:$0xff]  ;;  %v5382_v63 = vld [vmem:[%s7820_s1 + $0x20] sm:$0xf] }
  0x83   : > { %407 = vst.msk [vmem:[#allocation2 + $0xd0] sm:$0xff] %vm278_vm0, %v375_v0  ;;  %v6051_v2 = vld [vmem:[#allocation2 + $0x187] sm:$0xff]  ;;  %v6055_v4 = vld [vmem:[#allocation2 + $0x8f] sm:$0xff]  ;;  %5383 = vmatpush.msk.msra.mxu0 %vm591_vm1, %v5382_v63 }
  0x84   : > { %5132 = vmatmul.msk.f32.gmra.mxu2 %vm278_vm0, %v5949_v35  ;;  %423 = vst.msk [vmem:[#allocation2 + $0x1d0] sm:$0xff] %vm278_vm0, %v391_v5  ;;  %v6069_v7 = vld [vmem:[#allocation2 + $0x190] sm:$0xff]  ;;  %v6073_v11 = vld [vmem:[#allocation2 + $0xa8] sm:$0xff] }
  0x85   : > { %5165 = vmatmul.msk.f32.gmra.mxu3 %vm278_vm0, %v5951_v36  ;;  %5150 = vmatmul.msk.f32.gmra.mxu1 %vm278_vm0, %v5955_v38  ;;  %408 = vst.msk [vmem:[#allocation2 + $0xe8] sm:$0xff] %vm278_vm0, %v376_v6  ;;  %v6071_v10 = vld [vmem:[#allocation2 + $0x18f] sm:$0xff]  ;;  %v6075_v12 = vld [vmem:[#allocation2 + $0xa7] sm:$0xff] }
  0x86   : > { %5117 = vmatmul.msk.f32.gmra.mxu0 %vm278_vm0, %v5953_v37  ;;  %424 = vst.msk [vmem:[#allocation2 + $0x1e8] sm:$0xff] %vm278_vm0, %v392_v13  ;;  %v6089_v15 = vld [vmem:[#allocation2 + $0x1a8] sm:$0xff]  ;;  %v6093_v17 = vld [vmem:[#allocation2 + $0xb0] sm:$0xff] }
  0x87   : > { %409 = vst.msk [vmem:[#allocation2 + $0xf0] sm:$0xff] %vm278_vm0, %v377_v14  ;;  %v6091_v16 = vld [vmem:[#allocation2 + $0x1a7] sm:$0xff]  ;;  %v6095_v18 = vld [vmem:[#allocation2 + $0xaf] sm:$0xff] }
  0x88   : > { %425 = vst.msk [vmem:[#allocation2 + $0x1f0] sm:$0xff] %vm278_vm0, %v393_v19  ;;  %v6107_v20 = vld [vmem:[#allocation2 + $0x1b0] sm:$0xff]  ;;  %v6111_v22 = vld [vmem:[#allocation2 + $0xc8] sm:$0xff] }
  0x89   : > { %v6109_v21 = vld [vmem:[#allocation2 + $0x1af] sm:$0xff]  ;;  %v6113_v25 = vld [vmem:[#allocation2 + $0xc7] sm:$0xff] }
  0x8a   : > { %7853 = vst [vmem:[#allocation13_spill] sm:$0xff] %v6109_v21  ;;  %v6123_v28 = vld [vmem:[#allocation2 + $0x1c8] sm:$0xff]  ;;  %v6127_v34 = vld [vmem:[#allocation2 + $0xd0] sm:$0xff] }
  0x8b   : > { %7854 = vst [vmem:[#allocation14_spill] sm:$0xff] %v6123_v28  ;;  %v6125_v33 = vld [vmem:[#allocation2 + $0x1c7] sm:$0xff]  ;;  %v6129_v39 = vld [vmem:[#allocation2 + $0xcf] sm:$0xff] }
  0x8c   : > { %5133 = vmatmul.msk.f32.gmra.mxu2 %vm278_vm0, %v5969_v41  ;;  %7855 = vst [vmem:[#allocation15_spill] sm:$0xff] %v6125_v33  ;;  %v5314_v40 = vld [vmem:[%s7820_s1 + $0x18] sm:$0xf]  ;;  %v5348_v45 = vld [vmem:[%s7820_s1 + $0x1c] sm:$0xf]  ;;  %v6151_v52 = vld [vmem:[#allocation2 + $0xe8] sm:$0xff] }
  0x8d   : > { %5166 = vmatmul.msk.f32.gmra.mxu3 %vm278_vm0, %v5971_v42  ;;  %5151 = vmatmul.msk.f32.gmra.mxu1 %vm278_vm0, %v5975_v44  ;;  %v6147_v46 = vld [vmem:[#allocation2 + $0x1d0] sm:$0xff]  ;;  %v6153_v57 = vld [vmem:[#allocation2 + $0xe7] sm:$0xff] }
  0x8e   : > { %5118 = vmatmul.msk.f32.gmra.mxu0 %vm278_vm0, %v5973_v43  ;;  %5315 = vmatpush.msk.msra.mxu2 %vm591_vm1, %v5314_v40  ;;  %7856 = vst [vmem:[#allocation16_spill] sm:$0xff] %v6147_v46  ;;  %v6149_v51 = vld [vmem:[#allocation2 + $0x1cf] sm:$0xff]  ;;  %v6173_v5 = vld [vmem:[#allocation2 + $0x1e7] sm:$0xff] }
  0x8f   : > { %5349 = vmatpush.msk.msra.mxu3 %vm591_vm1, %v5348_v45  ;;  %7857 = vst [vmem:[#allocation17_spill] sm:$0xff] %v6149_v51  ;;  %v5280_v58 = vld [vmem:[%s7820_s1 + $0x14] sm:$0xf]  ;;  %v6175_v6 = vld [vmem:[#allocation2 + $0xf0] sm:$0xff] }
  0x90   : > { %5281 = vmatpush.msk.msrb.mxu1 %vm591_vm1, %v5280_v58  ;;  %v6171_v0 = vld [vmem:[#allocation2 + $0x1e8] sm:$0xff]  ;;  %7859 = vst [vmem:[#allocation19_spill] sm:$0xff] %v6173_v5  ;;  %v6191_v40 = vld [vmem:[#allocation2 + $0x1f0] sm:$0xff] }
  0x91   : > { %7858 = vst [vmem:[#allocation18_spill] sm:$0xff] %v6171_v0  ;;  %v6177_v13 = vld [vmem:[#allocation2 + $0xef] sm:$0xff] }
  0x92   : > { %7860 = vst [vmem:[#allocation20_spill] sm:$0xff] %v6191_v40  ;;  %v6193_v45 = vld [vmem:[#allocation2 + $0x1ef] sm:$0xff] }
  0x93   : > { %7861 = vst [vmem:[#allocation21_spill] sm:$0xff] %v6193_v45  ;;  %v1754_v58 = vld [vmem:[#allocation2 + $0x29] sm:$0xff] }
  0x94   : > { %5134 = vmatmul.msk.f32.gmra.mxu2 %vm278_vm0, %v5989_v47 }
  0x95   : > { %5167 = vmatmul.msk.f32.gmra.mxu3 %vm278_vm0, %v5991_v48  ;;  %5152 = vmatmul.msk.f32.gmra.mxu1 %vm278_vm0, %v5995_v50 }
  0x96   : > { %5119 = vmatmul.msk.f32.gmra.mxu0 %vm278_vm0, %v5993_v49 }
  0x9c   : > { %5135 = vmatmul.msk.f32.gmra.mxu2 %vm278_vm0, %v6009_v53 }
  0x9d   : > { %5168 = vmatmul.msk.f32.gmra.mxu3 %vm278_vm0, %v6011_v54  ;;  %5153 = vmatmul.msk.f32.gmra.mxu1 %vm278_vm0, %v6015_v56 }
  0x9e   : > { %5120 = vmatmul.msk.f32.gmra.mxu0 %vm278_vm0, %v6013_v55 }
  0xa0   : > { %v6187_v14 = vpop.f32.mrf.mxu0 }
  0xa2   : > { %v6189_v19 = vpop.f32.mrf.mxu1 }
  0xa4   : > { %5136 = vmatmul.msk.f32.gmra.mxu2 %vm278_vm0, %v6029_v59 }
  0xa5   : > { %5169 = vmatmul.msk.f32.gmra.mxu3 %vm278_vm0, %v6031_v60  ;;  %5154 = vmatmul.msk.f32.gmra.mxu1 %vm278_vm0, %v6035_v62 }
  0xa6   : > { %5121 = vmatmul.msk.f32.gmra.mxu0 %vm278_vm0, %v6033_v61 }
  0xa8   : > { %v6202_v63 = vpop.f32.mrf.mxu0 }
  0xac   : > { %5137 = vmatmul.msk.f32.gmra.mxu2 %vm278_vm0, %v6049_v1 }
  0xad   : > { %5170 = vmatmul.msk.f32.gmra.mxu3 %vm278_vm0, %v6051_v2  ;;  %5155 = vmatmul.msk.f32.gmra.mxu1 %vm278_vm0, %v6055_v4 }
  0xae   : > { %5122 = vmatmul.msk.f32.gmra.mxu0 %vm278_vm0, %v6053_v3 }
  0xb4   : > { %5138 = vmatmul.msk.f32.gmra.mxu2 %vm278_vm0, %v6069_v7 }
  0xb5   : > { %5171 = vmatmul.msk.f32.gmra.mxu3 %vm278_vm0, %v6071_v10  ;;  %5156 = vmatmul.msk.f32.gmra.mxu1 %vm278_vm0, %v6075_v12 }
  0xb6   : > { %5123 = vmatmul.msk.f32.gmra.mxu0 %vm278_vm0, %v6073_v11 }
  0xbc   : > { %5139 = vmatmul.msk.f32.gmra.mxu2 %vm278_vm0, %v6089_v15 }
  0xbd   : > { %5172 = vmatmul.msk.f32.gmra.mxu3 %vm278_vm0, %v6091_v16  ;;  %5157 = vmatmul.msk.f32.gmra.mxu1 %vm278_vm0, %v6095_v18 }
  0xbe   : > { %5124 = vmatmul.msk.f32.gmra.mxu0 %vm278_vm0, %v6093_v17 }
  0xc4   : > { %5140 = vmatmul.msk.f32.gmra.mxu2 %vm278_vm0, %v6107_v20 }
  0xc5   : > { %5173 = vmatmul.msk.f32.gmra.mxu3 %vm278_vm0, %v6109_v21  ;;  %5158 = vmatmul.msk.f32.gmra.mxu1 %vm278_vm0, %v6113_v25  ;;  %v6235_v21 = vld [vmem:[#allocation2 + $0x51] sm:$0xff] }
  0xc6   : > { %5125 = vmatmul.msk.f32.gmra.mxu0 %vm278_vm0, %v6111_v22  ;;  %7866 = vst [vmem:[#allocation26_spill] sm:$0xff] %v6235_v21 }
  0xcc   : > { %5141 = vmatmul.msk.f32.gmra.mxu2 %vm278_vm0, %v6123_v28  ;;  %v6220_v28 = vld [vmem:[#allocation2 + $0x49] sm:$0xff] }
  0xcd   : > { %5174 = vmatmul.msk.f32.gmra.mxu3 %vm278_vm0, %v6125_v33  ;;  %5159 = vmatmul.msk.f32.gmra.mxu1 %vm278_vm0, %v6129_v39  ;;  %7864 = vst [vmem:[#allocation24_spill] sm:$0xff] %v6220_v28 }
  0xce   : > { %5126 = vmatmul.msk.f32.gmra.mxu0 %vm278_vm0, %v6127_v34 }
  0xd4   : > { %5142 = vmatmul.msk.f32.gmra.mxu2 %vm278_vm0, %v6147_v46 }
  0xd5   : > { %5175 = vmatmul.msk.f32.gmra.mxu3 %vm278_vm0, %v6149_v51  ;;  %5160 = vmatmul.msk.f32.gmra.mxu1 %vm278_vm0, %v6153_v57  ;;  %v1755_v51 = vld [vmem:[#allocation2 + $0x31] sm:$0xff] }
  0xd6   : > { %5127 = vmatmul.msk.f32.gmra.mxu0 %vm278_vm0, %v6151_v52 }
  0xdc   : > { %5143 = vmatmul.msk.f32.gmra.mxu2 %vm278_vm0, %v6171_v0  ;;  %v920_v0 = vld [vmem:[#allocation2 + $0x9] sm:$0xff] }
  0xdd   : > { %5176 = vmatmul.msk.f32.gmra.mxu3 %vm278_vm0, %v6173_v5  ;;  %5161 = vmatmul.msk.f32.gmra.mxu1 %vm278_vm0, %v6177_v13  ;;  %v6204_v5 = vpop.f32.mrf.mxu1 }
  0xde   : > { %5128 = vmatmul.msk.f32.gmra.mxu0 %vm278_vm0, %v6175_v6 }
  0xe4   : > { %5144 = vmatmul.msk.f32.gmra.mxu2 %vm278_vm0, %v6191_v40  ;;  %v6213_v40 = vpop.f32.mrf.mxu3 }
  0xe5   : > { %5177 = vmatmul.msk.f32.gmra.mxu3 %vm278_vm0, %v6193_v45  ;;  %5282 = vmatmul.msk.f32.vlgmr.msrb.gmra.mxu1 %vm278_vm0, %v1754_v58  ;;  %v6211_v45 = vpop.f32.mrf.mxu2  ;;  %7863 = vst [vmem:[#allocation23_spill] sm:$0xff] %v6213_v40 }
  0xe6   : > { %5248 = vmatmul.msk.f32.vlgmr.msrb.gmra.mxu0 %vm278_vm0, %v5916_v26  ;;  %7862 = vst [vmem:[#allocation22_spill] sm:$0xff] %v6211_v45  ;;  %v921_v26 = vld [vmem:[#allocation2 + $0x11] sm:$0xff] }
  0xec   : > { %5180 = vmatmul.msk.f32.vlgmr.msrb.gmra.mxu2 %vm278_vm0, %v920_v0 }
  0xed   : > { %5214 = vmatmul.msk.f32.vlgmr.msrb.gmra.mxu3 %vm278_vm0, %v5918_v27  ;;  %5283 = vmatmul.msk.f32.gmra.mxu1 %vm278_vm0, %v1755_v51 }
  0xee   : > { %5249 = vmatmul.msk.f32.gmra.mxu0 %vm278_vm0, %v5933_v31 }
  0xf2   : > { %v6218_v33 = vpop.f32.mrf.mxu1 }
  0xf3   : > { %v6216_v46 = vpop.f32.mrf.mxu0 }
  0xf4   : > { %5181 = vmatmul.msk.f32.gmra.mxu2 %vm278_vm0, %v921_v26 }
  0xf5   : > { %5215 = vmatmul.msk.f32.gmra.mxu3 %vm278_vm0, %v5935_v32  ;;  %5284 = vmatmul.msk.f32.gmra.mxu1 %vm278_vm0, %v6220_v28 }
  0xf6   : > { %5250 = vmatmul.msk.f32.gmra.mxu0 %vm278_vm0, %v5953_v37 }
  0xf7   : > { %v663_v27 = vpop.f32.mrf.mxu2 }
  0xf8   : > { %v875_v31 = vpop.f32.mrf.mxu3 }
  0xf9   : > { %v6229_v0 = vadd.f32 %v875_v31, %v663_v27 }
  0xfa   : > { %v6233_v45 = vpop.f32.mrf.mxu1 }
  0xfb   : > { %7865 = vst [vmem:[#allocation25_spill] sm:$0xff] %v6229_v0  ;;  %v6231_v40 = vpop.f32.mrf.mxu0  ;;  %v6250_v0 = vld [vmem:[#allocation2 + $0x69] sm:$0xff] }
  0xfc   : > { %5182 = vmatmul.msk.f32.gmra.mxu2 %vm278_vm0, %v1754_v58  ;;  %7868 = vst [vmem:[#allocation28_spill] sm:$0xff] %v6250_v0 }
  0xfd   : > { %5216 = vmatmul.msk.f32.gmra.mxu3 %vm278_vm0, %v5955_v38  ;;  %5285 = vmatmul.msk.f32.gmra.mxu1 %vm278_vm0, %v6235_v21 }
  0xfe   : > { %5251 = vmatmul.msk.f32.gmra.mxu0 %vm278_vm0, %v5973_v43 }
  0xff   : > { %v666_v32 = vpop.f32.mrf.mxu2 }
 0x100   : > { %v878_v37 = vpop.f32.mrf.mxu3 }
 0x101   : > { %v6244_v26 = vadd.f32 %v878_v37, %v666_v32 }
 0x102   : > { %v6248_v31 = vpop.f32.mrf.mxu1 }
 0x103   : > { %7867 = vst [vmem:[#allocation27_spill] sm:$0xff] %v6244_v26  ;;  %v6246_v27 = vpop.f32.mrf.mxu0  ;;  %v6265_v26 = vld [vmem:[#allocation2 + $0x71] sm:$0xff] }
 0x104   : > { %5183 = vmatmul.msk.f32.gmra.mxu2 %vm278_vm0, %v1755_v51  ;;  %7870 = vst [vmem:[#allocation30_spill] sm:$0xff] %v6265_v26 }
 0x105   : > { %5217 = vmatmul.msk.f32.gmra.mxu3 %vm278_vm0, %v5975_v44  ;;  %5286 = vmatmul.msk.f32.gmra.mxu1 %vm278_vm0, %v6250_v0 }
 0x106   : > { %5252 = vmatmul.msk.f32.gmra.mxu0 %vm278_vm0, %v5993_v49 }
 0x107   : > { %v669_v38 = vpop.f32.mrf.mxu2 }
 0x108   : > { %v881_v43 = vpop.f32.mrf.mxu3 }
 0x109   : > { %v6259_v58 = vadd.f32 %v881_v43, %v669_v38 }
 0x10a   : > { %v6263_v37 = vpop.f32.mrf.mxu1 }
 0x10b   : > { %7869 = vst [vmem:[#allocation29_spill] sm:$0xff] %v6259_v58  ;;  %v6261_v32 = vpop.f32.mrf.mxu0  ;;  %v6281_v58 = vld [vmem:[#allocation2 + $0x89] sm:$0xff] }
 0x10c   : > { %5184 = vmatmul.msk.f32.gmra.mxu2 %vm278_vm0, %v6220_v28  ;;  %7872 = vst [vmem:[#allocation32_spill] sm:$0xff] %v6281_v58  ;;  %v6297_v28 = vld [vmem:[#allocation2 + $0x91] sm:$0xff] }
 0x10d   : > { %5218 = vmatmul.msk.f32.gmra.mxu3 %vm278_vm0, %v5995_v50  ;;  %5287 = vmatmul.msk.f32.gmra.mxu1 %vm278_vm0, %v6265_v26  ;;  %7874 = vst [vmem:[#allocation34_spill] sm:$0xff] %v6297_v28 }
 0x10e   : > { %5253 = vmatmul.msk.f32.gmra.mxu0 %vm278_vm0, %v6013_v55 }
 0x10f   : > { %v672_v44 = vpop.f32.mrf.mxu2 }
 0x110   : > { %v884_v49 = vpop.f32.mrf.mxu3 }
 0x111   : > { %v6275_v51 = vadd.f32 %v884_v49, %v672_v44 }
 0x112   : > { %v6279_v43 = vpop.f32.mrf.mxu1 }
 0x113   : > { %7871 = vst [vmem:[#allocation31_spill] sm:$0xff] %v6275_v51  ;;  %v6277_v38 = vpop.f32.mrf.mxu0 }
 0x114   : > { %5185 = vmatmul.msk.f32.gmra.mxu2 %vm278_vm0, %v6235_v21  ;;  %v6313_v21 = vld [vmem:[#allocation2 + $0xa9] sm:$0xff] }
 0x115   : > { %5219 = vmatmul.msk.f32.gmra.mxu3 %vm278_vm0, %v6015_v56  ;;  %5288 = vmatmul.msk.f32.gmra.mxu1 %vm278_vm0, %v6281_v58  ;;  %7876 = vst [vmem:[#allocation36_spill] sm:$0xff] %v6313_v21 }
 0x116   : > { %5254 = vmatmul.msk.f32.gmra.mxu0 %vm278_vm0, %v6033_v61 }
 0x117   : > { %v675_v50 = vpop.f32.mrf.mxu2 }
 0x118   : > { %v887_v55 = vpop.f32.mrf.mxu3 }
 0x119   : > { %v6291_v44 = vadd.f32 %v887_v55, %v675_v50 }
 0x11a   : > { %v6295_v51 = vpop.f32.mrf.mxu1 }
 0x11b   : > { %7873 = vst [vmem:[#allocation33_spill] sm:$0xff] %v6291_v44  ;;  %v6293_v49 = vpop.f32.mrf.mxu0 }
 0x11c   : > { %5186 = vmatmul.msk.f32.gmra.mxu2 %vm278_vm0, %v6250_v0  ;;  %v6329_v0 = vld [vmem:[#allocation2 + $0xb1] sm:$0xff] }
 0x11d   : > { %5220 = vmatmul.msk.f32.gmra.mxu3 %vm278_vm0, %v6035_v62  ;;  %5289 = vmatmul.msk.f32.gmra.mxu1 %vm278_vm0, %v6297_v28  ;;  %7878 = vst [vmem:[#allocation38_spill] sm:$0xff] %v6329_v0 }
 0x11e   : > { %5255 = vmatmul.msk.f32.gmra.mxu0 %vm278_vm0, %v6053_v3 }
 0x11f   : > { %v678_v56 = vpop.f32.mrf.mxu2 }
 0x120   : > { %v890_v61 = vpop.f32.mrf.mxu3 }
 0x121   : > { %v6307_v50 = vadd.f32 %v890_v61, %v678_v56 }
 0x122   : > { %v6311_v44 = vpop.f32.mrf.mxu1 }
 0x123   : > { %7875 = vst [vmem:[#allocation35_spill] sm:$0xff] %v6307_v50  ;;  %v6309_v55 = vpop.f32.mrf.mxu0 }
 0x124   : > { %5187 = vmatmul.msk.f32.gmra.mxu2 %vm278_vm0, %v6265_v26  ;;  %v6345_v26 = vld [vmem:[#allocation2 + $0xc9] sm:$0xff] }
 0x125   : > { %5221 = vmatmul.msk.f32.gmra.mxu3 %vm278_vm0, %v6055_v4  ;;  %5290 = vmatmul.msk.f32.gmra.mxu1 %vm278_vm0, %v6313_v21  ;;  %7880 = vst [vmem:[#allocation40_spill] sm:$0xff] %v6345_v26 }
 0x126   : > { %5256 = vmatmul.msk.f32.gmra.mxu0 %vm278_vm0, %v6073_v11 }
 0x127   : > { %v681_v62 = vpop.f32.mrf.mxu2 }
 0x128   : > { %v893_v3 = vpop.f32.mrf.mxu3 }
 0x129   : > { %v6323_v56 = vadd.f32 %v893_v3, %v681_v62 }
 0x12a   : > { %v6327_v50 = vpop.f32.mrf.mxu1 }
 0x12b   : > { %7877 = vst [vmem:[#allocation37_spill] sm:$0xff] %v6323_v56  ;;  %v6325_v61 = vpop.f32.mrf.mxu0 }
 0x12c   : > { %5188 = vmatmul.msk.f32.gmra.mxu2 %vm278_vm0, %v6281_v58  ;;  %v6361_v58 = vld [vmem:[#allocation2 + $0xd1] sm:$0xff] }
 0x12d   : > { %5222 = vmatmul.msk.f32.gmra.mxu3 %vm278_vm0, %v6075_v12  ;;  %5291 = vmatmul.msk.f32.gmra.mxu1 %vm278_vm0, %v6329_v0  ;;  %7882 = vst [vmem:[#allocation42_spill] sm:$0xff] %v6361_v58 }
 0x12e   : > { %5257 = vmatmul.msk.f32.gmra.mxu0 %vm278_vm0, %v6093_v17 }
 0x12f   : > { %v684_v4 = vpop.f32.mrf.mxu2 }
 0x130   : > { %v896_v11 = vpop.f32.mrf.mxu3 }
 0x131   : > { %v6339_v62 = vadd.f32 %v896_v11, %v684_v4 }
 0x132   : > { %v6343_v56 = vpop.f32.mrf.mxu1 }
 0x133   : > { %7879 = vst [vmem:[#allocation39_spill] sm:$0xff] %v6339_v62  ;;  %v6341_v3 = vpop.f32.mrf.mxu0 }
 0x134   : > { %5189 = vmatmul.msk.f32.gmra.mxu2 %vm278_vm0, %v6297_v28  ;;  %v6377_v28 = vld [vmem:[#allocation2 + $0xe9] sm:$0xff] }
 0x135   : > { %5223 = vmatmul.msk.f32.gmra.mxu3 %vm278_vm0, %v6095_v18  ;;  %5292 = vmatmul.msk.f32.gmra.mxu1 %vm278_vm0, %v6345_v26  ;;  %7884 = vst [vmem:[#allocation44_spill] sm:$0xff] %v6377_v28 }
 0x136   : > { %5258 = vmatmul.msk.f32.gmra.mxu0 %vm278_vm0, %v6111_v22 }
 0x137   : > { %v687_v12 = vpop.f32.mrf.mxu2 }
 0x138   : > { %v899_v17 = vpop.f32.mrf.mxu3 }
 0x139   : > { %v6355_v4 = vadd.f32 %v899_v17, %v687_v12 }
 0x13a   : > { %v6359_v62 = vpop.f32.mrf.mxu1 }
 0x13b   : > { %7881 = vst [vmem:[#allocation41_spill] sm:$0xff] %v6355_v4  ;;  %v6357_v11 = vpop.f32.mrf.mxu0 }
 0x13c   : > { %5190 = vmatmul.msk.f32.gmra.mxu2 %vm278_vm0, %v6313_v21  ;;  %v6393_v21 = vld [vmem:[#allocation2 + $0xf1] sm:$0xff] }
 0x13d   : > { %5224 = vmatmul.msk.f32.gmra.mxu3 %vm278_vm0, %v6113_v25  ;;  %5293 = vmatmul.msk.f32.gmra.mxu1 %vm278_vm0, %v6361_v58  ;;  %7886 = vst [vmem:[#allocation46_spill] sm:$0xff] %v6393_v21 }
 0x13e   : > { %5259 = vmatmul.msk.f32.gmra.mxu0 %vm278_vm0, %v6127_v34 }
 0x13f   : > { %v690_v18 = vpop.f32.mrf.mxu2 }
 0x140   : > { %v902_v22 = vpop.f32.mrf.mxu3 }
 0x141   : > { %v6371_v12 = vadd.f32 %v902_v22, %v690_v18 }
 0x142   : > { %v6375_v4 = vpop.f32.mrf.mxu1 }
 0x143   : > { %7883 = vst [vmem:[#allocation43_spill] sm:$0xff] %v6371_v12  ;;  %v6373_v17 = vpop.f32.mrf.mxu0 }
 0x144   : > { %5191 = vmatmul.msk.f32.gmra.mxu2 %vm278_vm0, %v6329_v0  ;;  %v6409_v0 = vld [vmem:[#allocation2 + $0x109] sm:$0xff] }
 0x145   : > { %5225 = vmatmul.msk.f32.gmra.mxu3 %vm278_vm0, %v6129_v39  ;;  %5294 = vmatmul.msk.f32.gmra.mxu1 %vm278_vm0, %v6377_v28  ;;  %7888 = vst [vmem:[#allocation48_spill] sm:$0xff] %v6409_v0 }
 0x146   : > { %5260 = vmatmul.msk.f32.gmra.mxu0 %vm278_vm0, %v6151_v52 }
 0x147   : > { %v693_v25 = vpop.f32.mrf.mxu2 }
 0x148   : > { %v905_v34 = vpop.f32.mrf.mxu3 }
 0x149   : > { %v6387_v18 = vadd.f32 %v905_v34, %v693_v25 }
 0x14a   : > { %v6391_v12 = vpop.f32.mrf.mxu1 }
 0x14b   : > { %7885 = vst [vmem:[#allocation45_spill] sm:$0xff] %v6387_v18  ;;  %v6389_v22 = vpop.f32.mrf.mxu0 }
 0x14c   : > { %5192 = vmatmul.msk.f32.gmra.mxu2 %vm278_vm0, %v6345_v26  ;;  %v3063_v26 = vld [vmem:[#allocation4 + $0xf8] sm:$0xff] }
 0x14d   : > { %5226 = vmatmul.msk.f32.gmra.mxu3 %vm278_vm0, %v6153_v57  ;;  %5295 = vmatmul.msk.f32.gmra.mxu1 %vm278_vm0, %v6393_v21 }
 0x14e   : > { %5261 = vmatmul.msk.f32.gmra.mxu0 %vm278_vm0, %v6175_v6  ;;  %3064 = vmatpush.msra.mxu1 %v3063_v26 }
 0x14f   : > { %v696_v39 = vpop.f32.mrf.mxu2 }
 0x150   : > { %v908_v52 = vpop.f32.mrf.mxu3 }
 0x151   : > { %v6403_v25 = vadd.f32 %v908_v52, %v696_v39 }
 0x152   : > { %v6407_v18 = vpop.f32.mrf.mxu1 }
 0x153   : > { %7887 = vst [vmem:[#allocation47_spill] sm:$0xff] %v6403_v25  ;;  %v6405_v34 = vpop.f32.mrf.mxu0  ;;  %v6423_v25 = vld [vmem:[#allocation2 + $0x111] sm:$0xff] }
 0x154   : > { %5193 = vmatmul.msk.f32.gmra.mxu2 %vm278_vm0, %v6361_v58  ;;  %7890 = vst [vmem:[#allocation50_spill] sm:$0xff] %v6423_v25  ;;  %v3062_v58 = vld [vmem:[#allocation4 + $0xf0] sm:$0xff] }
 0x155   : > { %5227 = vmatmul.msk.f32.gmra.mxu3 %vm278_vm0, %v6177_v13  ;;  %5296 = vmatmul.msk.f32.gmra.mxu1 %vm278_vm0, %v6409_v0 }
 0x156   : > { %5262 = vmatmul.msk.f32.gmra.mxu0 %vm278_vm0, %v5823_v8  ;;  %3065 = vmatpush.msra.mxu1 %v3062_v58 }
 0x157   : > { %v699_v57 = vpop.f32.mrf.mxu2 }
 0x158   : > { %v911_v6 = vpop.f32.mrf.mxu3 }
 0x159   : > { %v6419_v39 = vadd.f32 %v911_v6, %v699_v57 }
 0x15a   : > { %v6429_v13 = vpop.f32.mrf.mxu1 }
 0x15b   : > { %7889 = vst [vmem:[#allocation49_spill] sm:$0xff] %v6419_v39  ;;  %v6421_v52 = vpop.f32.mrf.mxu0  ;;  %v6437_v39 = vld [vmem:[#allocation2 + $0x129] sm:$0xff] }
 0x15c   : > { %5194 = vmatmul.msk.f32.gmra.mxu2 %vm278_vm0, %v6377_v28  ;;  %7891 = vst [vmem:[#allocation51_spill] sm:$0xff] %v6429_v13  ;;  %v6449_v28 = vld [vmem:[#allocation2 + $0x131] sm:$0xff]  ;;  %v6461_v13 = vld [vmem:[#allocation2 + $0x149] sm:$0xff] }
 0x15d   : > { %5228 = vmatmul.msk.f32.gmra.mxu3 %vm278_vm0, %v5829_v9  ;;  %5297 = vmatmul.msk.f32.gmra.mxu1 %vm278_vm0, %v6423_v25 }
 0x15e   : > { %5263 = vmatmul.msk.f32.gmra.mxu0 %vm278_vm0, %v5906_v23 }
 0x15f   : > { %v702_v8 = vpop.f32.mrf.mxu2 }
 0x160   : > { %v914_v26 = vpop.f32.mrf.mxu3 }
 0x161   : > { %v6435_v57 = vadd.f32 %v914_v26, %v702_v8 }
 0x162   : > { %v1904_v9 = vpop.f32.mrf.mxu1 }
 0x163   : > { %7892 = vst [vmem:[#allocation52_spill] sm:$0xff] %v6435_v57  ;;  %v1626_v6 = vpop.f32.mrf.mxu0 }
 0x164   : > { %5195 = vmatmul.msk.f32.gmra.mxu2 %vm278_vm0, %v6393_v21 }
 0x165   : > { %5229 = vmatmul.msk.f32.gmra.mxu3 %vm278_vm0, %v5908_v24  ;;  %5298 = vmatmul.msk.f32.gmra.mxu1 %vm278_vm0, %v6437_v39  ;;  %v825_v24 = vadd.f32 %v6189_v19, %v6187_v14 }
 0x166   : > { %5264 = vmatmul.msk.f32.gmra.mxu0 %vm278_vm0, %v5929_v29 }
 0x167   : > { %v705_v23 = vpop.f32.mrf.mxu2 }
 0x168   : > { %v917_v8 = vpop.f32.mrf.mxu3 }
 0x169   : > { %v6447_v26 = vadd.f32 %v917_v8, %v705_v23 }
 0x16a   : > { %v1907_v29 = vpop.f32.mrf.mxu1 }
 0x16b   : > { %7893 = vst [vmem:[#allocation53_spill] sm:$0xff] %v6447_v26  ;;  %v1629_v57 = vpop.f32.mrf.mxu0 }
 0x16c   : > { %5196 = vmatmul.msk.f32.gmra.mxu2 %vm278_vm0, %v6409_v0  ;;  %v3061_v0 = vld [vmem:[#allocation4 + $0xe8] sm:$0xff] }
 0x16d   : > { %5230 = vmatmul.msk.f32.gmra.mxu3 %vm278_vm0, %v5931_v30  ;;  %5299 = vmatmul.msk.f32.gmra.mxu1 %vm278_vm0, %v6449_v28 }
 0x16e   : > { %5265 = vmatmul.msk.f32.gmra.mxu0 %vm278_vm0, %v5949_v35  ;;  %3066 = vmatpush.msra.mxu1 %v3061_v0  ;;  %v828_v35 = vadd.f32 %v6204_v5, %v6202_v63 }
 0x16f   : > { %v1070_v58 = vpop.f32.mrf.mxu2 }
 0x170   : > { %v1348_v23 = vpop.f32.mrf.mxu3  ;;  %v1166_v8 = vadd.f32 %v1070_v58, %v825_v24 }
 0x172   : > { %v1444_v26 = vadd.f32 %v1348_v23, %v1166_v8  ;;  %v1910_v58 = vpop.f32.mrf.mxu1 }
 0x173   : > { %v1632_v21 = vpop.f32.mrf.mxu0 }
 0x174   : > { %5197 = vmatmul.msk.f32.gmra.mxu2 %vm278_vm0, %v6423_v25  ;;  %v1722_v30 = vadd.f32 %v1626_v6, %v1444_v26  ;;  %v6475_v25 = vld [vmem:[#allocation2 + $0x151] sm:$0xff] }
 0x175   : > { %5231 = vmatmul.msk.f32.gmra.mxu3 %vm278_vm0, %v5951_v36  ;;  %5300 = vmatmul.msk.f32.gmra.mxu1 %vm278_vm0, %v6461_v13 }
 0x176   : > { %5266 = vmatmul.msk.f32.gmra.mxu0 %vm278_vm0, %v5969_v41  ;;  %v6473_v14 = vadd.f32 %v1904_v9, %v1722_v30  ;;  %v831_v41 = vadd.f32 %v6218_v33, %v6216_v46  ;;  %v834_v33 = vadd.f32 %v6233_v45, %v6231_v40 }
 0x177   : > { %v1073_v19 = vpop.f32.mrf.mxu2 }
 0x178   : > { %v1351_v0 = vpop.f32.mrf.mxu3  ;;  %v1167_v24 = vadd.f32 %v1073_v19, %v828_v35  ;;  %v6489_v19 = vld [vmem:[#allocation2 + $0x169] sm:$0xff] }
 0x17a   : > { %v1445_v23 = vadd.f32 %v1351_v0, %v1167_v24  ;;  %v1913_v35 = vpop.f32.mrf.mxu1 }
 0x17b   : > { %v1635_v8 = vpop.f32.mrf.mxu0 }
 0x17c   : > { %5198 = vmatmul.msk.f32.gmra.mxu2 %vm278_vm0, %v6437_v39  ;;  %v1723_v36 = vadd.f32 %v1629_v57, %v1445_v23 }
 0x17d   : > { %5232 = vmatmul.msk.f32.gmra.mxu3 %vm278_vm0, %v5971_v42  ;;  %5301 = vmatmul.msk.f32.gmra.mxu1 %vm278_vm0, %v6475_v25  ;;  %v3060_v42 = vld [vmem:[#allocation4 + $0xe0] sm:$0xff] }
 0x17e   : > { %5267 = vmatmul.msk.f32.gmra.mxu0 %vm278_vm0, %v5989_v47  ;;  %v6487_v5 = vadd.f32 %v1907_v29, %v1723_v36  ;;  %3067 = vmatpush.msra.mxu1 %v3060_v42  ;;  %v6503_v36 = vld [vmem:[#allocation2 + $0x171] sm:$0xff] }
 0x17f   : > { %v1076_v63 = vpop.f32.mrf.mxu2 }
 0x180   : > { %v1354_v6 = vpop.f32.mrf.mxu3  ;;  %v1168_v9 = vadd.f32 %v1076_v63, %v831_v41 }
 0x182   : > { %v1446_v26 = vadd.f32 %v1354_v6, %v1168_v9  ;;  %v6517_v9 = vld [vmem:[#allocation2 + $0x189] sm:$0xff] }
 0x183   : > { %v1638_v30 = vpop.f32.mrf.mxu0 }
 0x184   : > { %5199 = vmatmul.msk.f32.gmra.mxu2 %vm278_vm0, %v6449_v28  ;;  %v1724_v47 = vadd.f32 %v1632_v21, %v1446_v26  ;;  %v837_v21 = vadd.f32 %v6248_v31, %v6246_v27  ;;  %v840_v27 = vadd.f32 %v6263_v37, %v6261_v32 }
 0x185   : > { %5233 = vmatmul.msk.f32.gmra.mxu3 %vm278_vm0, %v5991_v48  ;;  %5302 = vmatmul.msk.f32.gmra.mxu1 %vm278_vm0, %v6489_v19 }
 0x186   : > { %5268 = vmatmul.msk.f32.gmra.mxu0 %vm278_vm0, %v6009_v53  ;;  %v6501_v46 = vadd.f32 %v1910_v58, %v1724_v47  ;;  %v1916_v53 = vpop.f32.mrf.mxu1 }
 0x187   : > { %v1079_v57 = vpop.f32.mrf.mxu2 }
 0x188   : > { %v1357_v29 = vpop.f32.mrf.mxu3  ;;  %v1169_v0 = vadd.f32 %v1079_v57, %v834_v33  ;;  %v6531_v57 = vld [vmem:[#allocation2 + $0x191] sm:$0xff] }
 0x18a   : > { %v1447_v24 = vadd.f32 %v1357_v29, %v1169_v0 }
 0x18b   : > { %v1641_v23 = vpop.f32.mrf.mxu0 }
 0x18c   : > { %5200 = vmatmul.msk.f32.gmra.mxu2 %vm278_vm0, %v6461_v13  ;;  %v1725_v48 = vadd.f32 %v1635_v8, %v1447_v24 }
 0x18d   : > { %5234 = vmatmul.msk.f32.gmra.mxu3 %vm278_vm0, %v6011_v54  ;;  %5303 = vmatmul.msk.f32.gmra.mxu1 %vm278_vm0, %v6503_v36  ;;  %v3059_v54 = vld [vmem:[#allocation4 + $0xd8] sm:$0xff] }
 0x18e   : > { %5269 = vmatmul.msk.f32.gmra.mxu0 %vm278_vm0, %v6029_v59  ;;  %v6515_v40 = vadd.f32 %v1913_v35, %v1725_v48  ;;  %3068 = vmatpush.msra.mxu1 %v3059_v54  ;;  %v1919_v8 = vpop.f32.mrf.mxu1 }
 0x18f   : > { %v1082_v45 = vpop.f32.mrf.mxu2 }
 0x190   : > { %v1360_v58 = vpop.f32.mrf.mxu3  ;;  %v1170_v41 = vadd.f32 %v1082_v45, %v837_v21 }
 0x192   : > { %v1448_v63 = vadd.f32 %v1360_v58, %v1170_v41 }
 0x193   : > { %v1644_v6 = vpop.f32.mrf.mxu0 }
 0x194   : > { %5201 = vmatmul.msk.f32.gmra.mxu2 %vm278_vm0, %v6475_v25  ;;  %v1726_v59 = vadd.f32 %v1638_v30, %v1448_v63  ;;  %v6559_v63 = vld [vmem:[#allocation2 + $0x1b1] sm:$0xff] }
 0x195   : > { %5235 = vmatmul.msk.f32.gmra.mxu3 %vm278_vm0, %v6031_v60  ;;  %5304 = vmatmul.msk.f32.gmra.mxu1 %vm278_vm0, %v6517_v9 }
 0x196   : > { %5270 = vmatmul.msk.f32.gmra.mxu0 %vm278_vm0, %v6049_v1  ;;  %v6529_v31 = vadd.f32 %v1916_v53, %v1726_v59  ;;  %v843_v1 = vadd.f32 %v6279_v43, %v6277_v38  ;;  %v1922_v0 = vpop.f32.mrf.mxu1  ;;  %v6545_v53 = vld [vmem:[#allocation2 + $0x1a9] sm:$0xff]  ;;  %v846_v38 = vadd.f32 %v6295_v51, %v6293_v49  ;;  %v849_v51 = vadd.f32 %v6311_v44, %v6309_v55 }
 0x197   : > { %v1085_v26 = vpop.f32.mrf.mxu2  ;;  %v395_v44 = vld [vmem:[%s5794_s9 + $0xf8] sm:$0xff]  ;;  %v7895_v55 = vld [vmem:[#allocation14_spill] sm:$0xff] }
 0x198   : > { %v1363_v35 = vpop.f32.mrf.mxu3  ;;  %v1171_v42 = vadd.f32 %v1085_v26, %v840_v27  ;;  %v6575_v26 = vld [vmem:[#allocation2 + $0x1c9] sm:$0xff]  ;;  %427 = vst.msk [vmem:[#allocation2 + $0x210] sm:$0xff] %vm278_vm0, %v395_v44 }
 0x19a   : > { %v1449_v47 = vadd.f32 %v1363_v35, %v1171_v42  ;;  %v3057_v35 = vld [vmem:[#allocation4 + $0xc8] sm:$0xff] }
 0x19b   : > { %v1647_v33 = vpop.f32.mrf.mxu0 }
 0x19c   : > { %5202 = vmatmul.msk.f32.gmra.mxu2 %vm278_vm0, %v6489_v19  ;;  %v1727_v60 = vadd.f32 %v1641_v23, %v1449_v47  ;;  %v852_v47 = vadd.f32 %v6327_v50, %v6325_v61  ;;  %v855_v50 = vadd.f32 %v6343_v56, %v6341_v3  ;;  %v858_v56 = vadd.f32 %v6359_v62, %v6357_v11 }
 0x19d   : > { %5236 = vmatmul.msk.f32.gmra.mxu3 %vm278_vm0, %v6051_v2  ;;  %5305 = vmatmul.msk.f32.gmra.mxu1 %vm278_vm0, %v6531_v57  ;;  %v3058_v2 = vld [vmem:[#allocation4 + $0xd0] sm:$0xff]  ;;  %v861_v62 = vadd.f32 %v6375_v4, %v6373_v17  ;;  %v864_v4 = vadd.f32 %v6391_v12, %v6389_v22  ;;  %v867_v12 = vadd.f32 %v6407_v18, %v6405_v34 }
 0x19e   : > { %5271 = vmatmul.msk.f32.gmra.mxu0 %vm278_vm0, %v6069_v7  ;;  %v6543_v32 = vadd.f32 %v1919_v8, %v1727_v60  ;;  %3069 = vmatpush.msra.mxu1 %v3058_v2  ;;  %v7904_v18 = vld [vmem:[#allocation51_spill] sm:$0xff] }
 0x19f   : > { %v1088_v37 = vpop.f32.mrf.mxu2  ;;  %v870_v34 = vadd.f32 %v7904_v18, %v6421_v52 }
 0x1a0   : > { %v1366_v30 = vpop.f32.mrf.mxu3  ;;  %v1172_v29 = vadd.f32 %v1088_v37, %v843_v1  ;;  %3070 = vmatpush.msra.mxu1 %v3057_v35 }
 0x1a2   : > { %v1450_v24 = vadd.f32 %v1366_v30, %v1172_v29  ;;  %v6591_v29 = vld [vmem:[#allocation2 + $0x1d1] sm:$0xff] }
 0x1a3   : > { %v1650_v48 = vpop.f32.mrf.mxu0 }
 0x1a4   : > { %5203 = vmatmul.msk.f32.gmra.mxu2 %vm278_vm0, %v6503_v36  ;;  %v1728_v7 = vadd.f32 %v1644_v6, %v1450_v24  ;;  %v394_v6 = vld [vmem:[%s5794_s9 + $0xf0] sm:$0xff]  ;;  %s4991_s9 = sshll.u32 %s7527_s17, 4  ;;  %s4992_s9 = int_to_ptr.vmem [resolvable:$true] %s4991_s9 }
 0x1a5   : > { %5237 = vmatmul.msk.f32.gmra.mxu3 %vm278_vm0, %v6071_v10  ;;  %5306 = vmatmul.msk.f32.gmra.mxu1 %vm278_vm0, %v6545_v53  ;;  %v1925_v10 = vpop.f32.mrf.mxu1  ;;  %426 = vst.msk [vmem:[#allocation2 + $0x208] sm:$0xff] %vm278_vm0, %v394_v6 }
 0x1a6   : > { %5272 = vmatmul.msk.f32.gmra.mxu0 %vm278_vm0, %v6089_v15  ;;  %v6557_v43 = vadd.f32 %v1922_v0, %v1728_v7  ;;  %v7896_v0 = vld [vmem:[#allocation15_spill] sm:$0xff] }
 0x1a7   : > { %v1091_v23 = vpop.f32.mrf.mxu2 }
 0x1a8   : > { %v1369_v21 = vpop.f32.mrf.mxu3  ;;  %v1173_v45 = vadd.f32 %v1091_v23, %v846_v38 }
 0x1aa   : > { %v1451_v58 = vadd.f32 %v1369_v21, %v1173_v45  ;;  %v6605_v21 = vld [vmem:[#allocation2 + $0x1e9] sm:$0xff]  ;;  %v3056_v45 = vld [vmem:[#allocation4 + $0xc0] sm:$0xff] }
 0x1ab   : > { %v1653_v41 = vpop.f32.mrf.mxu0  ;;  %3071 = vmatpush.msra.mxu1 %v3056_v45 }
 0x1ac   : > { %5204 = vmatmul.msk.f32.gmra.mxu2 %vm278_vm0, %v6517_v9  ;;  %v1729_v15 = vadd.f32 %v1647_v33, %v1451_v58  ;;  %v7898_v58 = vld [vmem:[#allocation17_spill] sm:$0xff] }
 0x1ad   : > { %5238 = vmatmul.msk.f32.gmra.mxu3 %vm278_vm0, %v6091_v16  ;;  %5307 = vmatmul.msk.f32.gmra.mxu1 %vm278_vm0, %v6559_v63 }
 0x1ae   : > { %5273 = vmatmul.msk.f32.gmra.mxu0 %vm278_vm0, %v6107_v20  ;;  %v6573_v49 = vadd.f32 %v1925_v10, %v1729_v15  ;;  %v7894_v20 = vld [vmem:[#allocation13_spill] sm:$0xff]  ;;  %v7899_v10 = vld [vmem:[#allocation18_spill] sm:$0xff] }
 0x1af   : > { %v1094_v54 = vpop.f32.mrf.mxu2 }
 0x1b0   : > { %v1372_v59 = vpop.f32.mrf.mxu3  ;;  %v1174_v27 = vadd.f32 %v1094_v54, %v849_v51 }
 0x1b2   : > { %v1452_v16 = vadd.f32 %v1372_v59, %v1174_v27  ;;  %v6619_v59 = vld [vmem:[#allocation2 + $0x1f1] sm:$0xff] }
 0x1b3   : > { %v1656_v8 = vpop.f32.mrf.mxu0  ;;  %v7900_v27 = vld [vmem:[#allocation19_spill] sm:$0xff] }
 0x1b4   : > { %5205 = vmatmul.msk.f32.gmra.mxu2 %vm278_vm0, %v6531_v57  ;;  %v6581_v42 = vadd.f32 %v1650_v48, %v1452_v16  ;;  %v7897_v48 = vld [vmem:[#allocation16_spill] sm:$0xff] }
 0x1b5   : > { %5239 = vmatmul.msk.f32.gmra.mxu3 %vm278_vm0, %v7894_v20  ;;  %5308 = vmatmul.msk.f32.gmra.mxu1 %vm278_vm0, %v6575_v26 }
 0x1b6   : > { %5274 = vmatmul.msk.f32.gmra.mxu0 %vm278_vm0, %v7895_v55 }
 0x1b7   : > { %v1097_v33 = vpop.f32.mrf.mxu2 }
 0x1b8   : > { %v1375_v60 = vpop.f32.mrf.mxu3  ;;  %v1175_v1 = vadd.f32 %v1097_v33, %v852_v47  ;;  %v1506_v47 = vld [vmem:[#allocation2 + $0x208] sm:$0xff] }
 0x1b9   : > { %v6633_v33 = vld [vmem:[#allocation2 + $0x209] sm:$0xff] }
 0x1ba   : > { %v1453_v37 = vadd.f32 %v1375_v60, %v1175_v1  ;;  %v3055_v60 = vld [vmem:[#allocation4 + $0xb8] sm:$0xff]  ;;  %v7902_v1 = vld [vmem:[#allocation21_spill] sm:$0xff] }
 0x1bb   : > { %v1659_v30 = vpop.f32.mrf.mxu0  ;;  %3072 = vmatpush.msra.mxu1 %v3055_v60 }
 0x1bc   : > { %5206 = vmatmul.msk.f32.gmra.mxu2 %vm278_vm0, %v6545_v53  ;;  %v6597_v24 = vadd.f32 %v1653_v41, %v1453_v37 }
 0x1bd   : > { %5240 = vmatmul.msk.f32.gmra.mxu3 %vm278_vm0, %v7896_v0  ;;  %5309 = vmatmul.msk.f32.gmra.mxu1 %vm278_vm0, %v6591_v29 }
 0x1be   : > { %5275 = vmatmul.msk.f32.gmra.mxu0 %vm278_vm0, %v7897_v48  ;;  %v1228_v48 = vld [vmem:[#allocation2 + $0x207] sm:$0xff] }
 0x1bf   : > { %v1100_v61 = vpop.f32.mrf.mxu2 }
 0x1c0   : > { %v1378_v2 = vpop.f32.mrf.mxu3  ;;  %v1176_v7 = vadd.f32 %v1100_v61, %v855_v50 }
 0x1c2   : > { %v1454_v38 = vadd.f32 %v1378_v2, %v1176_v7  ;;  %v1507_v2 = vld [vmem:[#allocation2 + $0x210] sm:$0xff] }
 0x1c3   : > { %v1662_v23 = vpop.f32.mrf.mxu0  ;;  %v1785_v7 = vld [vmem:[#allocation2 + $0x211] sm:$0xff] }
 0x1c4   : > { %5207 = vmatmul.msk.f32.gmra.mxu2 %vm278_vm0, %v6559_v63  ;;  %v6611_v41 = vadd.f32 %v1656_v8, %v1454_v38  ;;  %v7901_v8 = vld [vmem:[#allocation20_spill] sm:$0xff] }
 0x1c5   : > { %5241 = vmatmul.msk.f32.gmra.mxu3 %vm278_vm0, %v7898_v58  ;;  %5310 = vmatmul.msk.f32.gmra.mxu1 %vm278_vm0, %v6605_v21  ;;  %v1229_v58 = vld [vmem:[#allocation2 + $0x20f] sm:$0xff] }
 0x1c6   : > { %5276 = vmatmul.msk.f32.gmra.mxu0 %vm278_vm0, %v7899_v10 }
 0x1c7   : > { %v1103_v3 = vpop.f32.mrf.mxu2 }
 0x1c8   : > { %v1381_v15 = vpop.f32.mrf.mxu3  ;;  %v1177_v6 = vadd.f32 %v1103_v3, %v858_v56  ;;  %v3054_v3 = vld [vmem:[#allocation4 + $0xb0] sm:$0xff] }
 0x1c9   : > { %3073 = vmatpush.msra.mxu1 %v3054_v3 }
 0x1ca   : > { %v1455_v51 = vadd.f32 %v1381_v15, %v1177_v6  ;;  %v7903_v6 = vld [vmem:[#allocation24_spill] sm:$0xff] }
 0x1cb   : > { %v1665_v54 = vpop.f32.mrf.mxu0 }
 0x1cc   : > { %5208 = vmatmul.msk.f32.gmra.mxu2 %vm278_vm0, %v6575_v26  ;;  %v6625_v16 = vadd.f32 %v1659_v30, %v1455_v51 }
 0x1cd   : > { %5242 = vmatmul.msk.f32.gmra.mxu3 %vm278_vm0, %v7900_v27  ;;  %5311 = vmatmul.msk.f32.gmra.mxu1 %vm278_vm0, %v6619_v59 }
 0x1ce   : > { %5277 = vmatmul.msk.f32.gmra.mxu0 %vm278_vm0, %v7901_v8  ;;  %v2033_v8 = vld [vmem:[#allocation2 + $0x47] sm:$0xff] }
 0x1cf   : > { %v1106_v11 = vpop.f32.mrf.mxu2 }
 0x1d0   : > { %v1384_v35 = vpop.f32.mrf.mxu3  ;;  %v1178_v20 = vadd.f32 %v1106_v11, %v861_v62  ;;  %v2311_v62 = vld [vmem:[#allocation2 + $0x48] sm:$0xff] }
 0x1d2   : > { %v1456_v44 = vadd.f32 %v1384_v35, %v1178_v20 }
 0x1d3   : > { %v1668_v55 = vpop.f32.mrf.mxu0 }
 0x1d4   : > { %5209 = vmatmul.msk.f32.gmra.mxu2 %vm278_vm0, %v6591_v29  ;;  %v6639_v37 = vadd.f32 %v1662_v23, %v1456_v44  ;;  %v7905_v44 = vld [vmem:[#allocation26_spill] sm:$0xff] }
 0x1d5   : > { %5243 = vmatmul.msk.f32.gmra.mxu3 %vm278_vm0, %v7902_v1  ;;  %5312 = vmatmul.msk.f32.gmra.mxu1 %vm278_vm0, %v6633_v33 }
 0x1d6   : > { %5278 = vmatmul.msk.f32.gmra.mxu0 %vm278_vm0, %v1506_v47  ;;  %v7907_v47 = vld [vmem:[#allocation23_spill] sm:$0xff] }
 0x1d7   : > { %v1109_v17 = vpop.f32.mrf.mxu2 }
 0x1d8   : > { %v1387_v30 = vpop.f32.mrf.mxu3  ;;  %v1179_v0 = vadd.f32 %v1109_v17, %v864_v4  ;;  %v2034_v17 = vld [vmem:[#allocation2 + $0x4f] sm:$0xff] }
 0x1da   : > { %v1457_v50 = vadd.f32 %v1387_v30, %v1179_v0  ;;  %v2312_v30 = vld [vmem:[#allocation2 + $0x50] sm:$0xff] }
 0x1db   : > { %v1671_v61 = vpop.f32.mrf.mxu0 }
 0x1dc   : > { %5210 = vmatmul.msk.f32.gmra.mxu2 %vm278_vm0, %v6605_v21  ;;  %v6649_v38 = vadd.f32 %v1665_v54, %v1457_v50  ;;  %v3053_v50 = vld [vmem:[#allocation4 + $0xa8] sm:$0xff] }
 0x1dd   : > { %5244 = vmatmul.msk.f32.gmra.mxu3 %vm278_vm0, %v1228_v48  ;;  %5313 = vmatmul.msk.f32.gmra.mxu1 %vm278_vm0, %v1785_v7  ;;  %v6678_v7 = vpop.f32.mrf.mxu1 }
 0x1de   : > { %5279 = vmatmul.msk.f32.gmra.mxu0 %vm278_vm0, %v1507_v2  ;;  %3074 = vmatpush.msra.mxu1 %v3053_v50  ;;  %v7908_v2 = vld [vmem:[#allocation28_spill] sm:$0xff] }
 0x1df   : > { %v1112_v22 = vpop.f32.mrf.mxu2 }
 0x1e0   : > { %v1390_v23 = vpop.f32.mrf.mxu3  ;;  %v1180_v45 = vadd.f32 %v1112_v22, %v867_v12 }
 0x1e2   : > { %v1458_v10 = vadd.f32 %v1390_v23, %v1180_v45  ;;  %v7909_v23 = vld [vmem:[#allocation25_spill] sm:$0xff] }
 0x1e3   : > { %v1674_v56 = vpop.f32.mrf.mxu0 }
 0x1e4   : > { %5211 = vmatmul.msk.f32.gmra.mxu2 %vm278_vm0, %v6619_v59  ;;  %v6658_v15 = vadd.f32 %v1668_v55, %v1458_v10  ;;  %v7906_v55 = vld [vmem:[#allocation22_spill] sm:$0xff] }
 0x1e5   : > { %5245 = vmatmul.msk.f32.gmra.mxu3 %vm278_vm0, %v1229_v58  ;;  %v873_v60 = vadd.f32 %v7907_v47, %v7906_v55  ;;  %v2035_v58 = vld [vmem:[#allocation2 + $0x67] sm:$0xff] }
 0x1e6   : > { %5384 = vmatmul.msk.f32.vlgmr.msra.gmra.mxu0 %vm278_vm0, %v7903_v6  ;;  %v2313_v10 = vld [vmem:[#allocation2 + $0x68] sm:$0xff]  ;;  %v3052_v47 = vld [vmem:[#allocation4 + $0xa0] sm:$0xff] }
 0x1e7   : > { %v1115_v51 = vpop.f32.mrf.mxu2  ;;  %3075 = vmatpush.msra.mxu1 %v3052_v47  ;;  %v7917_v47 = vld [vmem:[#allocation33_spill] sm:$0xff] }
 0x1e8   : > { %v1393_v54 = vpop.f32.mrf.mxu3  ;;  %v1181_v27 = vadd.f32 %v1115_v51, %v870_v34 }
 0x1ea   : > { %v1459_v11 = vadd.f32 %v1393_v54, %v1181_v27  ;;  %v6687_v54 = vpop.f32.mrf.mxu1  ;;  %v7911_v27 = vld [vmem:[#allocation27_spill] sm:$0xff] }
 0x1eb   : > { %v1677_v35 = vpop.f32.mrf.mxu0 }
 0x1ec   : > { %5316 = vmatmul.msk.f32.vlgmr.msra.gmra.mxu2 %vm278_vm0, %v2033_v8  ;;  %v6666_v20 = vadd.f32 %v1671_v61, %v1459_v11  ;;  %v2314_v11 = vld [vmem:[#allocation2 + $0x70] sm:$0xff] }
 0x1ed   : > { %5350 = vmatmul.msk.f32.vlgmr.msra.gmra.mxu3 %vm278_vm0, %v2311_v62  ;;  %v2036_v62 = vld [vmem:[#allocation2 + $0x6f] sm:$0xff] }
 0x1ee   : > { %5385 = vmatmul.msk.f32.gmra.mxu0 %vm278_vm0, %v7905_v44 }
 0x1ef   : > { %v1118_v52 = vpop.f32.mrf.mxu2 }
 0x1f0   : > { %v1396_v1 = vpop.f32.mrf.mxu3  ;;  %v1182_v4 = vadd.f32 %v1118_v52, %v873_v60  ;;  %v7912_v60 = vld [vmem:[#allocation32_spill] sm:$0xff] }
 0x1f2   : > { %v1460_v0 = vadd.f32 %v1396_v1, %v1182_v4  ;;  %v7913_v4 = vld [vmem:[#allocation29_spill] sm:$0xff]  ;;  %v6697_v50 = vpop.f32.mrf.mxu1 }
 0x1f3   : > { %v1680_v48 = vpop.f32.mrf.mxu0 }
 0x1f4   : > { %5317 = vmatmul.msk.f32.gmra.mxu2 %vm278_vm0, %v2034_v17  ;;  %v6674_v61 = vadd.f32 %v1674_v56, %v1460_v0  ;;  %v7910_v56 = vld [vmem:[#allocation30_spill] sm:$0xff] }
 0x1f5   : > { %5351 = vmatmul.msk.f32.gmra.mxu3 %vm278_vm0, %v2312_v30  ;;  %v2037_v30 = vld [vmem:[#allocation2 + $0x87] sm:$0xff] }
 0x1f6   : > { %5386 = vmatmul.msk.f32.gmra.mxu0 %vm278_vm0, %v7908_v2  ;;  %v2315_v0 = vld [vmem:[#allocation2 + $0x88] sm:$0xff] }
 0x1f7   : > { %v1121_v12 = vpop.f32.mrf.mxu2 }
 0x1f8   : > { %v1399_v22 = vpop.f32.mrf.mxu3  ;;  %v1183_v45 = vadd.f32 %v1121_v12, %v7909_v23 }
 0x1fa   : > { %v1461_v3 = vadd.f32 %v1399_v22, %v1183_v45 }
 0x1fb   : > { %v1683_v6 = vpop.f32.mrf.mxu0 }
 0x1fc   : > { %5318 = vmatmul.msk.f32.gmra.mxu2 %vm278_vm0, %v2035_v58  ;;  %v6683_v18 = vadd.f32 %v1677_v35, %v1461_v3  ;;  %v7915_v58 = vld [vmem:[#allocation31_spill] sm:$0xff] }
 0x1fd   : > { %5352 = vmatmul.msk.f32.gmra.mxu3 %vm278_vm0, %v2313_v10  ;;  %v2038_v3 = vld [vmem:[#allocation2 + $0x8f] sm:$0xff] }
 0x1fe   : > { %5387 = vmatmul.msk.f32.gmra.mxu0 %vm278_vm0, %v7910_v56  ;;  %v2316_v56 = vld [vmem:[#allocation2 + $0x90] sm:$0xff] }
 0x1ff   : > { %v1124_v34 = vpop.f32.mrf.mxu2 }
 0x200   : > { %v1402_v51 = vpop.f32.mrf.mxu3  ;;  %v1184_v8 = vadd.f32 %v1124_v34, %v7911_v27  ;;  %v3051_v27 = vld [vmem:[#allocation4 + $0x98] sm:$0xff] }
 0x201   : > { %3076 = vmatpush.msra.mxu1 %v3051_v27  ;;  %v7922_v27 = vld [vmem:[#allocation40_spill] sm:$0xff] }
 0x202   : > { %v1462_v44 = vadd.f32 %v1402_v51, %v1184_v8  ;;  %v6706_v8 = vpop.f32.mrf.mxu1 }
 0x203   : > { %v1686_v55 = vpop.f32.mrf.mxu0 }
 0x204   : > { %5319 = vmatmul.msk.f32.gmra.mxu2 %vm278_vm0, %v2036_v62  ;;  %v6692_v35 = vadd.f32 %v1680_v48, %v1462_v44  ;;  %v7914_v48 = vld [vmem:[#allocation34_spill] sm:$0xff]  ;;  %v7916_v62 = vld [vmem:[#allocation36_spill] sm:$0xff] }
 0x205   : > { %5353 = vmatmul.msk.f32.gmra.mxu3 %vm278_vm0, %v2314_v11 }
 0x206   : > { %5388 = vmatmul.msk.f32.gmra.mxu0 %vm278_vm0, %v7912_v60 }
 0x207   : > { %v1127_v52 = vpop.f32.mrf.mxu2 }
 0x208   : > { %v1405_v1 = vpop.f32.mrf.mxu3  ;;  %v1185_v17 = vadd.f32 %v1127_v52, %v7913_v4  ;;  %v2039_v52 = vld [vmem:[#allocation2 + $0xa7] sm:$0xff] }
 0x20a   : > { %v1463_v2 = vadd.f32 %v1405_v1, %v1185_v17  ;;  %v2317_v1 = vld [vmem:[#allocation2 + $0xa8] sm:$0xff] }
 0x20b   : > { %v1689_v12 = vpop.f32.mrf.mxu0 }
 0x20c   : > { %5320 = vmatmul.msk.f32.gmra.mxu2 %vm278_vm0, %v2037_v30  ;;  %v6701_v22 = vadd.f32 %v1683_v6, %v1463_v2 }
 0x20d   : > { %5354 = vmatmul.msk.f32.gmra.mxu3 %vm278_vm0, %v2315_v0  ;;  %v7919_v0 = vld [vmem:[#allocation38_spill] sm:$0xff] }
 0x20e   : > { %5389 = vmatmul.msk.f32.gmra.mxu0 %vm278_vm0, %v7914_v48 }
 0x20f   : > { %v1130_v23 = vpop.f32.mrf.mxu2 }
 0x210   : > { %v1408_v45 = vpop.f32.mrf.mxu3  ;;  %v1186_v10 = vadd.f32 %v1130_v23, %v7915_v58  ;;  %v7920_v23 = vld [vmem:[#allocation35_spill] sm:$0xff] }
 0x211   : > { %v2040_v58 = vld [vmem:[#allocation2 + $0xaf] sm:$0xff] }
 0x212   : > { %v1464_v34 = vadd.f32 %v1408_v45, %v1186_v10  ;;  %v2318_v10 = vld [vmem:[#allocation2 + $0xb0] sm:$0xff] }
 0x213   : > { %v1692_v51 = vpop.f32.mrf.mxu0 }
 0x214   : > { %5321 = vmatmul.msk.f32.gmra.mxu2 %vm278_vm0, %v2038_v3  ;;  %v6710_v6 = vadd.f32 %v1686_v55, %v1464_v34  ;;  %v6721_v55 = vpop.f32.mrf.mxu1  ;;  %v3050_v34 = vld [vmem:[#allocation4 + $0x90] sm:$0xff] }
 0x215   : > { %5355 = vmatmul.msk.f32.gmra.mxu3 %vm278_vm0, %v2316_v56  ;;  %3077 = vmatpush.msra.mxu1 %v3050_v34 }
 0x216   : > { %5390 = vmatmul.msk.f32.gmra.mxu0 %vm278_vm0, %v7916_v62 }
 0x217   : > { %v1133_v11 = vpop.f32.mrf.mxu2 }
 0x218   : > { %v1411_v44 = vpop.f32.mrf.mxu3  ;;  %v1187_v60 = vadd.f32 %v1133_v11, %v7917_v47  ;;  %v7923_v47 = vld [vmem:[#allocation37_spill] sm:$0xff] }
 0x21a   : > { %v1465_v4 = vadd.f32 %v1411_v44, %v1187_v60 }
 0x21b   : > { %v1695_v17 = vpop.f32.mrf.mxu0 }
 0x21c   : > { %5322 = vmatmul.msk.f32.gmra.mxu2 %vm278_vm0, %v2039_v52  ;;  %v6717_v30 = vadd.f32 %v1689_v12, %v1465_v4  ;;  %v6730_v44 = vpop.f32.mrf.mxu1  ;;  %v2041_v52 = vld [vmem:[#allocation2 + $0xc7] sm:$0xff] }
 0x21d   : > { %5356 = vmatmul.msk.f32.gmra.mxu3 %vm278_vm0, %v2317_v1  ;;  %v2319_v1 = vld [vmem:[#allocation2 + $0xc8] sm:$0xff] }
 0x21e   : > { %7918 = vst [vmem:[#allocation13_spill] sm:$0xff] %v6717_v30  ;;  %5391 = vmatmul.msk.f32.gmra.mxu0 %vm278_vm0, %v7919_v0  ;;  %v3726_v30 = vld [vmem:[#allocation4 + $0x278] sm:$0xff] }
 0x21f   : > { %v1136_v2 = vpop.f32.mrf.mxu2 }
 0x220   : > { %v1414_v48 = vpop.f32.mrf.mxu3  ;;  %v1188_v45 = vadd.f32 %v1136_v2, %v7920_v23 }
 0x222   : > { %v1466_v3 = vadd.f32 %v1414_v48, %v1188_v45  ;;  %v7926_v45 = vld [vmem:[#allocation39_spill] sm:$0xff] }
 0x223   : > { %v1698_v56 = vpop.f32.mrf.mxu0 }
 0x224   : > { %5323 = vmatmul.msk.f32.gmra.mxu2 %vm278_vm0, %v2040_v58  ;;  %v6726_v12 = vadd.f32 %v1692_v51, %v1466_v3  ;;  %v7925_v51 = vld [vmem:[#allocation42_spill] sm:$0xff]  ;;  %v2320_v3 = vld [vmem:[#allocation2 + $0xd0] sm:$0xff]  ;;  %v6740_v34 = vpop.f32.mrf.mxu1 }
 0x225   : > { %5357 = vmatmul.msk.f32.gmra.mxu3 %vm278_vm0, %v2318_v10  ;;  %v2042_v10 = vld [vmem:[#allocation2 + $0xcf] sm:$0xff] }
 0x226   : > { %7921 = vst [vmem:[#allocation14_spill] sm:$0xff] %v6726_v12  ;;  %5392 = vmatmul.msk.f32.gmra.mxu0 %vm278_vm0, %v7922_v27 }
 0x227   : > { %v1139_v62 = vpop.f32.mrf.mxu2 }
 0x228   : > { %v1417_v11 = vpop.f32.mrf.mxu3  ;;  %v1189_v60 = vadd.f32 %v1139_v62, %v7923_v47  ;;  %v7928_v47 = vld [vmem:[#allocation44_spill] sm:$0xff] }
 0x22a   : > { %v1467_v4 = vadd.f32 %v1417_v11, %v1189_v60  ;;  %v3049_v11 = vld [vmem:[#allocation4 + $0x88] sm:$0xff] }
 0x22b   : > { %v1701_v0 = vpop.f32.mrf.mxu0  ;;  %3078 = vmatpush.msra.mxu1 %v3049_v11  ;;  %v7932_v11 = vld [vmem:[#allocation43_spill] sm:$0xff] }
 0x22c   : > { %5324 = vmatmul.msk.f32.gmra.mxu2 %vm278_vm0, %v2041_v52  ;;  %v6735_v2 = vadd.f32 %v1695_v17, %v1467_v4 }
 0x22d   : > { %5358 = vmatmul.msk.f32.gmra.mxu3 %vm278_vm0, %v2319_v1  ;;  %v7929_v1 = vld [vmem:[#allocation41_spill] sm:$0xff] }
 0x22e   : > { %7924 = vst [vmem:[#allocation15_spill] sm:$0xff] %v6735_v2  ;;  %5393 = vmatmul.msk.f32.gmra.mxu0 %vm278_vm0, %v7925_v51  ;;  %v2043_v51 = vld [vmem:[#allocation2 + $0xe7] sm:$0xff] }
 0x22f   : > { %v1142_v48 = vpop.f32.mrf.mxu2 }
 0x230   : > { %v1420_v23 = vpop.f32.mrf.mxu3  ;;  %v1190_v58 = vadd.f32 %v1142_v48, %v7926_v45  ;;  %v2321_v48 = vld [vmem:[#allocation2 + $0xe8] sm:$0xff] }
 0x232   : > { %v1468_v27 = vadd.f32 %v1420_v23, %v1190_v58  ;;  %v6749_v58 = vpop.f32.mrf.mxu1 }
 0x233   : > { %v1704_v62 = vpop.f32.mrf.mxu0 }
 0x234   : > { %5325 = vmatmul.msk.f32.gmra.mxu2 %vm278_vm0, %v2042_v10  ;;  %v6744_v17 = vadd.f32 %v1698_v56, %v1468_v27  ;;  %v7931_v56 = vld [vmem:[#allocation46_spill] sm:$0xff] }
 0x235   : > { %5359 = vmatmul.msk.f32.gmra.mxu3 %vm278_vm0, %v2320_v3 }
 0x236   : > { %7927 = vst [vmem:[#allocation16_spill] sm:$0xff] %v6744_v17  ;;  %5394 = vmatmul.msk.f32.gmra.mxu0 %vm278_vm0, %v7928_v47 }
 0x237   : > { %v1145_v60 = vpop.f32.mrf.mxu2 }
 0x238   : > { %v1423_v52 = vpop.f32.mrf.mxu3  ;;  %v1191_v4 = vadd.f32 %v1145_v60, %v7929_v1  ;;  %v2044_v60 = vld [vmem:[#allocation2 + $0xef] sm:$0xff] }
 0x239   : > { %v2322_v1 = vld [vmem:[#allocation2 + $0xf0] sm:$0xff] }
 0x23a   : > { %v1469_v45 = vadd.f32 %v1423_v52, %v1191_v4  ;;  %v3048_v4 = vld [vmem:[#allocation4 + $0x80] sm:$0xff] }
 0x23b   : > { %v1707_v23 = vpop.f32.mrf.mxu0  ;;  %3079 = vmatpush.msra.mxu1 %v3048_v4  ;;  %v2045_v4 = vld [vmem:[#allocation2 + $0x107] sm:$0xff] }
 0x23c   : > { %5326 = vmatmul.msk.f32.gmra.mxu2 %vm278_vm0, %v2043_v51  ;;  %v6753_v10 = vadd.f32 %v1701_v0, %v1469_v45  ;;  %v7934_v0 = vld [vmem:[#allocation48_spill] sm:$0xff]  ;;  %v6764_v45 = vpop.f32.mrf.mxu1 }
 0x23d   : > { %5360 = vmatmul.msk.f32.gmra.mxu3 %vm278_vm0, %v2321_v48  ;;  %v5492_v48 = vld [vmem:[#allocation3] sm:$0xff]  ;;  %3727 = vmatpush.msrb.mxu1 %v3726_v30 }
 0x23e   : > { %7930 = vst [vmem:[#allocation17_spill] sm:$0xff] %v6753_v10  ;;  %5395 = vmatmul.msk.f32.gmra.mxu0 %vm278_vm0, %v7931_v56  ;;  %3080 = vmatmul.f32.vlgmr.msra.gmra.mxu1 %v5492_v48  ;;  %v3014_v56 = vld [vmem:[#allocation4 + $0x78] sm:$0xff]  ;;  %v2323_v10 = vld [vmem:[#allocation2 + $0x108] sm:$0xff] }
 0x23f   : > { %v1148_v3 = vpop.f32.mrf.mxu2  ;;  %3177 = vmatpush.msrb.mxu2 %v3014_v56 }
 0x240   : > { %v1426_v27 = vpop.f32.mrf.mxu3  ;;  %v1192_v47 = vadd.f32 %v1148_v3, %v7932_v11 }
 0x242   : > { %v1470_v17 = vadd.f32 %v1426_v27, %v1192_v47  ;;  %v7935_v27 = vld [vmem:[#allocation45_spill] sm:$0xff] }
 0x243   : > { %v1710_v52 = vpop.f32.mrf.mxu0 }
 0x244   : > { %5327 = vmatmul.msk.f32.gmra.mxu2 %vm278_vm0, %v2044_v60  ;;  %v6760_v51 = vadd.f32 %v1704_v62, %v1470_v17  ;;  %v7937_v17 = vld [vmem:[#allocation50_spill] sm:$0xff] }
 0x245   : > { %5361 = vmatmul.msk.f32.gmra.mxu3 %vm278_vm0, %v2322_v1  ;;  %v3338_v1 = vld [vmem:[#allocation4 + $0x178] sm:$0xff] }
 0x246   : > { %7933 = vst [vmem:[#allocation18_spill] sm:$0xff] %v6760_v51  ;;  %5396 = vmatmul.msk.f32.gmra.mxu0 %vm278_vm0, %v7934_v0  ;;  %3339 = vmatpush.msrb.mxu3 %v3338_v1  ;;  %v6773_v51 = vpop.f32.mrf.mxu1 }
 0x247   : > { %v1151_v3 = vpop.f32.mrf.mxu2  ;;  %3083 = vmatmul.f32.gmra.mxu1 %v5492_v48 }
 0x248   : > { %v1429_v11 = vpop.f32.mrf.mxu3  ;;  %v1193_v47 = vadd.f32 %v1151_v3, %v7935_v27  ;;  %v7938_v3 = vld [vmem:[#allocation47_spill] sm:$0xff] }
 0x24a   : > { %v1471_v60 = vadd.f32 %v1429_v11, %v1193_v47  ;;  %v2046_v11 = vld [vmem:[#allocation2 + $0x10f] sm:$0xff] }
 0x24b   : > { %v1713_v2 = vpop.f32.mrf.mxu0  ;;  %v2324_v47 = vld [vmem:[#allocation2 + $0x110] sm:$0xff] }
 0x24c   : > { %5328 = vmatmul.msk.f32.gmra.mxu2 %vm278_vm0, %v2045_v4  ;;  %v6769_v62 = vadd.f32 %v1707_v23, %v1471_v60  ;;  %v7940_v4 = vld [vmem:[#allocation49_spill] sm:$0xff] }
 0x24d   : > { %5362 = vmatmul.msk.f32.gmra.mxu3 %vm278_vm0, %v2323_v10 }
 0x24e   : > { %7936 = vst [vmem:[#allocation19_spill] sm:$0xff] %v6769_v62  ;;  %5397 = vmatmul.msk.f32.gmra.mxu0 %vm278_vm0, %v7937_v17  ;;  %v2047_v17 = vld [vmem:[#allocation2 + $0x127] sm:$0xff] }
 0x24f   : > { %v1154_v0 = vpop.f32.mrf.mxu2  ;;  %v2325_v62 = vld [vmem:[#allocation2 + $0x128] sm:$0xff] }
 0x250   : > { %v1432_v56 = vpop.f32.mrf.mxu3  ;;  %v1194_v27 = vadd.f32 %v1154_v0, %v7938_v3  ;;  %v6783_v0 = vpop.f32.mrf.mxu1 }
 0x252   : > { %v1472_v12 = vadd.f32 %v1432_v56, %v1194_v27  ;;  %v3532_v27 = vld [vmem:[#allocation4 + $0x1f8] sm:$0xff] }
 0x253   : > { %v1716_v1 = vpop.f32.mrf.mxu0  ;;  %3533 = vmatpush.msrb.mxu0 %v3532_v27  ;;  %v3337_v27 = vld [vmem:[#allocation4 + $0x170] sm:$0xff] }
 0x254   : > { %5329 = vmatmul.msk.f32.gmra.mxu2 %vm278_vm0, %v2046_v11  ;;  %v6778_v23 = vadd.f32 %v1710_v52, %v1472_v12  ;;  %v3013_v11 = vld [vmem:[#allocation4 + $0x70] sm:$0xff]  ;;  %3340 = vmatpush.msrb.mxu3 %v3337_v27 }
 0x255   : > { %5363 = vmatmul.msk.f32.gmra.mxu3 %vm278_vm0, %v2324_v47  ;;  %3178 = vmatpush.msrb.mxu2 %v3013_v11  ;;  %v7942_v47 = vld [vmem:[#allocation52_spill] sm:$0xff]  ;;  %v2049_v11 = vld [vmem:[#allocation2 + $0x147] sm:$0xff]  ;;  %v3725_v27 = vld [vmem:[#allocation4 + $0x270] sm:$0xff] }
 0x256   : > { %7939 = vst [vmem:[#allocation20_spill] sm:$0xff] %v6778_v23  ;;  %5398 = vmatmul.msk.f32.gmra.mxu0 %vm278_vm0, %v6437_v39  ;;  %3728 = vmatpush.msrb.mxu1 %v3725_v27 }
 0x257   : > { %v1157_v10 = vpop.f32.mrf.mxu2 }
 0x258   : > { %v1435_v48 = vpop.f32.mrf.mxu3  ;;  %v1195_v60 = vadd.f32 %v1157_v10, %v7940_v4  ;;  %v2326_v4 = vld [vmem:[#allocation2 + $0x130] sm:$0xff]  ;;  %v6792_v30 = vpop.f32.mrf.mxu1 }
 0x25a   : > { %v1473_v3 = vadd.f32 %v1435_v48, %v1195_v60  ;;  %v2048_v48 = vld [vmem:[#allocation2 + $0x12f] sm:$0xff] }
 0x25b   : > { %v1719_v56 = vpop.f32.mrf.mxu0 }
 0x25c   : > { %5330 = vmatmul.msk.f32.gmra.mxu2 %vm278_vm0, %v2047_v17  ;;  %v6787_v39 = vadd.f32 %v1713_v2, %v1473_v3  ;;  %v7943_v17 = vld [vmem:[#allocation53_spill] sm:$0xff] }
 0x25d   : > { %5364 = vmatmul.msk.f32.gmra.mxu3 %vm278_vm0, %v2325_v62 }
 0x25e   : > { %7941 = vst [vmem:[#allocation21_spill] sm:$0xff] %v6787_v39  ;;  %5399 = vmatmul.msk.f32.gmra.mxu0 %vm278_vm0, %v6449_v28  ;;  %v3012_v39 = vld [vmem:[#allocation4 + $0x68] sm:$0xff] }
 0x25f   : > { %v1160_v12 = vpop.f32.mrf.mxu2  ;;  %3179 = vmatpush.msrb.mxu2 %v3012_v39 }
 0x260   : > { %v1438_v52 = vpop.f32.mrf.mxu3  ;;  %v1196_v10 = vadd.f32 %v1160_v12, %v7942_v47  ;;  %v2327_v12 = vld [vmem:[#allocation2 + $0x148] sm:$0xff] }
 0x262   : > { %v1474_v60 = vadd.f32 %v1438_v52, %v1196_v10  ;;  %v3531_v10 = vld [vmem:[#allocation4 + $0x1f0] sm:$0xff] }
 0x263   : > { %v2739_v23 = vpop.f32.mrf.mxu0  ;;  %3534 = vmatpush.msrb.mxu0 %v3531_v10 }
 0x264   : > { %5331 = vmatmul.msk.f32.gmra.mxu2 %vm278_vm0, %v2048_v48  ;;  %v6796_v2 = vadd.f32 %v1716_v1, %v1474_v60 }
 0x265   : > { %5365 = vmatmul.msk.f32.gmra.mxu3 %vm278_vm0, %v2326_v4 }
 0x266   : > { %5400 = vmatmul.msk.f32.gmra.mxu0 %vm278_vm0, %v6461_v13  ;;  %v6807_v13 = vpop.f32.mrf.mxu1 }
 0x267   : > { %v1163_v28 = vpop.f32.mrf.mxu2 }
 0x268   : > { %v1441_v62 = vpop.f32.mrf.mxu3  ;;  %v1197_v3 = vadd.f32 %v1163_v28, %v7943_v17  ;;  %v2050_v28 = vld [vmem:[#allocation2 + $0x14f] sm:$0xff] }
 0x26a   : > { %v1475_v52 = vadd.f32 %v1441_v62, %v1197_v3  ;;  %v2328_v62 = vld [vmem:[#allocation2 + $0x150] sm:$0xff]  ;;  %v6813_v3 = vld [vmem:[%s7821_s2] ss:$0 sm:$0xff] }
 0x26b   : > { %v2742_v47 = vpop.f32.mrf.mxu0 }
 0x26c   : > { %5332 = vmatmul.msk.f32.gmra.mxu2 %vm278_vm0, %v2049_v11  ;;  %v6803_v1 = vadd.f32 %v1719_v56, %v1475_v52  ;;  %v3336_v11 = vld [vmem:[#allocation4 + $0x168] sm:$0xff] }
 0x26d   : > { %5366 = vmatmul.msk.f32.gmra.mxu3 %vm278_vm0, %v2327_v12 }
 0x26e   : > { %5401 = vmatmul.msk.f32.gmra.mxu0 %vm278_vm0, %v6475_v25  ;;  %3341 = vmatpush.msrb.mxu3 %v3336_v11  ;;  %v6820_v52 = vpop.f32.mrf.mxu1 }
 0x26f   : > { %v2183_v48 = vpop.f32.mrf.mxu2 }
 0x270   : > { %v2461_v4 = vpop.f32.mrf.mxu3  ;;  %v2279_v60 = vadd.f32 %v2183_v48, %v6473_v14  ;;  %v2051_v48 = vld [vmem:[#allocation2 + $0x167] sm:$0xff] }
 0x272   : > { %v2557_v17 = vadd.f32 %v2461_v4, %v2279_v60  ;;  %v2329_v4 = vld [vmem:[#allocation2 + $0x168] sm:$0xff] }
 0x273   : > { %v2745_v56 = vpop.f32.mrf.mxu0 }
 0x274   : > { %v2835_v12 = vadd.f32 %v2739_v23, %v2557_v17  ;;  %5333 = vmatmul.msk.f32.gmra.mxu2 %vm278_vm0, %v2050_v28  ;;  %v3530_v28 = vld [vmem:[#allocation4 + $0x1e8] sm:$0xff]  ;;  %v3011_v17 = vld [vmem:[#allocation4 + $0x60] sm:$0xff] }
 0x275   : > { %5367 = vmatmul.msk.f32.gmra.mxu3 %vm278_vm0, %v2328_v62  ;;  %v3724_v62 = vld [vmem:[#allocation4 + $0x268] sm:$0xff]  ;;  %3535 = vmatpush.msrb.mxu0 %v3530_v28 }
 0x276   : > { %5402 = vmatmul.msk.f32.gmra.mxu0 %vm278_vm0, %v6489_v19  ;;  %v2871_v25 = vadd.f32 %v6813_v3, %v2835_v12  ;;  %3729 = vmatpush.msrb.mxu1 %v3724_v62 }
 0x277   : > { %v2186_v14 = vpop.f32.mrf.mxu2  ;;  %3180 = vmatpush.msrb.mxu2 %v3011_v17 }
 0x278   : > { %v2464_v39 = vpop.f32.mrf.mxu3  ;;  %v2903_v10 = vmax.f32 %v2871_v25, 0.0  ;;  %v2280_v27 = vadd.f32 %v2186_v14, %v6487_v5 }
 0x27a   : > { %2935 = vst [vmem:[#allocation3 + $0x28] sm:$0xff] %v2903_v10  ;;  %v2558_v23 = vadd.f32 %v2464_v39, %v2280_v27  ;;  %3086 = vmatmul.f32.gmra.mxu1 %v2903_v10  ;;  %v2052_v39 = vld [vmem:[#allocation2 + $0x16f] sm:$0xff]  ;;  %v6829_v27 = vpop.f32.mrf.mxu1 }
 0x27b   : > { %v2748_v60 = vpop.f32.mrf.mxu0  ;;  %v2330_v10 = vld [vmem:[#allocation2 + $0x170] sm:$0xff] }
 0x27c   : > { %v2836_v19 = vadd.f32 %v2742_v47, %v2558_v23  ;;  %5334 = vmatmul.msk.f32.gmra.mxu2 %vm278_vm0, %v2051_v48 }
 0x27d   : > { %5368 = vmatmul.msk.f32.gmra.mxu3 %vm278_vm0, %v2329_v4  ;;  %v3335_v4 = vld [vmem:[#allocation4 + $0x160] sm:$0xff] }
 0x27e   : > { %5403 = vmatmul.msk.f32.gmra.mxu0 %vm278_vm0, %v6503_v36  ;;  %v2872_v5 = vadd.f32 %v6813_v3, %v2836_v19  ;;  %3342 = vmatpush.msrb.mxu3 %v3335_v4  ;;  %v2053_v19 = vld [vmem:[#allocation2 + $0x187] sm:$0xff] }
 0x27f   : > { %v2189_v11 = vpop.f32.mrf.mxu2 }
 0x280   : > { %v2467_v12 = vpop.f32.mrf.mxu3  ;;  %v2904_v25 = vmax.f32 %v2872_v5, 0.0  ;;  %v2281_v14 = vadd.f32 %v2189_v11, %v6501_v46  ;;  %v2331_v5 = vld [vmem:[#allocation2 + $0x188] sm:$0xff] }
 0x282   : > { %2936 = vst [vmem:[#allocation3 + $0x30] sm:$0xff] %v2904_v25  ;;  %v2559_v47 = vadd.f32 %v2467_v12, %v2281_v14  ;;  %3089 = vmatmul.f32.gmra.mxu1 %v2904_v25  ;;  %v3723_v25 = vld [vmem:[#allocation4 + $0x260] sm:$0xff]  ;;  %v3010_v14 = vld [vmem:[#allocation4 + $0x58] sm:$0xff] }
 0x283   : > { %v2751_v48 = vpop.f32.mrf.mxu0  ;;  %3730 = vmatpush.msrb.mxu1 %v3723_v25  ;;  %3181 = vmatpush.msrb.mxu2 %v3010_v14  ;;  %v2055_v25 = vld [vmem:[#allocation2 + $0x1a7] sm:$0xff] }
 0x284   : > { %v2837_v23 = vadd.f32 %v2745_v56, %v2559_v47  ;;  %5335 = vmatmul.msk.f32.gmra.mxu2 %vm278_vm0, %v2052_v39  ;;  %v3529_v56 = vld [vmem:[#allocation4 + $0x1e0] sm:$0xff]  ;;  %v6837_v39 = vpop.f32.mrf.mxu1  ;;  %v2333_v14 = vld [vmem:[#allocation2 + $0x1a8] sm:$0xff] }
 0x285   : > { %5369 = vmatmul.msk.f32.gmra.mxu3 %vm278_vm0, %v2330_v10  ;;  %3536 = vmatpush.msrb.mxu0 %v3529_v56 }
 0x286   : > { %5404 = vmatmul.msk.f32.gmra.mxu0 %vm278_vm0, %v6517_v9  ;;  %v2873_v46 = vadd.f32 %v6813_v3, %v2837_v23 }
 0x287   : > { %v2192_v36 = vpop.f32.mrf.mxu2 }
 0x288   : > { %v2470_v28 = vpop.f32.mrf.mxu3  ;;  %v2905_v62 = vmax.f32 %v2873_v46, 0.0  ;;  %v2282_v17 = vadd.f32 %v2192_v36, %v6515_v40  ;;  %v2054_v46 = vld [vmem:[#allocation2 + $0x18f] sm:$0xff] }
 0x289   : > { %v2332_v36 = vld [vmem:[#allocation2 + $0x190] sm:$0xff] }
 0x28a   : > { %2937 = vst [vmem:[#allocation3 + $0x48] sm:$0xff] %v2905_v62  ;;  %v2560_v11 = vadd.f32 %v2470_v28, %v2282_v17  ;;  %3092 = vmatmul.f32.gmra.mxu1 %v2905_v62  ;;  %v3334_v62 = vld [vmem:[#allocation4 + $0x158] sm:$0xff] }
 0x28b   : > { %v2754_v12 = vpop.f32.mrf.mxu0  ;;  %3343 = vmatpush.msrb.mxu3 %v3334_v62  ;;  %v2056_v62 = vld [vmem:[#allocation2 + $0x1af] sm:$0xff] }
 0x28c   : > { %v2838_v9 = vadd.f32 %v2748_v60, %v2560_v11  ;;  %5336 = vmatmul.msk.f32.gmra.mxu2 %vm278_vm0, %v2053_v19 }
 0x28d   : > { %5370 = vmatmul.msk.f32.gmra.mxu3 %vm278_vm0, %v2331_v5 }
 0x28e   : > { %5405 = vmatmul.msk.f32.gmra.mxu0 %vm278_vm0, %v6531_v57  ;;  %v2874_v40 = vadd.f32 %v6813_v3, %v2838_v9  ;;  %v6849_v57 = vpop.f32.mrf.mxu1 }
 0x28f   : > { %v2195_v10 = vpop.f32.mrf.mxu2 }
 0x290   : > { %v2473_v47 = vpop.f32.mrf.mxu3  ;;  %v2906_v4 = vmax.f32 %v2874_v40, 0.0  ;;  %v2283_v23 = vadd.f32 %v2195_v10, %v6529_v31  ;;  %v3528_v40 = vld [vmem:[#allocation4 + $0x1d8] sm:$0xff] }
 0x291   : > { %v3722_v10 = vld [vmem:[#allocation4 + $0x258] sm:$0xff]  ;;  %3537 = vmatpush.msrb.mxu0 %v3528_v40 }
 0x292   : > { %2938 = vst [vmem:[#allocation3 + $0x50] sm:$0xff] %v2906_v4  ;;  %v2561_v28 = vadd.f32 %v2473_v47, %v2283_v23  ;;  %3095 = vmatmul.f32.gmra.mxu1 %v2906_v4  ;;  %v3009_v47 = vld [vmem:[#allocation4 + $0x50] sm:$0xff] }
 0x293   : > { %v2757_v60 = vpop.f32.mrf.mxu0  ;;  %3731 = vmatpush.msrb.mxu1 %v3722_v10  ;;  %3182 = vmatpush.msrb.mxu2 %v3009_v47  ;;  %v3527_v47 = vld [vmem:[#allocation4 + $0x1d0] sm:$0xff] }
 0x294   : > { %v2839_v17 = vadd.f32 %v2751_v48, %v2561_v28  ;;  %5337 = vmatmul.msk.f32.gmra.mxu2 %vm278_vm0, %v2054_v46  ;;  %3538 = vmatpush.msrb.mxu0 %v3527_v47 }
 0x295   : > { %5371 = vmatmul.msk.f32.gmra.mxu3 %vm278_vm0, %v2332_v36 }
 0x296   : > { %5406 = vmatmul.msk.f32.gmra.mxu0 %vm278_vm0, %v6545_v53  ;;  %v2875_v31 = vadd.f32 %v6813_v3, %v2839_v17  ;;  %v6858_v46 = vpop.f32.mrf.mxu1  ;;  %v2334_v17 = vld [vmem:[#allocation2 + $0x1b0] sm:$0xff] }
 0x297   : > { %v2198_v19 = vpop.f32.mrf.mxu2 }
 0x298   : > { %v2476_v5 = vpop.f32.mrf.mxu3  ;;  %v2907_v11 = vmax.f32 %v2875_v31, 0.0  ;;  %v2284_v56 = vadd.f32 %v2198_v19, %v6543_v32  ;;  %v3333_v19 = vld [vmem:[#allocation4 + $0x150] sm:$0xff] }
 0x299   : > { %3344 = vmatpush.msrb.mxu3 %v3333_v19 }
 0x29a   : > { %2939 = vst [vmem:[#allocation3 + $0x68] sm:$0xff] %v2907_v11  ;;  %v2562_v48 = vadd.f32 %v2476_v5, %v2284_v56  ;;  %3098 = vmatmul.f32.gmra.mxu1 %v2907_v11 }
 0x29b   : > { %v2760_v9 = vpop.f32.mrf.mxu0 }
 0x29c   : > { %v2840_v53 = vadd.f32 %v2754_v12, %v2562_v48  ;;  %5338 = vmatmul.msk.f32.gmra.mxu2 %vm278_vm0, %v2055_v25  ;;  %v2335_v48 = vld [vmem:[#allocation2 + $0x1c8] sm:$0xff] }
 0x29d   : > { %5372 = vmatmul.msk.f32.gmra.mxu3 %vm278_vm0, %v2333_v14  ;;  %v2057_v14 = vld [vmem:[#allocation2 + $0x1c7] sm:$0xff] }
 0x29e   : > { %5407 = vmatmul.msk.f32.gmra.mxu0 %vm278_vm0, %v6559_v63  ;;  %v2876_v32 = vadd.f32 %v6813_v3, %v2840_v53  ;;  %v6867_v40 = vpop.f32.mrf.mxu1  ;;  %v3721_v53 = vld [vmem:[#allocation4 + $0x250] sm:$0xff] }
 0x29f   : > { %v2201_v4 = vpop.f32.mrf.mxu2  ;;  %3732 = vmatpush.msrb.mxu1 %v3721_v53  ;;  %v2337_v53 = vld [vmem:[#allocation2 + $0x1e8] sm:$0xff] }
 0x2a0   : > { %v2479_v23 = vpop.f32.mrf.mxu3  ;;  %v2908_v36 = vmax.f32 %v2876_v32, 0.0  ;;  %v2285_v28 = vadd.f32 %v2201_v4, %v6557_v43  ;;  %v3008_v32 = vld [vmem:[#allocation4 + $0x48] sm:$0xff] }
 0x2a1   : > { %3183 = vmatpush.msrb.mxu2 %v3008_v32 }
 0x2a2   : > { %2940 = vst [vmem:[#allocation3 + $0x70] sm:$0xff] %v2908_v36  ;;  %v2563_v12 = vadd.f32 %v2479_v23, %v2285_v28  ;;  %3101 = vmatmul.f32.gmra.mxu1 %v2908_v36 }
 0x2a3   : > { %v2763_v31 = vpop.f32.mrf.mxu0 }
 0x2a4   : > { %v2841_v5 = vadd.f32 %v2757_v60, %v2563_v12  ;;  %5339 = vmatmul.msk.f32.gmra.mxu2 %vm278_vm0, %v2056_v62  ;;  %v2336_v12 = vld [vmem:[#allocation2 + $0x1d0] sm:$0xff] }
 0x2a5   : > { %5373 = vmatmul.msk.f32.gmra.mxu3 %vm278_vm0, %v2334_v17  ;;  %v2058_v17 = vld [vmem:[#allocation2 + $0x1cf] sm:$0xff] }
 0x2a6   : > { %5408 = vmatmul.msk.f32.gmra.mxu0 %vm278_vm0, %v6575_v26  ;;  %v2877_v63 = vadd.f32 %v6813_v3, %v2841_v5 }
 0x2a7   : > { %v2204_v11 = vpop.f32.mrf.mxu2 }
 0x2a8   : > { %v2482_v43 = vpop.f32.mrf.mxu3  ;;  %v2909_v56 = vmax.f32 %v2877_v63, 0.0  ;;  %v2286_v25 = vadd.f32 %v2204_v11, %v6573_v49  ;;  %v2008_v49 = vadd.f32 %v6678_v7, %v6581_v42  ;;  %v3332_v63 = vld [vmem:[#allocation4 + $0x148] sm:$0xff]  ;;  %v6878_v11 = vpop.f32.mrf.mxu1  ;;  %v3524_v7 = vld [vmem:[#allocation4 + $0x1b8] sm:$0xff] }
 0x2a9   : > { %3345 = vmatpush.msrb.mxu3 %v3332_v63 }
 0x2aa   : > { %2941 = vst [vmem:[#allocation3 + $0x88] sm:$0xff] %v2909_v56  ;;  %v2564_v60 = vadd.f32 %v2482_v43, %v2286_v25  ;;  %3104 = vmatmul.f32.gmra.mxu1 %v2909_v56  ;;  %v2009_v43 = vadd.f32 %v6687_v54, %v6597_v24  ;;  %v3522_v24 = vld [vmem:[#allocation4 + $0x1a8] sm:$0xff] }
 0x2ab   : > { %v2766_v10 = vpop.f32.mrf.mxu0 }
 0x2ac   : > { %v2842_v26 = vadd.f32 %v2760_v9, %v2564_v60  ;;  %5340 = vmatmul.msk.f32.gmra.mxu2 %vm278_vm0, %v2057_v14  ;;  %v3526_v9 = vld [vmem:[#allocation4 + $0x1c8] sm:$0xff] }
 0x2ad   : > { %5374 = vmatmul.msk.f32.gmra.mxu3 %vm278_vm0, %v2335_v48  ;;  %3539 = vmatpush.msrb.mxu0 %v3526_v9  ;;  %v3523_v48 = vld [vmem:[#allocation4 + $0x1b0] sm:$0xff] }
 0x2ae   : > { %5409 = vmatmul.msk.f32.gmra.mxu0 %vm278_vm0, %v6591_v29  ;;  %v2878_v4 = vadd.f32 %v6813_v3, %v2842_v26  ;;  %v3525_v29 = vld [vmem:[#allocation4 + $0x1c0] sm:$0xff]  ;;  %v3329_v9 = vld [vmem:[#allocation4 + $0x130] sm:$0xff] }
 0x2af   : > { %v2207_v23 = vpop.f32.mrf.mxu2  ;;  %3540 = vmatpush.msrb.mxu0 %v3525_v29  ;;  %v3520_v29 = vld [vmem:[#allocation4 + $0x198] sm:$0xff] }
 0x2b0   : > { %v2485_v36 = vpop.f32.mrf.mxu3  ;;  %v2910_v28 = vmax.f32 %v2878_v4, 0.0  ;;  %v2287_v62 = vadd.f32 %v2207_v23, %v2008_v49  ;;  %v3007_v49 = vld [vmem:[#allocation4 + $0x40] sm:$0xff]  ;;  %v3006_v23 = vld [vmem:[#allocation4 + $0x38] sm:$0xff] }
 0x2b1   : > { %3541 = vmatpush.msrb.mxu0 %v3524_v7  ;;  %v3331_v4 = vld [vmem:[#allocation4 + $0x140] sm:$0xff]  ;;  %3184 = vmatpush.msrb.mxu2 %v3007_v49 }
 0x2b2   : > { %2942 = vst [vmem:[#allocation3 + $0x90] sm:$0xff] %v2910_v28  ;;  %v2565_v19 = vadd.f32 %v2485_v36, %v2287_v62  ;;  %3107 = vmatmul.f32.gmra.mxu1 %v2910_v28  ;;  %v3330_v36 = vld [vmem:[#allocation4 + $0x138] sm:$0xff]  ;;  %3346 = vmatpush.msrb.mxu3 %v3331_v4  ;;  %v3521_v28 = vld [vmem:[#allocation4 + $0x1a0] sm:$0xff]  ;;  %v2010_v62 = vadd.f32 %v6697_v50, %v6611_v41  ;;  %v2338_v41 = vld [vmem:[#allocation2 + $0x1f0] sm:$0xff] }
 0x2b3   : > { %v6876_v5 = vpop.f32.mrf.mxu0  ;;  %3542 = vmatpush.msrb.mxu0 %v3523_v48  ;;  %3185 = vmatpush.msrb.mxu2 %v3006_v23  ;;  %v3519_v48 = vld [vmem:[#allocation4 + $0x190] sm:$0xff] }
 0x2b4   : > { %v2843_v42 = vadd.f32 %v2763_v31, %v2565_v19  ;;  %5341 = vmatmul.msk.f32.gmra.mxu2 %vm278_vm0, %v2058_v17  ;;  %v2059_v31 = vld [vmem:[#allocation2 + $0x1e7] sm:$0xff]  ;;  %v6895_v17 = vpop.f32.mrf.mxu1  ;;  %3347 = vmatpush.msrb.mxu3 %v3330_v36  ;;  %v3001_v4 = vld [vmem:[#allocation4 + $0x10] sm:$0xff] }
 0x2b5   : > { %5375 = vmatmul.msk.f32.gmra.mxu3 %vm278_vm0, %v2336_v12  ;;  %3543 = vmatpush.msrb.mxu0 %v3522_v24 }
 0x2b6   : > { %5410 = vmatmul.msk.f32.gmra.mxu0 %vm278_vm0, %v6605_v21  ;;  %v2879_v56 = vadd.f32 %v6813_v3, %v2843_v42  ;;  %v3720_v21 = vld [vmem:[#allocation4 + $0x248] sm:$0xff]  ;;  %3348 = vmatpush.msrb.mxu3 %v3329_v9 }
 0x2b7   : > { %v2210_v25 = vpop.f32.mrf.mxu2  ;;  %3733 = vmatpush.msrb.mxu1 %v3720_v21  ;;  %3544 = vmatpush.msrb.mxu0 %v3521_v28  ;;  %v2011_v21 = vadd.f32 %v6706_v8, %v6625_v16  ;;  %v3000_v9 = vld [vmem:[#allocation4 + $0x8] sm:$0xff] }
 0x2b8   : > { %v2488_v14 = vpop.f32.mrf.mxu3  ;;  %v2911_v60 = vmax.f32 %v2879_v56, 0.0  ;;  %v2288_v47 = vadd.f32 %v2210_v25, %v2009_v43  ;;  %v3328_v43 = vld [vmem:[#allocation4 + $0x128] sm:$0xff] }
 0x2b9   : > { %v2060_v56 = vld [vmem:[#allocation2 + $0x1ef] sm:$0xff]  ;;  %3545 = vmatpush.msrb.mxu0 %v3520_v29  ;;  %3349 = vmatpush.msrb.mxu3 %v3328_v43  ;;  %v2999_v29 = vld [vmem:[#allocation4] sm:$0xff] }
 0x2ba   : > { %2943 = vst [vmem:[#allocation3 + $0xa8] sm:$0xff] %v2911_v60  ;;  %v2566_v32 = vadd.f32 %v2488_v14, %v2288_v47  ;;  %3110 = vmatmul.f32.gmra.mxu1 %v2911_v60  ;;  %v3003_v14 = vld [vmem:[#allocation4 + $0x20] sm:$0xff] }
 0x2bb   : > { %v6887_v26 = vpop.f32.mrf.mxu0  ;;  %v3327_v60 = vld [vmem:[#allocation4 + $0x120] sm:$0xff]  ;;  %3546 = vmatpush.msrb.mxu0 %v3519_v48  ;;  %v2340_v48 = vld [vmem:[#allocation2 + $0x210] sm:$0xff] }
 0x2bc   : > { %v2844_v54 = vadd.f32 %v2766_v10, %v2566_v32  ;;  %5342 = vmatmul.msk.f32.gmra.mxu2 %vm278_vm0, %v2059_v31  ;;  %v3005_v10 = vld [vmem:[#allocation4 + $0x30] sm:$0xff]  ;;  %v3002_v31 = vld [vmem:[#allocation4 + $0x18] sm:$0xff]  ;;  %3350 = vmatpush.msrb.mxu3 %v3327_v60  ;;  %v6908_v23 = vpop.f32.mrf.mxu1 }
 0x2bd   : > { %5376 = vmatmul.msk.f32.gmra.mxu3 %vm278_vm0, %v2337_v53  ;;  %3186 = vmatpush.msrb.mxu2 %v3005_v10  ;;  %v3518_v53 = vld [vmem:[#allocation4 + $0x188] sm:$0xff]  ;;  %v3326_v32 = vld [vmem:[#allocation4 + $0x118] sm:$0xff]  ;;  %v3719_v10 = vld [vmem:[#allocation4 + $0x240] sm:$0xff] }
 0x2be   : > { %5411 = vmatmul.msk.f32.gmra.mxu0 %vm278_vm0, %v6619_v59  ;;  %v2880_v12 = vadd.f32 %v6813_v3, %v2844_v54  ;;  %v3004_v59 = vld [vmem:[#allocation4 + $0x28] sm:$0xff]  ;;  %v3517_v54 = vld [vmem:[#allocation4 + $0x180] sm:$0xff]  ;;  %3351 = vmatpush.msrb.mxu3 %v3326_v32 }
 0x2bf   : > { %v2213_v19 = vpop.f32.mrf.mxu2  ;;  %3187 = vmatpush.msrb.mxu2 %v3004_v59  ;;  %3547 = vmatpush.msrb.mxu0 %v3518_v53  ;;  %v2012_v59 = vadd.f32 %v6721_v55, %v6639_v37  ;;  %v2619_v53 = vld [vmem:[#allocation2 + $0x229] sm:$0xff]  ;;  %v2013_v55 = vadd.f32 %v6730_v44, %v6649_v38  ;;  %v2014_v38 = vadd.f32 %v6740_v34, %v6658_v15 }
 0x2c0   : > { %v2491_v63 = vpop.f32.mrf.mxu3  ;;  %v2912_v42 = vmax.f32 %v2880_v12, 0.0  ;;  %v2289_v7 = vadd.f32 %v2213_v19, %v2010_v62  ;;  %v2061_v62 = vld [vmem:[#allocation2 + $0x207] sm:$0xff]  ;;  %3734 = vmatpush.msrb.mxu1 %v3719_v10  ;;  %v2015_v15 = vadd.f32 %v6749_v58, %v6666_v20  ;;  %v2016_v20 = vadd.f32 %v6764_v45, %v6674_v61 }
 0x2c1   : > { %3188 = vmatpush.msrb.mxu2 %v3003_v14  ;;  %v2339_v12 = vld [vmem:[#allocation2 + $0x208] sm:$0xff]  ;;  %3548 = vmatpush.msrb.mxu0 %v3517_v54  ;;  %v2017_v61 = vadd.f32 %v6773_v51, %v6683_v18  ;;  %v2018_v18 = vadd.f32 %v6783_v0, %v6692_v35  ;;  %v2019_v35 = vadd.f32 %v6792_v30, %v6701_v22 }
 0x2c2   : > { %2944 = vst [vmem:[#allocation3 + $0xb0] sm:$0xff] %v2912_v42  ;;  %v2567_v50 = vadd.f32 %v2491_v63, %v2289_v7  ;;  %3113 = vmatmul.f32.gmra.mxu1 %v2912_v42  ;;  %v3324_v19 = vld [vmem:[#allocation4 + $0x108] sm:$0xff]  ;;  %v5493_v42 = vld [vmem:[#allocation2 + $0x211] sm:$0xff]  ;;  %v3323_v7 = vld [vmem:[#allocation4 + $0x100] sm:$0xff]  ;;  %v2020_v22 = vadd.f32 %v6807_v13, %v6710_v6 }
 0x2c3   : > { %v6898_v25 = vpop.f32.mrf.mxu0  ;;  %3189 = vmatpush.msrb.mxu2 %v3002_v31  ;;  %v2062_v14 = vld [vmem:[#allocation2 + $0x20f] sm:$0xff] }
 0x2c4   : > { %v2845_v47 = vadd.f32 %v6876_v5, %v2567_v50  ;;  %5343 = vmatmul.msk.f32.gmra.mxu2 %vm278_vm0, %v2060_v56  ;;  %v6917_v60 = vpop.f32.mrf.mxu1  ;;  %v2341_v54 = vld [vmem:[#allocation2 + $0x228] sm:$0xff] }
 0x2c5   : > { %5377 = vmatmul.msk.f32.gmra.mxu3 %vm278_vm0, %v2338_v41  ;;  %3190 = vmatpush.msrb.mxu2 %v3001_v4 }
 0x2c6   : > { %5412 = vmatmul.msk.f32.gmra.mxu0 %vm278_vm0, %v6633_v33  ;;  %v2881_v49 = vadd.f32 %v6813_v3, %v2845_v47  ;;  %v3325_v33 = vld [vmem:[#allocation4 + $0x110] sm:$0xff] }
 0x2c7   : > { %v2216_v5 = vpop.f32.mrf.mxu2  ;;  %3352 = vmatpush.msrb.mxu3 %v3325_v33  ;;  %3191 = vmatpush.msrb.mxu2 %v3000_v9  ;;  %v3718_v33 = vld [vmem:[#allocation4 + $0x238] sm:$0xff] }
 0x2c8   : > { %v2494_v24 = vpop.f32.mrf.mxu3  ;;  %v2913_v36 = vmax.f32 %v2881_v49, 0.0  ;;  %v2290_v28 = vadd.f32 %v2216_v5, %v2011_v21  ;;  %3735 = vmatpush.msrb.mxu1 %v3718_v33  ;;  %v3486_v33 = vld [vmem:[#allocation3 + $0x47] sm:$0xff] }
 0x2c9   : > { %3353 = vmatpush.msrb.mxu3 %v3324_v19  ;;  %3192 = vmatpush.msrb.mxu2 %v2999_v29  ;;  %v2342_v29 = vld [vmem:[#allocation2 + $0x230] sm:$0xff] }
 0x2ca   : > { %2945 = vst [vmem:[#allocation3 + $0xc8] sm:$0xff] %v2913_v36  ;;  %v2568_v16 = vadd.f32 %v2494_v24, %v2290_v28  ;;  %3116 = vmatmul.f32.gmra.mxu1 %v2913_v36  ;;  %v2063_v24 = vld [vmem:[#allocation2 + $0x227] sm:$0xff]  ;;  %v2620_v28 = vld [vmem:[#allocation2 + $0x231] sm:$0xff] }
 0x2cb   : > { %v2778_v8 = vpop.f32.mrf.mxu0  ;;  %3354 = vmatpush.msrb.mxu3 %v3323_v7 }
 0x2cc   : > { %v2846_v63 = vadd.f32 %v6887_v26, %v2568_v16  ;;  %5344 = vmatmul.msk.f32.gmra.mxu2 %vm278_vm0, %v2061_v62  ;;  %v6926_v62 = vpop.f32.mrf.mxu1 }
 0x2cd   : > { %5378 = vmatmul.msk.f32.gmra.mxu3 %vm278_vm0, %v2339_v12 }
 0x2ce   : > { %5413 = vmatmul.msk.f32.gmra.mxu0 %vm278_vm0, %v5493_v42  ;;  %v2882_v43 = vadd.f32 %v6813_v3, %v2846_v63  ;;  %v2064_v63 = vld [vmem:[#allocation2 + $0x22f] sm:$0xff] }
 0x2cf   : > { %v2219_v56 = vpop.f32.mrf.mxu2 }
 0x2d0   : > { %v2497_v41 = vpop.f32.mrf.mxu3  ;;  %v2914_v26 = vmax.f32 %v2882_v43, 0.0  ;;  %v2291_v50 = vadd.f32 %v2219_v56, %v2012_v59  ;;  %v3484_v59 = vld [vmem:[#allocation3 + $0x27] sm:$0xff] }
 0x2d2   : > { %2946 = vst [vmem:[#allocation3 + $0xd0] sm:$0xff] %v2914_v26  ;;  %v2569_v47 = vadd.f32 %v2497_v41, %v2291_v50  ;;  %3119 = vmatmul.f32.gmra.mxu1 %v2914_v26 }
 0x2d3   : > { %v2781_v31 = vpop.f32.mrf.mxu0 }
 0x2d4   : > { %v2847_v37 = vadd.f32 %v6898_v25, %v2569_v47  ;;  %5345 = vmatmul.msk.f32.gmra.mxu2 %vm278_vm0, %v2062_v14  ;;  %v6936_v43 = vpop.f32.mrf.mxu1  ;;  %v2967_v14 = vld [vmem:[#allocation3 + $0x7] sm:$0xff] }
 0x2d5   : > { %5379 = vmatmul.msk.f32.gmra.mxu3 %vm278_vm0, %v2340_v48  ;;  %v3290_v48 = vld [vmem:[#allocation3 + $0x9] sm:$0xff] }
 0x2d6   : > { %5414 = vmatmul.msk.f32.gmra.mxu0 %vm278_vm0, %v2619_v53  ;;  %v2883_v32 = vadd.f32 %v6813_v3, %v2847_v37  ;;  %v3717_v53 = vld [vmem:[#allocation4 + $0x230] sm:$0xff] }
 0x2d7   : > { %v2222_v21 = vpop.f32.mrf.mxu2  ;;  %3736 = vmatpush.msrb.mxu1 %v3717_v53 }
 0x2d8   : > { %v2500_v49 = vpop.f32.mrf.mxu3  ;;  %v2915_v4 = vmax.f32 %v2883_v32, 0.0  ;;  %v2292_v5 = vadd.f32 %v2222_v21, %v2013_v55  ;;  %v3485_v55 = vld [vmem:[#allocation3 + $0x2f] sm:$0xff] }
 0x2da   : > { %2947 = vst [vmem:[#allocation3 + $0xe8] sm:$0xff] %v2915_v4  ;;  %v2570_v36 = vadd.f32 %v2500_v49, %v2292_v5  ;;  %3122 = vmatmul.f32.gmra.mxu1 %v2915_v4 }
 0x2db   : > { %v2784_v25 = vpop.f32.mrf.mxu0 }
 0x2dc   : > { %v2848_v12 = vadd.f32 %v2778_v8, %v2570_v36  ;;  %5346 = vmatmul.msk.f32.gmra.mxu2 %vm278_vm0, %v2063_v24  ;;  %v6944_v32 = vpop.f32.mrf.mxu1  ;;  %v2968_v24 = vld [vmem:[#allocation3 + $0xf] sm:$0xff] }
 0x2dd   : > { %5380 = vmatmul.msk.f32.gmra.mxu3 %vm278_vm0, %v2341_v54  ;;  %v3291_v54 = vld [vmem:[#allocation3 + $0x11] sm:$0xff] }
 0x2de   : > { %5415 = vmatmul.msk.f32.gmra.mxu0 %vm278_vm0, %v2620_v28  ;;  %v2884_v44 = vadd.f32 %v6813_v3, %v2848_v12 }
 0x2df   : > { %v2225_v16 = vpop.f32.mrf.mxu2 }
 0x2e0   : > { %v2503_v10 = vpop.f32.mrf.mxu3  ;;  %v2916_v9 = vmax.f32 %v2884_v44, 0.0  ;;  %v2293_v19 = vadd.f32 %v2225_v16, %v2014_v38 }
 0x2e2   : > { %2948 = vst [vmem:[#allocation3 + $0xf0] sm:$0xff] %v2916_v9  ;;  %v2571_v42 = vadd.f32 %v2503_v10, %v2293_v19  ;;  %3125 = vmatmul.f32.gmra.mxu1 %v2916_v9 }
 0x2e3   : > { %v2787_v8 = vpop.f32.mrf.mxu0 }
 0x2e4   : > { %v2849_v7 = vadd.f32 %v2781_v31, %v2571_v42  ;;  %5347 = vmatmul.msk.f32.gmra.mxu2 %vm278_vm0, %v2064_v63  ;;  %v3716_v63 = vld [vmem:[#allocation4 + $0x228] sm:$0xff] }
 0x2e5   : > { %5381 = vmatmul.msk.f32.gmra.mxu3 %vm278_vm0, %v2342_v29  ;;  %v3292_v29 = vld [vmem:[#allocation3 + $0x29] sm:$0xff]  ;;  %3737 = vmatpush.msrb.mxu1 %v3716_v63 }
 0x2e6   : > { %3549 = vmatmul.f32.vlgmr.msrb.gmra.mxu0 %v3484_v59  ;;  %v2885_v34 = vadd.f32 %v6813_v3, %v2849_v7 }
 0x2e7   : > { %v2228_v56 = vpop.f32.mrf.mxu2 }
 0x2e8   : > { %v2506_v41 = vpop.f32.mrf.mxu3  ;;  %v2917_v26 = vmax.f32 %v2885_v34, 0.0  ;;  %v2294_v50 = vadd.f32 %v2228_v56, %v2015_v15 }
 0x2ea   : > { %2949 = vst [vmem:[#allocation3 + $0x108] sm:$0xff] %v2917_v26  ;;  %v2572_v47 = vadd.f32 %v2506_v41, %v2294_v50  ;;  %3128 = vmatmul.f32.gmra.mxu1 %v2917_v26 }
 0x2eb   : > { %v2790_v31 = vpop.f32.mrf.mxu0 }
 0x2ec   : > { %v2850_v37 = vadd.f32 %v2784_v25, %v2572_v47  ;;  %3193 = vmatmul.f32.vlgmr.msrb.gmra.mxu2 %v2967_v14  ;;  %v3293_v14 = vld [vmem:[#allocation3 + $0x31] sm:$0xff] }
 0x2ed   : > { %3355 = vmatmul.f32.vlgmr.msrb.gmra.mxu3 %v3290_v48  ;;  %v3488_v48 = vld [vmem:[#allocation3 + $0x67] sm:$0xff] }
 0x2ee   : > { %3552 = vmatmul.f32.gmra.mxu0 %v3485_v55  ;;  %v2886_v58 = vadd.f32 %v6813_v3, %v2850_v37 }
 0x2ef   : > { %v2231_v21 = vpop.f32.mrf.mxu2 }
 0x2f0   : > { %v2509_v49 = vpop.f32.mrf.mxu3  ;;  %v2918_v4 = vmax.f32 %v2886_v58, 0.0  ;;  %v2295_v5 = vadd.f32 %v2231_v21, %v2016_v20 }
 0x2f2   : > { %2950 = vst [vmem:[#allocation3 + $0x110] sm:$0xff] %v2918_v4  ;;  %v2573_v36 = vadd.f32 %v2509_v49, %v2295_v5  ;;  %3131 = vmatmul.f32.gmra.mxu1 %v2918_v4  ;;  %v3715_v49 = vld [vmem:[#allocation4 + $0x220] sm:$0xff]  ;;  %v3489_v5 = vld [vmem:[#allocation3 + $0x6f] sm:$0xff] }
 0x2f3   : > { %v2793_v25 = vpop.f32.mrf.mxu0  ;;  %3738 = vmatpush.msrb.mxu1 %v3715_v49 }
 0x2f4   : > { %v2851_v28 = vadd.f32 %v2787_v8, %v2573_v36  ;;  %3196 = vmatmul.f32.gmra.mxu2 %v2968_v24  ;;  %v3487_v8 = vld [vmem:[#allocation3 + $0x4f] sm:$0xff] }
 0x2f5   : > { %3358 = vmatmul.f32.gmra.mxu3 %v3291_v54 }
 0x2f6   : > { %3555 = vmatmul.f32.gmra.mxu0 %v3486_v33  ;;  %v2887_v45 = vadd.f32 %v6813_v3, %v2851_v28 }
 0x2f7   : > { %v2234_v12 = vpop.f32.mrf.mxu2  ;;  %v6949_v10 = vpop.f32.mrf.mxu1 }
 0x2f8   : > { %v2512_v38 = vpop.f32.mrf.mxu3  ;;  %v2919_v44 = vmax.f32 %v2887_v45, 0.0  ;;  %v2296_v16 = vadd.f32 %v2234_v12, %v2017_v61  ;;  %v3295_v12 = vld [vmem:[#allocation3 + $0x51] sm:$0xff] }
 0x2fa   : > { %2951 = vst [vmem:[#allocation3 + $0x128] sm:$0xff] %v2919_v44  ;;  %v2574_v9 = vadd.f32 %v2512_v38, %v2296_v16  ;;  %3134 = vmatmul.f32.gmra.mxu1 %v2919_v44  ;;  %v3490_v38 = vld [vmem:[#allocation3 + $0x87] sm:$0xff] }
 0x2fb   : > { %v2796_v19 = vpop.f32.mrf.mxu0  ;;  %v7944_v44 = vld [vmem:[#allocation13_spill] sm:$0xff] }
 0x2fc   : > { %v2852_v42 = vadd.f32 %v2790_v31, %v2574_v9  ;;  %3199 = vmatmul.f32.gmra.mxu2 %v3484_v59  ;;  %v2021_v6 = vadd.f32 %v6820_v52, %v7944_v44  ;;  %v7945_v52 = vld [vmem:[#allocation14_spill] sm:$0xff] }
 0x2fd   : > { %3361 = vmatmul.f32.gmra.mxu3 %v3292_v29 }
 0x2fe   : > { %3558 = vmatmul.f32.gmra.mxu0 %v3487_v8  ;;  %v2888_v51 = vadd.f32 %v6813_v3, %v2852_v42 }
 0x2ff   : > { %v2237_v7 = vpop.f32.mrf.mxu2  ;;  %v6954_v41 = vpop.f32.mrf.mxu1 }
 0x300   : > { %v2515_v15 = vpop.f32.mrf.mxu3  ;;  %v2920_v34 = vmax.f32 %v2888_v51, 0.0  ;;  %v2297_v56 = vadd.f32 %v2237_v7, %v2018_v18  ;;  %v3714_v51 = vld [vmem:[#allocation4 + $0x218] sm:$0xff] }
 0x301   : > { %3739 = vmatpush.msrb.mxu1 %v3714_v51 }
 0x302   : > { %2952 = vst [vmem:[#allocation3 + $0x130] sm:$0xff] %v2920_v34  ;;  %v2575_v26 = vadd.f32 %v2515_v15, %v2297_v56  ;;  %3137 = vmatmul.f32.gmra.mxu1 %v2920_v34  ;;  %v3491_v15 = vld [vmem:[#allocation3 + $0x8f] sm:$0xff]  ;;  %v2022_v34 = vadd.f32 %v6829_v27, %v7945_v52 }
 0x303   : > { %v2799_v50 = vpop.f32.mrf.mxu0 }
 0x304   : > { %v2853_v59 = vadd.f32 %v2793_v25, %v2575_v26  ;;  %3202 = vmatmul.f32.gmra.mxu2 %v3485_v55  ;;  %v3294_v55 = vld [vmem:[#allocation3 + $0x49] sm:$0xff] }
 0x305   : > { %3364 = vmatmul.f32.gmra.mxu3 %v3293_v14 }
 0x306   : > { %3561 = vmatmul.f32.gmra.mxu0 %v3488_v48  ;;  %v2889_v0 = vadd.f32 %v6813_v3, %v2853_v59 }
 0x307   : > { %v2240_v47 = vpop.f32.mrf.mxu2  ;;  %v6959_v20 = vpop.f32.mrf.mxu1 }
 0x308   : > { %v2518_v31 = vpop.f32.mrf.mxu3  ;;  %v2921_v53 = vmax.f32 %v2889_v0, 0.0  ;;  %v2298_v37 = vadd.f32 %v2240_v47, %v2019_v35 }
 0x30a   : > { %2953 = vst [vmem:[#allocation3 + $0x148] sm:$0xff] %v2921_v53  ;;  %v2576_v58 = vadd.f32 %v2518_v31, %v2298_v37  ;;  %3140 = vmatmul.f32.gmra.mxu1 %v2921_v53  ;;  %v3297_v31 = vld [vmem:[#allocation3 + $0x71] sm:$0xff]  ;;  %v3492_v53 = vld [vmem:[#allocation3 + $0xa7] sm:$0xff] }
 0x30b   : > { %v2802_v21 = vpop.f32.mrf.mxu0  ;;  %v7946_v37 = vld [vmem:[#allocation15_spill] sm:$0xff] }
 0x30c   : > { %v2854_v4 = vadd.f32 %v2796_v19, %v2576_v58  ;;  %3205 = vmatmul.f32.gmra.mxu2 %v3486_v33  ;;  %v2023_v27 = vadd.f32 %v6837_v39, %v7946_v37  ;;  %v7947_v39 = vld [vmem:[#allocation16_spill] sm:$0xff] }
 0x30d   : > { %3367 = vmatmul.f32.gmra.mxu3 %v3294_v55 }
 0x30e   : > { %3564 = vmatmul.f32.gmra.mxu0 %v3489_v5  ;;  %v2890_v30 = vadd.f32 %v6813_v3, %v2854_v4 }
 0x30f   : > { %v2243_v24 = vpop.f32.mrf.mxu2  ;;  %v6964_v28 = vpop.f32.mrf.mxu1 }
 0x310   : > { %v2521_v54 = vpop.f32.mrf.mxu3  ;;  %v2922_v36 = vmax.f32 %v2890_v30, 0.0  ;;  %v2299_v25 = vadd.f32 %v2243_v24, %v2020_v22 }
 0x312   : > { %2954 = vst [vmem:[#allocation3 + $0x150] sm:$0xff] %v2922_v36  ;;  %v2577_v61 = vadd.f32 %v2521_v54, %v2299_v25  ;;  %3143 = vmatmul.f32.gmra.mxu1 %v2922_v36  ;;  %v3713_v54 = vld [vmem:[#allocation4 + $0x210] sm:$0xff] }
 0x313   : > { %v2805_v45 = vpop.f32.mrf.mxu0  ;;  %3740 = vmatpush.msrb.mxu1 %v3713_v54  ;;  %v3493_v25 = vld [vmem:[#allocation3 + $0xaf] sm:$0xff] }
 0x314   : > { %v2855_v33 = vadd.f32 %v2799_v50, %v2577_v61  ;;  %3208 = vmatmul.f32.gmra.mxu2 %v3487_v8  ;;  %v3296_v8 = vld [vmem:[#allocation3 + $0x69] sm:$0xff]  ;;  %v2024_v61 = vadd.f32 %v6849_v57, %v7947_v39 }
 0x315   : > { %3370 = vmatmul.f32.gmra.mxu3 %v3295_v12 }
 0x316   : > { %3567 = vmatmul.f32.gmra.mxu0 %v3490_v38  ;;  %v2891_v13 = vadd.f32 %v6813_v3, %v2855_v33 }
 0x317   : > { %v2246_v16 = vpop.f32.mrf.mxu2  ;;  %v6969_v29 = vpop.f32.mrf.mxu1 }
 0x318   : > { %v2524_v9 = vpop.f32.mrf.mxu3  ;;  %v2923_v19 = vmax.f32 %v2891_v13, 0.0  ;;  %v2300_v63 = vadd.f32 %v2246_v16, %v2021_v6 }
 0x31a   : > { %2955 = vst [vmem:[#allocation3 + $0x168] sm:$0xff] %v2923_v19  ;;  %v2578_v42 = vadd.f32 %v2524_v9, %v2300_v63  ;;  %3146 = vmatmul.f32.gmra.mxu1 %v2923_v19  ;;  %v3299_v19 = vld [vmem:[#allocation3 + $0x91] sm:$0xff]  ;;  %v3494_v63 = vld [vmem:[#allocation3 + $0xc7] sm:$0xff] }
 0x31b   : > { %v2808_v18 = vpop.f32.mrf.mxu0 }
 0x31c   : > { %v2856_v7 = vadd.f32 %v2802_v21, %v2578_v42  ;;  %3211 = vmatmul.f32.gmra.mxu2 %v3488_v48  ;;  %v7948_v42 = vld [vmem:[#allocation17_spill] sm:$0xff] }
 0x31d   : > { %3373 = vmatmul.f32.gmra.mxu3 %v3296_v8  ;;  %v2025_v57 = vadd.f32 %v6858_v46, %v7948_v42 }
 0x31e   : > { %3570 = vmatmul.f32.gmra.mxu0 %v3491_v15  ;;  %v2892_v56 = vadd.f32 %v6813_v3, %v2856_v7 }
 0x31f   : > { %v2249_v26 = vpop.f32.mrf.mxu2  ;;  %v6974_v35 = vpop.f32.mrf.mxu1 }
 0x320   : > { %v2527_v50 = vpop.f32.mrf.mxu3  ;;  %v2924_v14 = vmax.f32 %v2892_v56, 0.0  ;;  %v2301_v59 = vadd.f32 %v2249_v26, %v2022_v34  ;;  %v3712_v26 = vld [vmem:[#allocation4 + $0x208] sm:$0xff] }
 0x321   : > { %3741 = vmatpush.msrb.mxu1 %v3712_v26 }
 0x322   : > { %2956 = vst [vmem:[#allocation3 + $0x170] sm:$0xff] %v2924_v14  ;;  %v2579_v0 = vadd.f32 %v2527_v50, %v2301_v59  ;;  %3149 = vmatmul.f32.gmra.mxu1 %v2924_v14  ;;  %v3300_v50 = vld [vmem:[#allocation3 + $0xa9] sm:$0xff] }
 0x323   : > { %v2811_v47 = vpop.f32.mrf.mxu0  ;;  %v3495_v14 = vld [vmem:[#allocation3 + $0xcf] sm:$0xff] }
 0x324   : > { %v2857_v48 = vadd.f32 %v2805_v45, %v2579_v0  ;;  %3214 = vmatmul.f32.gmra.mxu2 %v3489_v5  ;;  %v3298_v5 = vld [vmem:[#allocation3 + $0x89] sm:$0xff] }
 0x325   : > { %3376 = vmatmul.f32.gmra.mxu3 %v3297_v31  ;;  %v7949_v59 = vld [vmem:[#allocation18_spill] sm:$0xff] }
 0x326   : > { %3573 = vmatmul.f32.gmra.mxu0 %v3492_v53  ;;  %v2893_v58 = vadd.f32 %v6813_v3, %v2857_v48  ;;  %v2026_v0 = vadd.f32 %v6867_v40, %v7949_v59  ;;  %v7950_v40 = vld [vmem:[#allocation19_spill] sm:$0xff] }
 0x327   : > { %v2252_v21 = vpop.f32.mrf.mxu2  ;;  %v6979_v22 = vpop.f32.mrf.mxu1 }
 0x328   : > { %v2530_v49 = vpop.f32.mrf.mxu3  ;;  %v2925_v55 = vmax.f32 %v2893_v58, 0.0  ;;  %v2302_v4 = vadd.f32 %v2252_v21, %v2023_v27 }
 0x32a   : > { %2957 = vst [vmem:[#allocation3 + $0x188] sm:$0xff] %v2925_v55  ;;  %v2580_v30 = vadd.f32 %v2530_v49, %v2302_v4  ;;  %3152 = vmatmul.f32.gmra.mxu1 %v2925_v55  ;;  %v3301_v55 = vld [vmem:[#allocation3 + $0xb1] sm:$0xff]  ;;  %v7001_v4 = vld [vmem:[#allocation3 + $0xe7] sm:$0xff] }
 0x32b   : > { %v2814_v24 = vpop.f32.mrf.mxu0 }
 0x32c   : > { %v2858_v36 = vadd.f32 %v2808_v18, %v2580_v30  ;;  %3217 = vmatmul.f32.gmra.mxu2 %v3490_v38  ;;  %v2027_v30 = vadd.f32 %v6878_v11, %v7950_v40  ;;  %v7009_v11 = vld [vmem:[#allocation3 + $0xef] sm:$0xff]  ;;  %v2030_v40 = vadd.f32 %v6917_v60, %v6796_v2  ;;  %v3500_v2 = vld [vmem:[#allocation3 + $0x127] sm:$0xff] }
 0x32d   : > { %3379 = vmatmul.f32.gmra.mxu3 %v3298_v5  ;;  %v3918_v60 = vld [vmem:[#allocation4 + $0x2e8] sm:$0xff] }
 0x32e   : > { %3576 = vmatmul.f32.gmra.mxu0 %v3493_v25  ;;  %v2894_v45 = vadd.f32 %v6813_v3, %v2858_v36  ;;  %v6991_v3 = vld [vmem:[%s7821_s2] ss:$0 sm:$0xff] }
 0x32f   : > { %v2255_v12 = vpop.f32.mrf.mxu2  ;;  %v6984_v13 = vpop.f32.mrf.mxu1 }
 0x330   : > { %v2533_v33 = vpop.f32.mrf.mxu3  ;;  %v2926_v44 = vmax.f32 %v2894_v45, 0.0  ;;  %v2303_v6 = vadd.f32 %v2255_v12, %v2024_v61 }
 0x332   : > { %2958 = vst [vmem:[#allocation3 + $0x190] sm:$0xff] %v2926_v44  ;;  %v2581_v16 = vadd.f32 %v2533_v33, %v2303_v6  ;;  %3155 = vmatmul.f32.gmra.mxu1 %v2926_v44  ;;  %v3920_v33 = vld [vmem:[#allocation4 + $0x2f8] sm:$0xff]  ;;  %v3302_v44 = vld [vmem:[#allocation3 + $0xc9] sm:$0xff] }
 0x333   : > { %v2817_v9 = vpop.f32.mrf.mxu0  ;;  %3921 = vmatpush.msra.mxu2 %v3920_v33  ;;  %v3305_v33 = vld [vmem:[#allocation3 + $0xf1] sm:$0xff] }
 0x334   : > { %v2859_v38 = vadd.f32 %v2811_v47, %v2581_v16  ;;  %3220 = vmatmul.f32.gmra.mxu2 %v3491_v15  ;;  %v7951_v16 = vld [vmem:[#allocation20_spill] sm:$0xff] }
 0x335   : > { %3382 = vmatmul.f32.gmra.mxu3 %v3299_v19 }
 0x336   : > { %3579 = vmatmul.f32.gmra.mxu0 %v3494_v63  ;;  %v2895_v18 = vadd.f32 %v6991_v3, %v2859_v38 }
 0x337   : > { %v2258_v51 = vpop.f32.mrf.mxu2  ;;  %v6994_v34 = vpop.f32.mrf.mxu1 }
 0x338   : > { %v2536_v8 = vpop.f32.mrf.mxu3  ;;  %v2927_v7 = vmax.f32 %v2895_v18, 0.0  ;;  %v2304_v52 = vadd.f32 %v2258_v51, %v2025_v57 }
 0x33a   : > { %2959 = vst [vmem:[#allocation3 + $0x1a8] sm:$0xff] %v2927_v7  ;;  %v2582_v15 = vadd.f32 %v2536_v8, %v2304_v52  ;;  %3158 = vmatmul.f32.gmra.mxu1 %v2927_v7  ;;  %v4309_v52 = vld [vmem:[#allocation4 + $0x3f8] sm:$0xff] }
 0x33b   : > { %v2820_v56 = vpop.f32.mrf.mxu0  ;;  %4310 = vmatpush.msra.mxu0 %v4309_v52 }
 0x33c   : > { %v2860_v46 = vadd.f32 %v2814_v24, %v2582_v15  ;;  %3223 = vmatmul.f32.gmra.mxu2 %v3492_v53  ;;  %v4503_v15 = vld [vmem:[#allocation4 + $0x478] sm:$0xff] }
 0x33d   : > { %3385 = vmatmul.f32.gmra.mxu3 %v3300_v50  ;;  %v3919_v50 = vld [vmem:[#allocation4 + $0x2f0] sm:$0xff] }
 0x33e   : > { %3582 = vmatmul.f32.gmra.mxu0 %v3495_v14  ;;  %v2896_v47 = vadd.f32 %v6991_v3, %v2860_v46  ;;  %v7952_v46 = vld [vmem:[#allocation21_spill] sm:$0xff]  ;;  %3922 = vmatpush.msra.mxu2 %v3919_v50 }
 0x33f   : > { %v2261_v31 = vpop.f32.mrf.mxu2  ;;  %v6999_v58 = vpop.f32.mrf.mxu1  ;;  %v2029_v59 = vadd.f32 %v6908_v23, %v7952_v46  ;;  %v3499_v23 = vld [vmem:[#allocation3 + $0x10f] sm:$0xff] }
 0x340   : > { %v2539_v48 = vpop.f32.mrf.mxu3  ;;  %v2928_v37 = vmax.f32 %v2896_v47, 0.0  ;;  %v2305_v27 = vadd.f32 %v2261_v31, %v2026_v0  ;;  %3923 = vmatpush.msra.mxu2 %v3918_v60  ;;  %v4500_v60 = vld [vmem:[#allocation4 + $0x460] sm:$0xff] }
 0x342   : > { %2960 = vst [vmem:[#allocation3 + $0x1b0] sm:$0xff] %v2928_v37  ;;  %v2583_v21 = vadd.f32 %v2539_v48, %v2305_v27  ;;  %3161 = vmatmul.f32.gmra.mxu1 %v2928_v37 }
 0x343   : > { %v2823_v49 = vpop.f32.mrf.mxu0 }
 0x344   : > { %v2861_v53 = vadd.f32 %v2817_v9, %v2583_v21  ;;  %3226 = vmatmul.f32.gmra.mxu2 %v3493_v25  ;;  %v3711_v25 = vld [vmem:[#allocation4 + $0x200] sm:$0xff]  ;;  %v2028_v9 = vadd.f32 %v6895_v17, %v7951_v16 }
 0x345   : > { %3388 = vmatmul.f32.gmra.mxu3 %v3301_v55  ;;  %3742 = vmatpush.msrb.mxu1 %v3711_v25  ;;  %v7017_v17 = vld [vmem:[#allocation3 + $0x107] sm:$0xff] }
 0x346   : > { %3585 = vmatmul.f32.gmra.mxu0 %v7001_v4  ;;  %v2897_v24 = vadd.f32 %v6991_v3, %v2861_v53  ;;  %v3304_v55 = vld [vmem:[#allocation3 + $0xe9] sm:$0xff] }
 0x347   : > { %v2264_v54 = vpop.f32.mrf.mxu2  ;;  %v7007_v61 = vpop.f32.mrf.mxu1  ;;  %4504 = vmatpush.msra.mxu1 %v4503_v15 }
 0x348   : > { %v2542_v5 = vpop.f32.mrf.mxu3  ;;  %v2929_v36 = vmax.f32 %v2897_v24, 0.0  ;;  %v2306_v39 = vadd.f32 %v2264_v54, %v2027_v30 }
 0x34a   : > { %2961 = vst [vmem:[#allocation3 + $0x1c8] sm:$0xff] %v2929_v36  ;;  %v2584_v45 = vadd.f32 %v2542_v5, %v2306_v39  ;;  %3164 = vmatmul.f32.gmra.mxu1 %v2929_v36 }
 0x34b   : > { %v2826_v12 = vpop.f32.mrf.mxu0 }
 0x34c   : > { %v2862_v6 = vadd.f32 %v2820_v56, %v2584_v45  ;;  %3229 = vmatmul.f32.gmra.mxu2 %v3494_v63  ;;  %v4115_v63 = vld [vmem:[#allocation4 + $0x378] sm:$0xff] }
 0x34d   : > { %3391 = vmatmul.f32.gmra.mxu3 %v3302_v44  ;;  %v3303_v56 = vld [vmem:[#allocation3 + $0xd1] sm:$0xff] }
 0x34e   : > { %3588 = vmatmul.f32.gmra.mxu0 %v7009_v11  ;;  %v2898_v19 = vadd.f32 %v6991_v3, %v2862_v6  ;;  %4116 = vmatpush.msra.mxu3 %v4115_v63  ;;  %v2031_v6 = vadd.f32 %v6926_v62, %v6803_v1  ;;  %v3306_v63 = vld [vmem:[#allocation3 + $0x109] sm:$0xff] }
 0x34f   : > { %v2267_v38 = vpop.f32.mrf.mxu2  ;;  %v7015_v51 = vpop.f32.mrf.mxu1  ;;  %v3501_v1 = vld [vmem:[#allocation3 + $0x12f] sm:$0xff] }
 0x350   : > { %v2545_v42 = vpop.f32.mrf.mxu3  ;;  %v2930_v57 = vmax.f32 %v2898_v19, 0.0  ;;  %v2307_v18 = vadd.f32 %v2267_v38, %v2028_v9 }
 0x352   : > { %2962 = vst [vmem:[#allocation3 + $0x1d0] sm:$0xff] %v2930_v57  ;;  %v2585_v8 = vadd.f32 %v2545_v42, %v2307_v18  ;;  %3167 = vmatmul.f32.gmra.mxu1 %v2930_v57  ;;  %v3678_v18 = vld [vmem:[#allocation3 + $0x28] sm:$0xff] }
 0x353   : > { %v2829_v7 = vpop.f32.mrf.mxu0 }
 0x354   : > { %v2863_v26 = vadd.f32 %v2823_v49, %v2585_v8  ;;  %3232 = vmatmul.f32.gmra.mxu2 %v3495_v14  ;;  %v4114_v49 = vld [vmem:[#allocation4 + $0x370] sm:$0xff] }
 0x355   : > { %3394 = vmatmul.f32.gmra.mxu3 %v3303_v56 }
 0x356   : > { %3591 = vmatmul.f32.gmra.mxu0 %v7017_v17  ;;  %v2899_v0 = vadd.f32 %v6991_v3, %v2863_v26  ;;  %4117 = vmatpush.msra.mxu3 %v4114_v49 }
 0x357   : > { %v2270_v47 = vpop.f32.mrf.mxu2  ;;  %v7023_v27 = vpop.f32.mrf.mxu1 }
 0x358   : > { %v2548_v31 = vpop.f32.mrf.mxu3  ;;  %v2931_v48 = vmax.f32 %v2899_v0, 0.0  ;;  %v2308_v37 = vadd.f32 %v2270_v47, %v2029_v59  ;;  %v3679_v59 = vld [vmem:[#allocation3 + $0x30] sm:$0xff] }
 0x35a   : > { %2963 = vst [vmem:[#allocation3 + $0x1e8] sm:$0xff] %v2931_v48  ;;  %v2586_v14 = vadd.f32 %v2548_v31, %v2308_v37  ;;  %3170 = vmatmul.f32.gmra.mxu1 %v2931_v48  ;;  %v4307_v31 = vld [vmem:[#allocation4 + $0x3e8] sm:$0xff] }
 0x35b   : > { %v2832_v21 = vpop.f32.mrf.mxu0  ;;  %v4501_v48 = vld [vmem:[#allocation4 + $0x468] sm:$0xff] }
 0x35c   : > { %v2864_v53 = vadd.f32 %v2826_v12, %v2586_v14  ;;  %3235 = vmatmul.f32.gmra.mxu2 %v7001_v4  ;;  %v4308_v12 = vld [vmem:[#allocation4 + $0x3f0] sm:$0xff]  ;;  %v3917_v14 = vld [vmem:[#allocation4 + $0x2e0] sm:$0xff] }
 0x35d   : > { %3397 = vmatmul.f32.gmra.mxu3 %v3304_v55  ;;  %v4502_v4 = vld [vmem:[#allocation4 + $0x470] sm:$0xff]  ;;  %4311 = vmatpush.msra.mxu0 %v4308_v12 }
 0x35e   : > { %3594 = vmatmul.f32.gmra.mxu0 %v3499_v23  ;;  %v2900_v30 = vadd.f32 %v6991_v3, %v2864_v53  ;;  %4505 = vmatpush.msra.mxu1 %v4502_v4  ;;  %v7047_v53 = vld [vmem:[#allocation3 + $0x48] sm:$0xff]  ;;  %v7055_v12 = vld [vmem:[#allocation3 + $0x50] sm:$0xff] }
 0x35f   : > { %v2273_v24 = vpop.f32.mrf.mxu2  ;;  %v7029_v39 = vpop.f32.mrf.mxu1  ;;  %4312 = vmatpush.msra.mxu0 %v4307_v31  ;;  %3924 = vmatpush.msra.mxu2 %v3917_v14  ;;  %v3311_v31 = vld [vmem:[#allocation3 + $0x151] sm:$0xff] }
 0x360   : > { %v2551_v54 = vpop.f32.mrf.mxu3  ;;  %v2932_v5 = vmax.f32 %v2900_v30, 0.0  ;;  %v2309_v36 = vadd.f32 %v2273_v24, %v2030_v40  ;;  %4506 = vmatpush.msra.mxu1 %v4501_v48  ;;  %v3308_v24 = vld [vmem:[#allocation3 + $0x129] sm:$0xff] }
 0x361   : > { %v3506_v48 = vld [vmem:[#allocation3 + $0x187] sm:$0xff] }
 0x362   : > { %2964 = vst [vmem:[#allocation3 + $0x1f0] sm:$0xff] %v2932_v5  ;;  %v2587_v45 = vadd.f32 %v2551_v54, %v2309_v36  ;;  %3173 = vmatmul.f32.gmra.mxu1 %v2932_v5  ;;  %v3503_v54 = vld [vmem:[#allocation3 + $0x14f] sm:$0xff] }
 0x363   : > { %v3550_v25 = vpop.f32.mrf.mxu0  ;;  %4507 = vmatpush.msra.mxu1 %v4500_v60 }
 0x364   : > { %v2865_v44 = vadd.f32 %v2829_v7, %v2587_v45  ;;  %3238 = vmatmul.f32.gmra.mxu2 %v7009_v11  ;;  %v4113_v7 = vld [vmem:[#allocation4 + $0x368] sm:$0xff] }
 0x365   : > { %3400 = vmatmul.f32.gmra.mxu3 %v3305_v33 }
 0x366   : > { %3597 = vmatmul.f32.gmra.mxu0 %v3500_v2  ;;  %v2901_v16 = vadd.f32 %v6991_v3, %v2865_v44  ;;  %4118 = vmatpush.msra.mxu3 %v4113_v7  ;;  %v4306_v44 = vld [vmem:[#allocation4 + $0x3e0] sm:$0xff]  ;;  %v4111_v7 = vld [vmem:[#allocation4 + $0x358] sm:$0xff] }
 0x367   : > { %v2276_v9 = vpop.f32.mrf.mxu2  ;;  %v7035_v57 = vpop.f32.mrf.mxu1  ;;  %4313 = vmatpush.msra.mxu0 %v4306_v44 }
 0x368   : > { %v2554_v19 = vpop.f32.mrf.mxu3  ;;  %v2933_v38 = vmax.f32 %v2901_v16, 0.0  ;;  %v2310_v42 = vadd.f32 %v2276_v9, %v2031_v6  ;;  %v3504_v6 = vld [vmem:[#allocation3 + $0x167] sm:$0xff] }
 0x36a   : > { %2965 = vst [vmem:[#allocation3 + $0x208] sm:$0xff] %v2933_v38  ;;  %v2588_v8 = vadd.f32 %v2554_v19, %v2310_v42  ;;  %3743 = vmatmul.f32.vlgmr.msrb.gmra.mxu1 %v3678_v18  ;;  %v7063_v18 = vld [vmem:[#allocation3 + $0x68] sm:$0xff] }
 0x36b   : > { %v3553_v11 = vpop.f32.mrf.mxu0 }
 0x36c   : > { %v2866_v52 = vadd.f32 %v2832_v21, %v2588_v8  ;;  %3241 = vmatmul.f32.gmra.mxu2 %v7017_v17  ;;  %v3307_v17 = vld [vmem:[#allocation3 + $0x111] sm:$0xff] }
 0x36d   : > { %3403 = vmatmul.f32.gmra.mxu3 %v3306_v63  ;;  %v3310_v63 = vld [vmem:[#allocation3 + $0x149] sm:$0xff] }
 0x36e   : > { %3600 = vmatmul.f32.gmra.mxu0 %v3501_v1  ;;  %v2902_v62 = vadd.f32 %v6991_v3, %v2866_v52  ;;  %v3502_v3 = vld [vmem:[#allocation3 + $0x147] sm:$0xff]  ;;  %v3505_v52 = vld [vmem:[#allocation3 + $0x16f] sm:$0xff] }
 0x36f   : > { %v3194_v15 = vpop.f32.mrf.mxu2  ;;  %v7040_v46 = vpop.f32.mrf.mxu1 }
 0x370   : > { %v3356_v56 = vpop.f32.mrf.mxu3  ;;  %v2934_v26 = vmax.f32 %v2902_v62, 0.0  ;;  %v3195_v50 = vadd.f32 %v3194_v15, %v6936_v43 }
 0x372   : > { %2966 = vst [vmem:[#allocation3 + $0x210] sm:$0xff] %v2934_v26  ;;  %v3452_v0 = vadd.f32 %v3356_v56, %v3195_v50  ;;  %3746 = vmatmul.f32.gmra.mxu1 %v3679_v59  ;;  %v7071_v26 = vld [vmem:[#allocation3 + $0x70] sm:$0xff] }
 0x373   : > { %v3556_v47 = vpop.f32.mrf.mxu0 }
 0x374   : > { %3244 = vmatmul.f32.gmra.mxu2 %v3499_v23  ;;  %v7042_v37 = vadd.f32 %v3550_v25, %v3452_v0  ;;  %v4112_v23 = vld [vmem:[#allocation4 + $0x360] sm:$0xff]  ;;  %v4305_v0 = vld [vmem:[#allocation4 + $0x3d8] sm:$0xff] }
 0x375   : > { %3406 = vmatmul.f32.gmra.mxu3 %v3307_v17  ;;  %4314 = vmatpush.msra.mxu0 %v4305_v0 }
 0x376   : > { %3603 = vmatmul.f32.gmra.mxu0 %v3502_v3  ;;  %4119 = vmatpush.msra.mxu3 %v4112_v23  ;;  %v4110_v23 = vld [vmem:[#allocation4 + $0x350] sm:$0xff] }
 0x377   : > { %v3197_v43 = vpop.f32.mrf.mxu2  ;;  %v7045_v55 = vpop.f32.mrf.mxu1 }
 0x378   : > { %v3359_v21 = vpop.f32.mrf.mxu3  ;;  %v3198_v49 = vadd.f32 %v3197_v43, %v6944_v32  ;;  %4120 = vmatpush.msra.mxu3 %v4111_v7 }
 0x37a   : > { %v3453_v40 = vadd.f32 %v3359_v21, %v3198_v49  ;;  %3749 = vmatmul.f32.gmra.mxu1 %v7047_v53  ;;  %v7079_v49 = vld [vmem:[#allocation3 + $0x88] sm:$0xff]  ;;  %4121 = vmatpush.msra.mxu3 %v4110_v23  ;;  %v4302_v23 = vld [vmem:[#allocation4 + $0x3c0] sm:$0xff] }
 0x37b   : > { %v3559_v30 = vpop.f32.mrf.mxu0 }
 0x37c   : > { %3247 = vmatmul.f32.gmra.mxu2 %v3500_v2  ;;  %v7050_v5 = vadd.f32 %v3553_v11, %v3453_v40  ;;  %v3309_v2 = vld [vmem:[#allocation3 + $0x131] sm:$0xff] }
 0x37d   : > { %3409 = vmatmul.f32.gmra.mxu3 %v3308_v24  ;;  %v3312_v24 = vld [vmem:[#allocation3 + $0x169] sm:$0xff] }
 0x37e   : > { %3606 = vmatmul.f32.gmra.mxu0 %v3503_v54 }
 0x37f   : > { %v3200_v36 = vpop.f32.mrf.mxu2  ;;  %v7053_v25 = vpop.f32.mrf.mxu1 }
 0x380   : > { %v3362_v45 = vpop.f32.mrf.mxu3  ;;  %v3201_v32 = vadd.f32 %v3200_v36, %v6949_v10  ;;  %v3916_v10 = vld [vmem:[#allocation4 + $0x2d8] sm:$0xff] }
 0x381   : > { %3925 = vmatpush.msra.mxu2 %v3916_v10  ;;  %v4498_v10 = vld [vmem:[#allocation4 + $0x450] sm:$0xff] }
 0x382   : > { %v3454_v4 = vadd.f32 %v3362_v45, %v3201_v32  ;;  %3752 = vmatmul.f32.gmra.mxu1 %v7055_v12 }
 0x383   : > { %v3562_v33 = vpop.f32.mrf.mxu0 }
 0x384   : > { %3250 = vmatmul.f32.gmra.mxu2 %v3501_v1  ;;  %v7058_v16 = vadd.f32 %v3556_v47, %v3454_v4  ;;  %v4499_v47 = vld [vmem:[#allocation4 + $0x458] sm:$0xff] }
 0x385   : > { %3412 = vmatmul.f32.gmra.mxu3 %v3309_v2  ;;  %4508 = vmatpush.msra.mxu1 %v4499_v47  ;;  %v4304_v2 = vld [vmem:[#allocation4 + $0x3d0] sm:$0xff] }
 0x386   : > { %3609 = vmatmul.f32.gmra.mxu0 %v3504_v6 }
 0x387   : > { %v3203_v9 = vpop.f32.mrf.mxu2  ;;  %v7061_v42 = vpop.f32.mrf.mxu1  ;;  %4315 = vmatpush.msra.mxu0 %v4304_v2  ;;  %4509 = vmatpush.msra.mxu1 %v4498_v10 }
 0x388   : > { %v3365_v19 = vpop.f32.mrf.mxu3  ;;  %v3204_v38 = vadd.f32 %v3203_v9, %v6954_v41  ;;  %v3508_v9 = vld [vmem:[#allocation3 + $0x1a7] sm:$0xff] }
 0x38a   : > { %v3455_v8 = vadd.f32 %v3365_v19, %v3204_v38  ;;  %3755 = vmatmul.f32.gmra.mxu1 %v7063_v18 }
 0x38b   : > { %v3565_v11 = vpop.f32.mrf.mxu0 }
 0x38c   : > { %3253 = vmatmul.f32.gmra.mxu2 %v3502_v3  ;;  %v7066_v1 = vadd.f32 %v3559_v30, %v3455_v8 }
 0x38d   : > { %3415 = vmatmul.f32.gmra.mxu3 %v3310_v63  ;;  %v7095_v63 = vld [vmem:[#allocation3 + $0xa8] sm:$0xff] }
 0x38e   : > { %3612 = vmatmul.f32.gmra.mxu0 %v3505_v52 }
 0x38f   : > { %v3206_v62 = vpop.f32.mrf.mxu2  ;;  %v7069_v56 = vpop.f32.mrf.mxu1 }
 0x390   : > { %v3368_v15 = vpop.f32.mrf.mxu3  ;;  %v3207_v41 = vadd.f32 %v3206_v62, %v6959_v20  ;;  %v3915_v20 = vld [vmem:[#allocation4 + $0x2d0] sm:$0xff] }
 0x391   : > { %3926 = vmatpush.msra.mxu2 %v3915_v20  ;;  %v7106_v20 = vld [vmem:[#allocation3 + $0xb0] sm:$0xff] }
 0x392   : > { %v3456_v50 = vadd.f32 %v3368_v15, %v3207_v41  ;;  %3758 = vmatmul.f32.gmra.mxu1 %v7071_v26  ;;  %v3314_v41 = vld [vmem:[#allocation3 + $0x189] sm:$0xff] }
 0x393   : > { %v3568_v59 = vpop.f32.mrf.mxu0 }
 0x394   : > { %3256 = vmatmul.f32.gmra.mxu2 %v3503_v54  ;;  %v7074_v17 = vadd.f32 %v3562_v33, %v3456_v50  ;;  %v3507_v54 = vld [vmem:[#allocation3 + $0x18f] sm:$0xff] }
 0x395   : > { %3418 = vmatmul.f32.gmra.mxu3 %v3311_v31  ;;  %v7087_v33 = vld [vmem:[#allocation3 + $0x90] sm:$0xff] }
 0x396   : > { %3615 = vmatmul.f32.gmra.mxu0 %v3506_v48  ;;  %v7098_v50 = vld [vmem:[#allocation3 + $0x1af] sm:$0xff] }
 0x397   : > { %v3209_v3 = vpop.f32.mrf.mxu2  ;;  %v7077_v21 = vpop.f32.mrf.mxu1 }
 0x398   : > { %v3371_v14 = vpop.f32.mrf.mxu3  ;;  %v3210_v43 = vadd.f32 %v3209_v3, %v6964_v28 }
 0x39a   : > { %v3457_v40 = vadd.f32 %v3371_v14, %v3210_v43  ;;  %3761 = vmatmul.f32.gmra.mxu1 %v7079_v49  ;;  %v4497_v43 = vld [vmem:[#allocation4 + $0x448] sm:$0xff] }
 0x39b   : > { %v3571_v30 = vpop.f32.mrf.mxu0  ;;  %4510 = vmatpush.msra.mxu1 %v4497_v43 }
 0x39c   : > { %3259 = vmatmul.f32.gmra.mxu2 %v3504_v6  ;;  %v7082_v36 = vadd.f32 %v3565_v11, %v3457_v40  ;;  %v3313_v6 = vld [vmem:[#allocation3 + $0x171] sm:$0xff] }
 0x39d   : > { %3421 = vmatmul.f32.gmra.mxu3 %v3312_v24  ;;  %v3315_v40 = vld [vmem:[#allocation3 + $0x191] sm:$0xff]  ;;  %v3913_v24 = vld [vmem:[#allocation4 + $0x2c0] sm:$0xff] }
 0x39e   : > { %3618 = vmatmul.f32.gmra.mxu0 %v3507_v54 }
 0x39f   : > { %v3212_v45 = vpop.f32.mrf.mxu2  ;;  %v7085_v4 = vpop.f32.mrf.mxu1 }
 0x3a0   : > { %v3374_v32 = vpop.f32.mrf.mxu3  ;;  %v3213_v28 = vadd.f32 %v3212_v45, %v6969_v29  ;;  %v3914_v29 = vld [vmem:[#allocation4 + $0x2c8] sm:$0xff]  ;;  %v4301_v45 = vld [vmem:[#allocation4 + $0x3b8] sm:$0xff] }
 0x3a1   : > { %3927 = vmatpush.msra.mxu2 %v3914_v29  ;;  %v4300_v29 = vld [vmem:[#allocation4 + $0x3b0] sm:$0xff] }
 0x3a2   : > { %v3458_v44 = vadd.f32 %v3374_v32, %v3213_v28  ;;  %3764 = vmatmul.f32.gmra.mxu1 %v7087_v33 }
 0x3a3   : > { %v3574_v60 = vpop.f32.mrf.mxu0  ;;  %3928 = vmatpush.msra.mxu2 %v3913_v24  ;;  %v4106_v24 = vld [vmem:[#allocation4 + $0x330] sm:$0xff] }
 0x3a4   : > { %3262 = vmatmul.f32.gmra.mxu2 %v3505_v52  ;;  %v7090_v19 = vadd.f32 %v3568_v59, %v3458_v44  ;;  %v4109_v52 = vld [vmem:[#allocation4 + $0x348] sm:$0xff] }
 0x3a5   : > { %3424 = vmatmul.f32.gmra.mxu3 %v3313_v6 }
 0x3a6   : > { %3621 = vmatmul.f32.gmra.mxu0 %v3508_v9  ;;  %4122 = vmatpush.msra.mxu3 %v4109_v52  ;;  %v3912_v52 = vld [vmem:[#allocation4 + $0x2b8] sm:$0xff] }
 0x3a7   : > { %v3215_v38 = vpop.f32.mrf.mxu2  ;;  %v7093_v7 = vpop.f32.mrf.mxu1  ;;  %3929 = vmatpush.msra.mxu2 %v3912_v52 }
 0x3a8   : > { %v3377_v8 = vpop.f32.mrf.mxu3  ;;  %v3216_v11 = vadd.f32 %v3215_v38, %v6974_v35  ;;  %v3316_v38 = vld [vmem:[#allocation3 + $0x1a9] sm:$0xff] }
 0x3aa   : > { %v3459_v62 = vadd.f32 %v3377_v8, %v3216_v11  ;;  %3767 = vmatmul.f32.gmra.mxu1 %v7095_v63  ;;  %v4299_v8 = vld [vmem:[#allocation4 + $0x3a8] sm:$0xff] }
 0x3ab   : > { %v3577_v15 = vpop.f32.mrf.mxu0  ;;  %v7124_v11 = vld [vmem:[#allocation3 + $0x1cf] sm:$0xff] }
 0x3ac   : > { %3265 = vmatmul.f32.gmra.mxu2 %v3506_v48  ;;  %v7100_v59 = vadd.f32 %v3571_v30, %v3459_v62  ;;  %v4303_v48 = vld [vmem:[#allocation4 + $0x3c8] sm:$0xff]  ;;  %v4298_v62 = vld [vmem:[#allocation4 + $0x3a0] sm:$0xff] }
 0x3ad   : > { %3427 = vmatmul.f32.gmra.mxu3 %v3314_v41  ;;  %4316 = vmatpush.msra.mxu0 %v4303_v48  ;;  %v7111_v30 = vld [vmem:[#allocation3 + $0x1c7] sm:$0xff]  ;;  %v4107_v41 = vld [vmem:[#allocation4 + $0x338] sm:$0xff] }
 0x3ae   : > { %3624 = vmatmul.f32.gmra.mxu0 %v7098_v50 }
 0x3af   : > { %v3218_v35 = vpop.f32.mrf.mxu2  ;;  %v7104_v31 = vpop.f32.mrf.mxu1  ;;  %4317 = vmatpush.msra.mxu0 %v4302_v23  ;;  %v3911_v23 = vld [vmem:[#allocation4 + $0x2b0] sm:$0xff] }
 0x3b0   : > { %v3380_v0 = vpop.f32.mrf.mxu3  ;;  %v3219_v47 = vadd.f32 %v3218_v35, %v6979_v22  ;;  %3930 = vmatpush.msra.mxu2 %v3911_v23  ;;  %v3318_v23 = vld [vmem:[#allocation3 + $0x1c9] sm:$0xff] }
 0x3b1   : > { %4318 = vmatpush.msra.mxu0 %v4301_v45  ;;  %v4296_v45 = vld [vmem:[#allocation4 + $0x390] sm:$0xff] }
 0x3b2   : > { %v3460_v3 = vadd.f32 %v3380_v0, %v3219_v47  ;;  %3770 = vmatmul.f32.gmra.mxu1 %v7106_v20  ;;  %v4297_v47 = vld [vmem:[#allocation4 + $0x398] sm:$0xff] }
 0x3b3   : > { %v7108_v14 = vpop.f32.mrf.mxu0  ;;  %4319 = vmatpush.msra.mxu0 %v4300_v29  ;;  %v4295_v29 = vld [vmem:[#allocation4 + $0x388] sm:$0xff] }
 0x3b4   : > { %3268 = vmatmul.f32.gmra.mxu2 %v3507_v54  ;;  %v7113_v22 = vadd.f32 %v3574_v60, %v3460_v3  ;;  %v7119_v54 = vld [vmem:[#allocation3 + $0xc8] sm:$0xff]  ;;  %v4108_v60 = vld [vmem:[#allocation4 + $0x340] sm:$0xff] }
 0x3b5   : > { %3430 = vmatmul.f32.gmra.mxu3 %v3315_v40  ;;  %4320 = vmatpush.msra.mxu0 %v4299_v8  ;;  %v3317_v40 = vld [vmem:[#allocation3 + $0x1b1] sm:$0xff] }
 0x3b6   : > { %3627 = vmatmul.f32.gmra.mxu0 %v7111_v30  ;;  %4123 = vmatpush.msra.mxu3 %v4108_v60  ;;  %v3908_v8 = vld [vmem:[#allocation4 + $0x298] sm:$0xff] }
 0x3b7   : > { %v3221_v32 = vpop.f32.mrf.mxu2  ;;  %v7117_v2 = vpop.f32.mrf.mxu1  ;;  %4321 = vmatpush.msra.mxu0 %v4298_v62 }
 0x3b8   : > { %v3383_v28 = vpop.f32.mrf.mxu3  ;;  %v3222_v44 = vadd.f32 %v3221_v32, %v6984_v13  ;;  %4124 = vmatpush.msra.mxu3 %v4107_v41  ;;  %v3910_v32 = vld [vmem:[#allocation4 + $0x2a8] sm:$0xff] }
 0x3b9   : > { %4322 = vmatpush.msra.mxu0 %v4297_v47  ;;  %3931 = vmatpush.msra.mxu2 %v3910_v32 }
 0x3ba   : > { %v3461_v10 = vadd.f32 %v3383_v28, %v3222_v44  ;;  %3773 = vmatmul.f32.gmra.mxu1 %v7119_v54  ;;  %4125 = vmatpush.msra.mxu3 %v4106_v24  ;;  %v4105_v28 = vld [vmem:[#allocation4 + $0x328] sm:$0xff]  ;;  %v4496_v44 = vld [vmem:[#allocation4 + $0x440] sm:$0xff] }
 0x3bb   : > { %v7121_v6 = vpop.f32.mrf.mxu0  ;;  %4323 = vmatpush.msra.mxu0 %v4296_v45  ;;  %4511 = vmatpush.msra.mxu1 %v4496_v44  ;;  %v3906_v24 = vld [vmem:[#allocation4 + $0x288] sm:$0xff]  ;;  %v4100_v44 = vld [vmem:[#allocation4 + $0x300] sm:$0xff] }
 0x3bc   : > { %3271 = vmatmul.f32.gmra.mxu2 %v3508_v9  ;;  %v7126_v13 = vadd.f32 %v3577_v15, %v3461_v10  ;;  %v7132_v9 = vld [vmem:[#allocation3 + $0xd0] sm:$0xff]  ;;  %v3909_v10 = vld [vmem:[#allocation4 + $0x2a0] sm:$0xff]  ;;  %4126 = vmatpush.msra.mxu3 %v4105_v28  ;;  %v4101_v45 = vld [vmem:[#allocation4 + $0x308] sm:$0xff] }
 0x3bd   : > { %3433 = vmatmul.f32.gmra.mxu3 %v3316_v38  ;;  %v4104_v38 = vld [vmem:[#allocation4 + $0x320] sm:$0xff]  ;;  %3932 = vmatpush.msra.mxu2 %v3909_v10 }
 0x3be   : > { %3630 = vmatmul.f32.gmra.mxu0 %v7124_v11  ;;  %4127 = vmatpush.msra.mxu3 %v4104_v38  ;;  %v3905_v28 = vld [vmem:[#allocation4 + $0x280] sm:$0xff] }
 0x3bf   : > { %v3224_v35 = vpop.f32.mrf.mxu2  ;;  %v7130_v48 = vpop.f32.mrf.mxu1  ;;  %4324 = vmatpush.msra.mxu0 %v4295_v29  ;;  %3933 = vmatpush.msra.mxu2 %v3908_v8 }
 0x3c0   : > { %v3386_v0 = vpop.f32.mrf.mxu3  ;;  %v3225_v3 = vadd.f32 %v3224_v35, %v6994_v34  ;;  %v7138_v34 = vld [vmem:[#allocation3 + $0x1e7] sm:$0xff] }
 0x3c2   : > { %v3462_v15 = vadd.f32 %v3386_v0, %v3225_v3  ;;  %3776 = vmatmul.f32.gmra.mxu1 %v7132_v9  ;;  %v7147_v0 = vld [vmem:[#allocation3 + $0xe8] sm:$0xff] }
 0x3c3   : > { %v7134_v43 = vpop.f32.mrf.mxu0 }
 0x3c4   : > { %3274 = vmatmul.f32.gmra.mxu2 %v7098_v50  ;;  %v7141_v60 = vadd.f32 %v7108_v14, %v3462_v15  ;;  %v4294_v50 = vld [vmem:[#allocation4 + $0x380] sm:$0xff]  ;;  %v4103_v14 = vld [vmem:[#allocation4 + $0x318] sm:$0xff]  ;;  %v3907_v15 = vld [vmem:[#allocation4 + $0x290] sm:$0xff] }
 0x3c5   : > { %3436 = vmatmul.f32.gmra.mxu3 %v3317_v40  ;;  %4325 = vmatpush.msra.mxu0 %v4294_v50  ;;  %v4102_v40 = vld [vmem:[#allocation4 + $0x310] sm:$0xff] }
 0x3c6   : > { %7953 = vst [vmem:[#allocation24_spill] sm:$0xff] %v7141_v60  ;;  %3633 = vmatmul.f32.gmra.mxu0 %v7138_v34  ;;  %4128 = vmatpush.msra.mxu3 %v4103_v14  ;;  %v3319_v50 = vld [vmem:[#allocation3 + $0x1d1] sm:$0xff] }
 0x3c7   : > { %v3227_v62 = vpop.f32.mrf.mxu2  ;;  %v7145_v35 = vpop.f32.mrf.mxu1  ;;  %3934 = vmatpush.msra.mxu2 %v3907_v15  ;;  %v7293_v60 = vld [vmem:[#allocation3 + $0xb1] sm:$0xff] }
 0x3c8   : > { %v3389_v52 = vpop.f32.mrf.mxu3  ;;  %v3228_v41 = vadd.f32 %v3227_v62, %v6999_v58  ;;  %v3513_v58 = vld [vmem:[#allocation3 + $0x1ef] sm:$0xff]  ;;  %4129 = vmatpush.msra.mxu3 %v4102_v40 }
 0x3c9   : > { %3935 = vmatpush.msra.mxu2 %v3906_v24 }
 0x3ca   : > { %v3463_v47 = vadd.f32 %v3389_v52, %v3228_v41  ;;  %3779 = vmatmul.f32.gmra.mxu1 %v7147_v0  ;;  %4130 = vmatpush.msra.mxu3 %v4101_v45  ;;  %v3514_v41 = vld [vmem:[#allocation3 + $0x207] sm:$0xff] }
 0x3cb   : > { %v3589_v3 = vpop.f32.mrf.mxu0  ;;  %3936 = vmatpush.msra.mxu2 %v3905_v28  ;;  %v3320_v28 = vld [vmem:[#allocation3 + $0x1e9] sm:$0xff] }
 0x3cc   : > { %3277 = vmatmul.f32.gmra.mxu2 %v7111_v30  ;;  %v7152_v32 = vadd.f32 %v7121_v6, %v3463_v47  ;;  %v7157_v30 = vld [vmem:[#allocation3 + $0xf0] sm:$0xff]  ;;  %4131 = vmatpush.msra.mxu3 %v4100_v44  ;;  %v4495_v6 = vld [vmem:[#allocation4 + $0x438] sm:$0xff] }
 0x3cd   : > { %3439 = vmatmul.f32.gmra.mxu3 %v3318_v23  ;;  %4512 = vmatpush.msra.mxu1 %v4495_v6  ;;  %v7167_v23 = vld [vmem:[#allocation3 + $0x108] sm:$0xff] }
 0x3ce   : > { %7954 = vst [vmem:[#allocation51_spill] sm:$0xff] %v7152_v32  ;;  %3636 = vmatmul.f32.gmra.mxu0 %v3513_v58  ;;  %v4075_v32 = vld [vmem:[#allocation3 + $0xc7] sm:$0xff] }
 0x3cf   : > { %v3230_v10 = vpop.f32.mrf.mxu2  ;;  %v7155_v8 = vpop.f32.mrf.mxu1 }
 0x3d0   : > { %v3392_v29 = vpop.f32.mrf.mxu3  ;;  %v3231_v38 = vadd.f32 %v3230_v10, %v7007_v61 }
 0x3d2   : > { %v3464_v62 = vadd.f32 %v3392_v29, %v3231_v38  ;;  %3782 = vmatmul.f32.gmra.mxu1 %v7157_v30  ;;  %v7176_v38 = vld [vmem:[#allocation3 + $0x110] sm:$0xff] }
 0x3d3   : > { %v3592_v52 = vpop.f32.mrf.mxu0 }
 0x3d4   : > { %3280 = vmatmul.f32.gmra.mxu2 %v7124_v11  ;;  %v7162_v14 = vadd.f32 %v7134_v43, %v3464_v62  ;;  %v3515_v11 = vld [vmem:[#allocation3 + $0x20f] sm:$0xff] }
 0x3d5   : > { %3442 = vmatmul.f32.gmra.mxu3 %v3319_v50  ;;  %v4494_v50 = vld [vmem:[#allocation4 + $0x430] sm:$0xff] }
 0x3d6   : > { %7955 = vst [vmem:[#allocation26_spill] sm:$0xff] %v7162_v14  ;;  %3639 = vmatmul.f32.gmra.mxu0 %v3514_v41  ;;  %v7179_v41 = vld [vmem:[#allocation3 + $0x1f1] sm:$0xff]  ;;  %4513 = vmatpush.msra.mxu1 %v4494_v50 }
 0x3d7   : > { %v3233_v61 = vpop.f32.mrf.mxu2  ;;  %v7165_v40 = vpop.f32.mrf.mxu1  ;;  %v7269_v14 = vld [vmem:[#allocation3 + $0x91] sm:$0xff] }
 0x3d8   : > { %v3395_v47 = vpop.f32.mrf.mxu3  ;;  %v3234_v15 = vadd.f32 %v3233_v61, %v7015_v51 }
 0x3da   : > { %v3465_v24 = vadd.f32 %v3395_v47, %v3234_v15  ;;  %3785 = vmatmul.f32.gmra.mxu1 %v7167_v23  ;;  %v7188_v15 = vld [vmem:[#allocation3 + $0x128] sm:$0xff] }
 0x3db   : > { %v3595_v45 = vpop.f32.mrf.mxu0 }
 0x3dc   : > { %3283 = vmatmul.f32.gmra.mxu2 %v7138_v34  ;;  %v7171_v43 = vadd.f32 %v3589_v3, %v3465_v24 }
 0x3dd   : > { %3445 = vmatmul.f32.gmra.mxu3 %v3320_v28 }
 0x3de   : > { %7956 = vst [vmem:[#allocation22_spill] sm:$0xff] %v7171_v43  ;;  %3642 = vmatmul.f32.gmra.mxu0 %v3515_v11  ;;  %v3872_v11 = vld [vmem:[#allocation3 + $0x29] sm:$0xff] }
 0x3df   : > { %v3236_v44 = vpop.f32.mrf.mxu2  ;;  %v7174_v29 = vpop.f32.mrf.mxu1  ;;  %v4073_v43 = vld [vmem:[#allocation3 + $0xa7] sm:$0xff] }
 0x3e0   : > { %v3398_v10 = vpop.f32.mrf.mxu3  ;;  %v3237_v51 = vadd.f32 %v3236_v44, %v7023_v27 }
 0x3e2   : > { %v3466_v62 = vadd.f32 %v3398_v10, %v3237_v51  ;;  %3788 = vmatmul.f32.gmra.mxu1 %v7176_v38  ;;  %v7197_v51 = vld [vmem:[#allocation3 + $0x130] sm:$0xff] }
 0x3e3   : > { %v3598_v6 = vpop.f32.mrf.mxu0 }
 0x3e4   : > { %3286 = vmatmul.f32.gmra.mxu2 %v3513_v58  ;;  %v7182_v34 = vadd.f32 %v3592_v52, %v3466_v62  ;;  %v4067_v58 = vld [vmem:[#allocation3 + $0x47] sm:$0xff] }
 0x3e5   : > { %3448 = vmatmul.f32.gmra.mxu3 %v7179_v41 }
 0x3e6   : > { %7957 = vst [vmem:[#allocation23_spill] sm:$0xff] %v7182_v34  ;;  %4326 = vmatmul.f32.vlgmr.msra.gmra.mxu0 %v7047_v53  ;;  %v7245_v34 = vld [vmem:[#allocation3 + $0x71] sm:$0xff] }
 0x3e7   : > { %v3239_v27 = vpop.f32.mrf.mxu2  ;;  %v7186_v47 = vpop.f32.mrf.mxu1 }
 0x3e8   : > { %v3401_v3 = vpop.f32.mrf.mxu3  ;;  %v3240_v61 = vadd.f32 %v3239_v27, %v7029_v39  ;;  %v4493_v27 = vld [vmem:[#allocation4 + $0x428] sm:$0xff] }
 0x3e9   : > { %4514 = vmatpush.msra.mxu1 %v4493_v27  ;;  %v4069_v27 = vld [vmem:[#allocation3 + $0x67] sm:$0xff] }
 0x3ea   : > { %v3467_v24 = vadd.f32 %v3401_v3, %v3240_v61  ;;  %3791 = vmatmul.f32.gmra.mxu1 %v7188_v15  ;;  %v3873_v3 = vld [vmem:[#allocation3 + $0x31] sm:$0xff] }
 0x3eb   : > { %v3601_v28 = vpop.f32.mrf.mxu0  ;;  %v4068_v61 = vld [vmem:[#allocation3 + $0x4f] sm:$0xff] }
 0x3ec   : > { %3937 = vmatmul.f32.vlgmr.msra.gmra.mxu2 %v3872_v11  ;;  %v7191_v52 = vadd.f32 %v3595_v45, %v3467_v24 }
 0x3ed   : > { %4132 = vmatmul.f32.vlgmr.msra.gmra.mxu3 %v4067_v58  ;;  %v7206_v58 = vld [vmem:[#allocation3 + $0x148] sm:$0xff] }
 0x3ee   : > { %7958 = vst [vmem:[#allocation28_spill] sm:$0xff] %v7191_v52  ;;  %4329 = vmatmul.f32.gmra.mxu0 %v7055_v12  ;;  %v4071_v52 = vld [vmem:[#allocation3 + $0x87] sm:$0xff] }
 0x3ef   : > { %v3242_v53 = vpop.f32.mrf.mxu2  ;;  %v7195_v10 = vpop.f32.mrf.mxu1 }
 0x3f0   : > { %v3404_v44 = vpop.f32.mrf.mxu3  ;;  %v3243_v39 = vadd.f32 %v3242_v53, %v7035_v57 }
 0x3f2   : > { %v3468_v62 = vadd.f32 %v3404_v44, %v3243_v39  ;;  %3794 = vmatmul.f32.gmra.mxu1 %v7197_v51  ;;  %v7209_v39 = vld [vmem:[#allocation3 + $0x49] sm:$0xff] }
 0x3f3   : > { %v3604_v50 = vpop.f32.mrf.mxu0 }
 0x3f4   : > { %3940 = vmatmul.f32.gmra.mxu2 %v3873_v3  ;;  %v7200_v45 = vadd.f32 %v3598_v6, %v3468_v62 }
 0x3f5   : > { %4135 = vmatmul.f32.gmra.mxu3 %v4068_v61  ;;  %v7218_v61 = vld [vmem:[#allocation3 + $0x150] sm:$0xff] }
 0x3f6   : > { %7959 = vst [vmem:[#allocation25_spill] sm:$0xff] %v7200_v45  ;;  %4332 = vmatmul.f32.gmra.mxu0 %v7063_v18  ;;  %v7221_v45 = vld [vmem:[#allocation3 + $0x51] sm:$0xff] }
 0x3f7   : > { %v3245_v12 = vpop.f32.mrf.mxu2  ;;  %v7204_v11 = vpop.f32.mrf.mxu1 }
 0x3f8   : > { %v3407_v57 = vpop.f32.mrf.mxu3  ;;  %v3246_v24 = vadd.f32 %v3245_v12, %v7040_v46 }
 0x3fa   : > { %v3469_v53 = vadd.f32 %v3407_v57, %v3246_v24  ;;  %3797 = vmatmul.f32.gmra.mxu1 %v7206_v58  ;;  %v4492_v24 = vld [vmem:[#allocation4 + $0x420] sm:$0xff] }
 0x3fb   : > { %v3607_v44 = vpop.f32.mrf.mxu0  ;;  %4515 = vmatpush.msra.mxu1 %v4492_v24  ;;  %v7233_v24 = vld [vmem:[#allocation3 + $0x69] sm:$0xff] }
 0x3fc   : > { %3943 = vmatmul.f32.gmra.mxu2 %v7209_v39  ;;  %v7212_v6 = vadd.f32 %v3601_v28, %v3469_v53 }
 0x3fd   : > { %4138 = vmatmul.f32.gmra.mxu3 %v4069_v27  ;;  %v4070_v27 = vld [vmem:[#allocation3 + $0x6f] sm:$0xff] }
 0x3fe   : > { %7960 = vst [vmem:[#allocation30_spill] sm:$0xff] %v7212_v6  ;;  %4335 = vmatmul.f32.gmra.mxu0 %v7071_v26 }
 0x3ff   : > { %v3248_v18 = vpop.f32.mrf.mxu2  ;;  %v7216_v3 = vpop.f32.mrf.mxu1 }
 0x400   : > { %v3410_v46 = vpop.f32.mrf.mxu3  ;;  %v3249_v62 = vadd.f32 %v3248_v18, %v7045_v55 }
 0x402   : > { %v3470_v12 = vadd.f32 %v3410_v46, %v3249_v62  ;;  %3800 = vmatmul.f32.gmra.mxu1 %v7218_v61  ;;  %v7230_v46 = vld [vmem:[#allocation3 + $0x168] sm:$0xff] }
 0x403   : > { %v3610_v57 = vpop.f32.mrf.mxu0 }
 0x404   : > { %3946 = vmatmul.f32.gmra.mxu2 %v7221_v45  ;;  %v7224_v26 = vadd.f32 %v3604_v50, %v3470_v12 }
 0x405   : > { %4141 = vmatmul.f32.gmra.mxu3 %v4070_v27 }
 0x406   : > { %7961 = vst [vmem:[#allocation27_spill] sm:$0xff] %v7224_v26  ;;  %4338 = vmatmul.f32.gmra.mxu0 %v7079_v49  ;;  %v4491_v26 = vld [vmem:[#allocation4 + $0x418] sm:$0xff] }
 0x407   : > { %v3251_v55 = vpop.f32.mrf.mxu2  ;;  %v7228_v18 = vpop.f32.mrf.mxu1  ;;  %4516 = vmatpush.msra.mxu1 %v4491_v26  ;;  %v7257_v26 = vld [vmem:[#allocation3 + $0x89] sm:$0xff] }
 0x408   : > { %v3413_v28 = vpop.f32.mrf.mxu3  ;;  %v3252_v53 = vadd.f32 %v3251_v55, %v7053_v25  ;;  %v7242_v55 = vld [vmem:[#allocation3 + $0x170] sm:$0xff] }
 0x40a   : > { %v3471_v62 = vadd.f32 %v3413_v28, %v3252_v53  ;;  %3803 = vmatmul.f32.gmra.mxu1 %v7230_v46 }
 0x40b   : > { %v3613_v6 = vpop.f32.mrf.mxu0 }
 0x40c   : > { %3949 = vmatmul.f32.gmra.mxu2 %v7233_v24  ;;  %v7236_v50 = vadd.f32 %v3607_v44, %v3471_v62 }
 0x40d   : > { %4144 = vmatmul.f32.gmra.mxu3 %v4071_v52  ;;  %v4072_v52 = vld [vmem:[#allocation3 + $0x8f] sm:$0xff] }
 0x40e   : > { %7962 = vst [vmem:[#allocation32_spill] sm:$0xff] %v7236_v50  ;;  %4341 = vmatmul.f32.gmra.mxu0 %v7087_v33 }
 0x40f   : > { %v3254_v49 = vpop.f32.mrf.mxu2  ;;  %v7240_v27 = vpop.f32.mrf.mxu1 }
 0x410   : > { %v3416_v25 = vpop.f32.mrf.mxu3  ;;  %v3255_v12 = vadd.f32 %v3254_v49, %v7061_v42 }
 0x412   : > { %v3472_v28 = vadd.f32 %v3416_v25, %v3255_v12  ;;  %3806 = vmatmul.f32.gmra.mxu1 %v7242_v55  ;;  %v7254_v25 = vld [vmem:[#allocation3 + $0x188] sm:$0xff] }
 0x413   : > { %v3616_v53 = vpop.f32.mrf.mxu0 }
 0x414   : > { %3952 = vmatmul.f32.gmra.mxu2 %v7245_v34  ;;  %v7248_v33 = vadd.f32 %v3610_v57, %v3472_v28 }
 0x415   : > { %4147 = vmatmul.f32.gmra.mxu3 %v4072_v52 }
 0x416   : > { %7963 = vst [vmem:[#allocation29_spill] sm:$0xff] %v7248_v33  ;;  %4344 = vmatmul.f32.gmra.mxu0 %v7095_v63  ;;  %v4490_v33 = vld [vmem:[#allocation4 + $0x410] sm:$0xff] }
 0x417   : > { %v3257_v42 = vpop.f32.mrf.mxu2  ;;  %v7252_v49 = vpop.f32.mrf.mxu1  ;;  %4517 = vmatpush.msra.mxu1 %v4490_v33  ;;  %v7281_v33 = vld [vmem:[#allocation3 + $0xa9] sm:$0xff] }
 0x418   : > { %v3419_v44 = vpop.f32.mrf.mxu3  ;;  %v3258_v62 = vadd.f32 %v3257_v42, %v7069_v56  ;;  %v7266_v42 = vld [vmem:[#allocation3 + $0x190] sm:$0xff] }
 0x41a   : > { %v3473_v12 = vadd.f32 %v3419_v44, %v3258_v62  ;;  %3809 = vmatmul.f32.gmra.mxu1 %v7254_v25 }
 0x41b   : > { %v3619_v50 = vpop.f32.mrf.mxu0 }
 0x41c   : > { %3955 = vmatmul.f32.gmra.mxu2 %v7257_v26  ;;  %v7260_v57 = vadd.f32 %v3613_v6, %v3473_v12 }
 0x41d   : > { %4150 = vmatmul.f32.gmra.mxu3 %v4073_v43  ;;  %v4074_v43 = vld [vmem:[#allocation3 + $0xaf] sm:$0xff] }
 0x41e   : > { %7964 = vst [vmem:[#allocation34_spill] sm:$0xff] %v7260_v57  ;;  %4347 = vmatmul.f32.gmra.mxu0 %v7106_v20 }
 0x41f   : > { %v3260_v63 = vpop.f32.mrf.mxu2  ;;  %v7264_v52 = vpop.f32.mrf.mxu1 }
 0x420   : > { %v3422_v56 = vpop.f32.mrf.mxu3  ;;  %v3261_v28 = vadd.f32 %v3260_v63, %v7077_v21 }
 0x422   : > { %v3474_v44 = vadd.f32 %v3422_v56, %v3261_v28  ;;  %3812 = vmatmul.f32.gmra.mxu1 %v7266_v42  ;;  %v7278_v56 = vld [vmem:[#allocation3 + $0x1a8] sm:$0xff] }
 0x423   : > { %v3622_v62 = vpop.f32.mrf.mxu0 }
 0x424   : > { %3958 = vmatmul.f32.gmra.mxu2 %v7269_v14  ;;  %v7272_v20 = vadd.f32 %v3616_v53, %v3474_v44 }
 0x425   : > { %4153 = vmatmul.f32.gmra.mxu3 %v4074_v43 }
 0x426   : > { %7965 = vst [vmem:[#allocation31_spill] sm:$0xff] %v7272_v20  ;;  %4350 = vmatmul.f32.gmra.mxu0 %v7119_v54  ;;  %v4489_v20 = vld [vmem:[#allocation4 + $0x408] sm:$0xff] }
 0x427   : > { %v3263_v21 = vpop.f32.mrf.mxu2  ;;  %v7276_v63 = vpop.f32.mrf.mxu1  ;;  %4518 = vmatpush.msra.mxu1 %v4489_v20  ;;  %v7305_v20 = vld [vmem:[#allocation3 + $0xc9] sm:$0xff] }
 0x428   : > { %v3425_v6 = vpop.f32.mrf.mxu3  ;;  %v3264_v12 = vadd.f32 %v3263_v21, %v7085_v4  ;;  %v7290_v21 = vld [vmem:[#allocation3 + $0x1b0] sm:$0xff] }
 0x42a   : > { %v3475_v28 = vadd.f32 %v3425_v6, %v3264_v12  ;;  %3815 = vmatmul.f32.gmra.mxu1 %v7278_v56 }
 0x42b   : > { %v3625_v57 = vpop.f32.mrf.mxu0 }
 0x42c   : > { %3961 = vmatmul.f32.gmra.mxu2 %v7281_v33  ;;  %v7284_v53 = vadd.f32 %v3619_v50, %v3475_v28 }
 0x42d   : > { %4156 = vmatmul.f32.gmra.mxu3 %v4075_v32  ;;  %v4076_v32 = vld [vmem:[#allocation3 + $0xcf] sm:$0xff] }
 0x42e   : > { %7966 = vst [vmem:[#allocation36_spill] sm:$0xff] %v7284_v53  ;;  %4353 = vmatmul.f32.gmra.mxu0 %v7132_v9 }
 0x42f   : > { %v3266_v54 = vpop.f32.mrf.mxu2  ;;  %v7288_v43 = vpop.f32.mrf.mxu1 }
 0x430   : > { %v3428_v4 = vpop.f32.mrf.mxu3  ;;  %v3267_v44 = vadd.f32 %v3266_v54, %v7093_v7  ;;  %7967 = vst [vmem:[#allocation33_spill] sm:$0xff] %v7288_v43  ;;  %v4077_v43 = vld [vmem:[#allocation3 + $0xe7] sm:$0xff] }
 0x432   : > { %v3476_v6 = vadd.f32 %v3428_v4, %v3267_v44  ;;  %3818 = vmatmul.f32.gmra.mxu1 %v7290_v21  ;;  %v7302_v4 = vld [vmem:[#allocation3 + $0x1c8] sm:$0xff] }
 0x433   : > { %v3628_v12 = vpop.f32.mrf.mxu0 }
 0x434   : > { %3964 = vmatmul.f32.gmra.mxu2 %v7293_v60  ;;  %v7296_v9 = vadd.f32 %v3622_v62, %v3476_v6 }
 0x435   : > { %4159 = vmatmul.f32.gmra.mxu3 %v4076_v32 }
 0x436   : > { %7968 = vst [vmem:[#allocation38_spill] sm:$0xff] %v7296_v9  ;;  %4356 = vmatmul.f32.gmra.mxu0 %v7147_v0  ;;  %v4488_v9 = vld [vmem:[#allocation4 + $0x400] sm:$0xff] }
 0x437   : > { %v3269_v7 = vpop.f32.mrf.mxu2  ;;  %v7300_v54 = vpop.f32.mrf.mxu1  ;;  %4519 = vmatpush.msra.mxu1 %v4488_v9  ;;  %v7329_v9 = vld [vmem:[#allocation3 + $0xe9] sm:$0xff] }
 0x438   : > { %v3431_v50 = vpop.f32.mrf.mxu3  ;;  %v3270_v28 = vadd.f32 %v3269_v7, %v7104_v31  ;;  %7969 = vst [vmem:[#allocation35_spill] sm:$0xff] %v7300_v54  ;;  %v7314_v7 = vld [vmem:[#allocation3 + $0x1d0] sm:$0xff] }
 0x439   : > { %v7317_v54 = vld [vmem:[#allocation3 + $0xd1] sm:$0xff] }
 0x43a   : > { %v3477_v44 = vadd.f32 %v3431_v50, %v3270_v28  ;;  %3821 = vmatmul.f32.gmra.mxu1 %v7302_v4 }
 0x43b   : > { %v3631_v53 = vpop.f32.mrf.mxu0 }
 0x43c   : > { %3967 = vmatmul.f32.gmra.mxu2 %v7305_v20  ;;  %v7308_v62 = vadd.f32 %v3625_v57, %v3477_v44 }
 0x43d   : > { %4162 = vmatmul.f32.gmra.mxu3 %v4077_v43  ;;  %v4078_v43 = vld [vmem:[#allocation3 + $0xef] sm:$0xff] }
 0x43e   : > { %7970 = vst [vmem:[#allocation40_spill] sm:$0xff] %v7308_v62  ;;  %4359 = vmatmul.f32.gmra.mxu0 %v7157_v30 }
 0x43f   : > { %v3272_v0 = vpop.f32.mrf.mxu2  ;;  %v7312_v32 = vpop.f32.mrf.mxu1 }
 0x440   : > { %v3434_v31 = vpop.f32.mrf.mxu3  ;;  %v3273_v6 = vadd.f32 %v3272_v0, %v7117_v2  ;;  %7971 = vst [vmem:[#allocation37_spill] sm:$0xff] %v7312_v32  ;;  %v4079_v32 = vld [vmem:[#allocation3 + $0x107] sm:$0xff] }
 0x442   : > { %v3478_v50 = vadd.f32 %v3434_v31, %v3273_v6  ;;  %3824 = vmatmul.f32.gmra.mxu1 %v7314_v7  ;;  %v7326_v31 = vld [vmem:[#allocation3 + $0x1e8] sm:$0xff] }
 0x443   : > { %v3634_v28 = vpop.f32.mrf.mxu0 }
 0x444   : > { %3970 = vmatmul.f32.gmra.mxu2 %v7317_v54  ;;  %v7320_v30 = vadd.f32 %v3628_v12, %v3478_v50 }
 0x445   : > { %4165 = vmatmul.f32.gmra.mxu3 %v4078_v43 }
 0x446   : > { %7972 = vst [vmem:[#allocation42_spill] sm:$0xff] %v7320_v30  ;;  %4362 = vmatmul.f32.gmra.mxu0 %v7167_v23  ;;  %v7341_v30 = vld [vmem:[#allocation3 + $0xf1] sm:$0xff] }
 0x447   : > { %v3275_v2 = vpop.f32.mrf.mxu2  ;;  %v7324_v0 = vpop.f32.mrf.mxu1 }
 0x448   : > { %v3437_v57 = vpop.f32.mrf.mxu3  ;;  %v3276_v44 = vadd.f32 %v3275_v2, %v7130_v48  ;;  %7973 = vst [vmem:[#allocation39_spill] sm:$0xff] %v7324_v0  ;;  %v7338_v2 = vld [vmem:[#allocation3 + $0x1f0] sm:$0xff] }
 0x449   : > { %v4080_v0 = vld [vmem:[#allocation3 + $0x10f] sm:$0xff] }
 0x44a   : > { %v3479_v6 = vadd.f32 %v3437_v57, %v3276_v44  ;;  %3827 = vmatmul.f32.gmra.mxu1 %v7326_v31 }
 0x44b   : > { %v3637_v62 = vpop.f32.mrf.mxu0 }
 0x44c   : > { %3973 = vmatmul.f32.gmra.mxu2 %v7329_v9  ;;  %v7332_v12 = vadd.f32 %v3631_v53, %v3479_v6 }
 0x44d   : > { %4168 = vmatmul.f32.gmra.mxu3 %v4079_v32 }
 0x44e   : > { %7974 = vst [vmem:[#allocation44_spill] sm:$0xff] %v7332_v12  ;;  %4365 = vmatmul.f32.gmra.mxu0 %v7176_v38  ;;  %v7353_v12 = vld [vmem:[#allocation3 + $0x109] sm:$0xff] }
 0x44f   : > { %v3278_v23 = vpop.f32.mrf.mxu2  ;;  %v7336_v43 = vpop.f32.mrf.mxu1 }
 0x450   : > { %v3440_v48 = vpop.f32.mrf.mxu3  ;;  %v3279_v50 = vadd.f32 %v3278_v23, %v7145_v35  ;;  %7975 = vst [vmem:[#allocation41_spill] sm:$0xff] %v7336_v43  ;;  %v7350_v23 = vld [vmem:[#allocation3 + $0x208] sm:$0xff] }
 0x451   : > { %v4081_v43 = vld [vmem:[#allocation3 + $0x127] sm:$0xff] }
 0x452   : > { %v3480_v57 = vadd.f32 %v3440_v48, %v3279_v50  ;;  %3830 = vmatmul.f32.gmra.mxu1 %v7338_v2 }
 0x453   : > { %v3640_v44 = vpop.f32.mrf.mxu0 }
 0x454   : > { %3976 = vmatmul.f32.gmra.mxu2 %v7341_v30  ;;  %v7344_v53 = vadd.f32 %v3634_v28, %v3480_v57 }
 0x455   : > { %4171 = vmatmul.f32.gmra.mxu3 %v4080_v0 }
 0x456   : > { %7976 = vst [vmem:[#allocation46_spill] sm:$0xff] %v7344_v53  ;;  %4368 = vmatmul.f32.gmra.mxu0 %v7188_v15  ;;  %v4082_v53 = vld [vmem:[#allocation3 + $0x12f] sm:$0xff] }
 0x457   : > { %v3281_v38 = vpop.f32.mrf.mxu2  ;;  %v7348_v6 = vpop.f32.mrf.mxu1 }
 0x458   : > { %v3443_v35 = vpop.f32.mrf.mxu3  ;;  %v3282_v32 = vadd.f32 %v3281_v38, %v7155_v8  ;;  %7977 = vst [vmem:[#allocation43_spill] sm:$0xff] %v7348_v6  ;;  %v7362_v38 = vld [vmem:[#allocation3 + $0x210] sm:$0xff] }
 0x45a   : > { %v3481_v48 = vadd.f32 %v3443_v35, %v3282_v32  ;;  %3833 = vmatmul.f32.gmra.mxu1 %v7350_v23  ;;  %v7365_v32 = vld [vmem:[#allocation3 + $0x111] sm:$0xff] }
 0x45b   : > { %v3643_v50 = vpop.f32.mrf.mxu0 }
 0x45c   : > { %3979 = vmatmul.f32.gmra.mxu2 %v7353_v12  ;;  %v7356_v28 = vadd.f32 %v3637_v62, %v3481_v48 }
 0x45d   : > { %4174 = vmatmul.f32.gmra.mxu3 %v4081_v43 }
 0x45e   : > { %4371 = vmatmul.f32.gmra.mxu0 %v7197_v51 }
 0x45f   : > { %v3284_v15 = vpop.f32.mrf.mxu2  ;;  %v7360_v57 = vpop.f32.mrf.mxu1 }
 0x460   : > { %v3446_v8 = vpop.f32.mrf.mxu3  ;;  %v3285_v0 = vadd.f32 %v3284_v15, %v7165_v40 }
 0x462   : > { %v3482_v35 = vadd.f32 %v3446_v8, %v3285_v0  ;;  %3836 = vmatmul.f32.gmra.mxu1 %v7362_v38  ;;  %v7375_v8 = vld [vmem:[#allocation3 + $0x129] sm:$0xff] }
 0x463   : > { %v4327_v6 = vpop.f32.mrf.mxu0  ;;  %v4083_v0 = vld [vmem:[#allocation3 + $0x147] sm:$0xff] }
 0x464   : > { %3982 = vmatmul.f32.gmra.mxu2 %v7365_v32  ;;  %v7368_v62 = vadd.f32 %v3640_v44, %v3482_v35 }
 0x465   : > { %4177 = vmatmul.f32.gmra.mxu3 %v4082_v53 }
 0x466   : > { %7978 = vst [vmem:[#allocation48_spill] sm:$0xff] %v7368_v62  ;;  %4374 = vmatmul.f32.gmra.mxu0 %v7206_v58  ;;  %v3840_v58 = vadd.f32 %v7186_v47, %v7042_v37  ;;  %v4084_v62 = vld [vmem:[#allocation3 + $0x14f] sm:$0xff]  ;;  %v3841_v37 = vadd.f32 %v7195_v10, %v7050_v5  ;;  %v3842_v5 = vadd.f32 %v7204_v11, %v7058_v16 }
 0x467   : > { %v3287_v51 = vpop.f32.mrf.mxu2  ;;  %v7372_v48 = vpop.f32.mrf.mxu1  ;;  %v3843_v16 = vadd.f32 %v7216_v3, %v7066_v1  ;;  %v3844_v1 = vadd.f32 %v7228_v18, %v7074_v17  ;;  %v3845_v17 = vadd.f32 %v7240_v27, %v7082_v36  ;;  %v3846_v36 = vadd.f32 %v7252_v49, %v7090_v19 }
 0x468   : > { %v3449_v40 = vpop.f32.mrf.mxu3  ;;  %v3288_v43 = vadd.f32 %v3287_v51, %v7174_v29  ;;  %v3847_v19 = vadd.f32 %v7264_v52, %v7100_v59  ;;  %v7472_v52 = vld [vmem:[#allocation3 + $0x1b1] sm:$0xff] }
 0x46a   : > { %v3483_v15 = vadd.f32 %v3449_v40, %v3288_v43  ;;  %4520 = vmatmul.f32.vlgmr.msra.gmra.mxu1 %v7209_v39  ;;  %v7386_v43 = vld [vmem:[#allocation3 + $0x131] sm:$0xff] }
 0x46b   : > { %v4330_v44 = vpop.f32.mrf.mxu0 }
 0x46c   : > { %3985 = vmatmul.f32.gmra.mxu2 %v7375_v8  ;;  %v7378_v53 = vadd.f32 %v3643_v50, %v3483_v15 }
 0x46d   : > { %4180 = vmatmul.f32.gmra.mxu3 %v4083_v0 }
 0x46e   : > { %4377 = vmatmul.f32.gmra.mxu0 %v7218_v61 }
 0x46f   : > { %v3938_v29 = vpop.f32.mrf.mxu2  ;;  %v7383_v40 = vpop.f32.mrf.mxu1 }
 0x470   : > { %v4133_v35 = vpop.f32.mrf.mxu3  ;;  %v4034_v51 = vadd.f32 %v3938_v29, %v3840_v58  ;;  %v7397_v29 = vld [vmem:[#allocation3 + $0x149] sm:$0xff] }
 0x472   : > { %v4229_v39 = vadd.f32 %v4133_v35, %v4034_v51  ;;  %4523 = vmatmul.f32.gmra.mxu1 %v7221_v45  ;;  %v4085_v35 = vld [vmem:[#allocation3 + $0x167] sm:$0xff] }
 0x473   : > { %v4333_v15 = vpop.f32.mrf.mxu0 }
 0x474   : > { %3988 = vmatmul.f32.gmra.mxu2 %v7386_v43  ;;  %v7389_v50 = vadd.f32 %v4327_v6, %v4229_v39 }
 0x475   : > { %4183 = vmatmul.f32.gmra.mxu3 %v4084_v62 }
 0x476   : > { %4380 = vmatmul.f32.gmra.mxu0 %v7230_v46 }
 0x477   : > { %v3941_v47 = vpop.f32.mrf.mxu2  ;;  %v7394_v58 = vpop.f32.mrf.mxu1 }
 0x478   : > { %v4136_v61 = vpop.f32.mrf.mxu3  ;;  %v4035_v0 = vadd.f32 %v3941_v47, %v3841_v37  ;;  %v7408_v37 = vld [vmem:[#allocation3 + $0x151] sm:$0xff] }
 0x479   : > { %v4086_v47 = vld [vmem:[#allocation3 + $0x16f] sm:$0xff] }
 0x47a   : > { %v4230_v45 = vadd.f32 %v4136_v61, %v4035_v0  ;;  %4526 = vmatmul.f32.gmra.mxu1 %v7233_v24 }
 0x47b   : > { %v4336_v39 = vpop.f32.mrf.mxu0 }
 0x47c   : > { %3991 = vmatmul.f32.gmra.mxu2 %v7397_v29  ;;  %v7400_v6 = vadd.f32 %v4330_v44, %v4230_v45 }
 0x47d   : > { %4186 = vmatmul.f32.gmra.mxu3 %v4085_v35  ;;  %v4087_v35 = vld [vmem:[#allocation3 + $0x187] sm:$0xff] }
 0x47e   : > { %4383 = vmatmul.f32.gmra.mxu0 %v7242_v55 }
 0x47f   : > { %v3944_v10 = vpop.f32.mrf.mxu2  ;;  %v7405_v51 = vpop.f32.mrf.mxu1 }
 0x480   : > { %v4139_v46 = vpop.f32.mrf.mxu3  ;;  %v4036_v62 = vadd.f32 %v3944_v10, %v3842_v5 }
 0x482   : > { %v4231_v24 = vadd.f32 %v4139_v46, %v4036_v62  ;;  %4529 = vmatmul.f32.gmra.mxu1 %v7245_v34  ;;  %v7419_v34 = vld [vmem:[#allocation3 + $0x169] sm:$0xff]  ;;  %v7430_v62 = vld [vmem:[#allocation3 + $0x171] sm:$0xff] }
 0x483   : > { %v4339_v5 = vpop.f32.mrf.mxu0 }
 0x484   : > { %3994 = vmatmul.f32.gmra.mxu2 %v7408_v37  ;;  %v7411_v44 = vadd.f32 %v4333_v15, %v4231_v24  ;;  %v4088_v24 = vld [vmem:[#allocation3 + $0x18f] sm:$0xff] }
 0x485   : > { %4189 = vmatmul.f32.gmra.mxu3 %v4086_v47 }
 0x486   : > { %4386 = vmatmul.f32.gmra.mxu0 %v7254_v25 }
 0x487   : > { %v3947_v11 = vpop.f32.mrf.mxu2  ;;  %v7416_v0 = vpop.f32.mrf.mxu1 }
 0x488   : > { %v4142_v55 = vpop.f32.mrf.mxu3  ;;  %v4037_v61 = vadd.f32 %v3947_v11, %v3843_v16 }
 0x48a   : > { %v4232_v45 = vadd.f32 %v4142_v55, %v4037_v61  ;;  %4532 = vmatmul.f32.gmra.mxu1 %v7257_v26  ;;  %v7441_v55 = vld [vmem:[#allocation3 + $0x189] sm:$0xff] }
 0x48b   : > { %v4342_v18 = vpop.f32.mrf.mxu0  ;;  %v4089_v61 = vld [vmem:[#allocation3 + $0x1a7] sm:$0xff] }
 0x48c   : > { %3997 = vmatmul.f32.gmra.mxu2 %v7419_v34  ;;  %v7422_v15 = vadd.f32 %v4336_v39, %v4232_v45 }
 0x48d   : > { %4192 = vmatmul.f32.gmra.mxu3 %v4087_v35 }
 0x48e   : > { %4389 = vmatmul.f32.gmra.mxu0 %v7266_v42 }
 0x48f   : > { %v3950_v3 = vpop.f32.mrf.mxu2  ;;  %v7427_v46 = vpop.f32.mrf.mxu1 }
 0x490   : > { %v4145_v25 = vpop.f32.mrf.mxu3  ;;  %v4038_v10 = vadd.f32 %v3950_v3, %v3844_v1  ;;  %v7452_v3 = vld [vmem:[#allocation3 + $0x191] sm:$0xff] }
 0x492   : > { %v4233_v26 = vadd.f32 %v4145_v25, %v4038_v10  ;;  %4535 = vmatmul.f32.gmra.mxu1 %v7269_v14  ;;  %v4090_v25 = vld [vmem:[#allocation3 + $0x1af] sm:$0xff] }
 0x493   : > { %v4345_v1 = vpop.f32.mrf.mxu0 }
 0x494   : > { %4000 = vmatmul.f32.gmra.mxu2 %v7430_v62  ;;  %v7433_v39 = vadd.f32 %v4339_v5, %v4233_v26 }
 0x495   : > { %4195 = vmatmul.f32.gmra.mxu3 %v4088_v24 }
 0x496   : > { %4392 = vmatmul.f32.gmra.mxu0 %v7278_v56 }
 0x497   : > { %v3953_v42 = vpop.f32.mrf.mxu2  ;;  %v7438_v11 = vpop.f32.mrf.mxu1 }
 0x498   : > { %v4148_v47 = vpop.f32.mrf.mxu3  ;;  %v4039_v16 = vadd.f32 %v3953_v42, %v3845_v17  ;;  %v4091_v42 = vld [vmem:[#allocation3 + $0x1c7] sm:$0xff] }
 0x49a   : > { %v4234_v14 = vadd.f32 %v4148_v47, %v4039_v16  ;;  %4538 = vmatmul.f32.gmra.mxu1 %v7281_v33  ;;  %v7479_v16 = vld [vmem:[#allocation3 + $0x1c9] sm:$0xff] }
 0x49c   : > { %4003 = vmatmul.f32.gmra.mxu2 %v7441_v55  ;;  %v7444_v45 = vadd.f32 %v4342_v18, %v4234_v14  ;;  %v7463_v18 = vld [vmem:[#allocation3 + $0x1a9] sm:$0xff] }
 0x49d   : > { %4198 = vmatmul.f32.gmra.mxu3 %v4089_v61  ;;  %v4093_v14 = vld [vmem:[#allocation3 + $0x1e7] sm:$0xff]  ;;  %v4094_v61 = vld [vmem:[#allocation3 + $0x1ef] sm:$0xff] }
 0x49e   : > { %4395 = vmatmul.f32.gmra.mxu0 %v7290_v21 }
 0x49f   : > { %v3956_v27 = vpop.f32.mrf.mxu2  ;;  %v7449_v5 = vpop.f32.mrf.mxu1 }
 0x4a0   : > { %v4151_v56 = vpop.f32.mrf.mxu3  ;;  %v4040_v35 = vadd.f32 %v3956_v27, %v3846_v36  ;;  %v4095_v36 = vld [vmem:[#allocation3 + $0x207] sm:$0xff] }
 0x4a1   : > { %v4097_v27 = vld [vmem:[#allocation3 + $0x227] sm:$0xff] }
 0x4a2   : > { %v4235_v33 = vadd.f32 %v4151_v56, %v4040_v35  ;;  %4541 = vmatmul.f32.gmra.mxu1 %v7293_v60  ;;  %v4348_v60 = vpop.f32.mrf.mxu0  ;;  %v7504_v56 = vld [vmem:[#allocation3 + $0x209] sm:$0xff] }
 0x4a4   : > { %4006 = vmatmul.f32.gmra.mxu2 %v7452_v3  ;;  %v7455_v10 = vadd.f32 %v4345_v1, %v4235_v33 }
 0x4a5   : > { %4201 = vmatmul.f32.gmra.mxu3 %v4090_v25 }
 0x4a6   : > { %4398 = vmatmul.f32.gmra.mxu0 %v7302_v4  ;;  %v4092_v4 = vld [vmem:[#allocation3 + $0x1cf] sm:$0xff] }
 0x4a7   : > { %v3959_v49 = vpop.f32.mrf.mxu2  ;;  %v7460_v26 = vpop.f32.mrf.mxu1 }
 0x4a8   : > { %v4041_v21 = vadd.f32 %v3959_v49, %v3847_v19  ;;  %v4154_v24 = vpop.f32.mrf.mxu3 }
 0x4aa   : > { %v4236_v17 = vadd.f32 %v4154_v24, %v4041_v21  ;;  %4544 = vmatmul.f32.gmra.mxu1 %v7305_v20  ;;  %v7535_v24 = vpop.f32.mrf.mxu0 }
 0x4ac   : > { %4009 = vmatmul.f32.gmra.mxu2 %v7463_v18  ;;  %v7466_v47 = vadd.f32 %v4348_v60, %v4236_v17 }
 0x4ad   : > { %4204 = vmatmul.f32.gmra.mxu3 %v4091_v42 }
 0x4ae   : > { %4401 = vmatmul.f32.gmra.mxu0 %v7314_v7  ;;  %v7486_v7 = vld [vmem:[#allocation3 + $0x1d1] sm:$0xff] }
 0x4af   : > { %v7469_v59 = vpop.f32.mrf.mxu1  ;;  %v7525_v25 = vpop.f32.mrf.mxu2 }
 0x4b0   : > { %v7533_v21 = vpop.f32.mrf.mxu3 }
 0x4b2   : > { %4547 = vmatmul.f32.gmra.mxu1 %v7317_v54 }
 0x4b4   : > { %4012 = vmatmul.f32.gmra.mxu2 %v7472_v52 }
 0x4b5   : > { %4207 = vmatmul.f32.gmra.mxu3 %v4092_v4  ;;  %v5630_v4 = vmov 1966171168  }
 0x4b6   : > { %4404 = vmatmul.f32.gmra.mxu0 %v7326_v31 }
 0x4b7   : > { %v7476_v20 = vpop.f32.mrf.mxu1  ;;  %v7538_v17 = vpop.f32.mrf.mxu2 }
 0x4ba   : > { %4550 = vmatmul.f32.gmra.mxu1 %v7329_v9  ;;  %v7493_v9 = vld [vmem:[#allocation3 + $0x1e9] sm:$0xff] }
 0x4bc   : > { %4015 = vmatmul.f32.gmra.mxu2 %v7479_v16 }
 0x4bd   : > { %4210 = vmatmul.f32.gmra.mxu3 %v4093_v14  ;;  %v4766_v14 = vunpack.c.l.s4 %v5630_v4 }
 0x4be   : > { %4407 = vmatmul.f32.gmra.mxu0 %v7338_v2  ;;  %v4096_v2 = vld [vmem:[#allocation3 + $0x20f] sm:$0xff] }
 0x4bf   : > { %v7483_v54 = vpop.f32.mrf.mxu1 }
 0x4c2   : > { %4553 = vmatmul.f32.gmra.mxu1 %v7341_v30 }
 0x4c4   : > { %4018 = vmatmul.f32.gmra.mxu2 %v7486_v7 }
 0x4c5   : > { %4213 = vmatmul.f32.gmra.mxu3 %v4094_v61  ;;  %v7543_v61 = vunpack.c.0.s8 %v4766_v14 }
 0x4c6   : > { %4410 = vmatmul.f32.gmra.mxu0 %v7350_v23  ;;  %v5495_v23 = vld [vmem:[#allocation3] sm:$0xff] }
 0x4c7   : > { %v7490_v31 = vpop.f32.mrf.mxu1 }
 0x4ca   : > { %4556 = vmatmul.f32.gmra.mxu1 %v7353_v12 }
 0x4cc   : > { %4021 = vmatmul.f32.gmra.mxu2 %v7493_v9 }
 0x4cd   : > { %4216 = vmatmul.f32.gmra.mxu3 %v4095_v36  ;;  %v7545_v36 = vpop.f32.mrf.mxu3 }
 0x4ce   : > { %4413 = vmatmul.f32.gmra.mxu0 %v7362_v38 }
 0x4cf   : > { %v7497_v30 = vpop.f32.mrf.mxu1 }
 0x4d2   : > { %4559 = vmatmul.f32.gmra.mxu1 %v7365_v32  ;;  %v4098_v32 = vld [vmem:[#allocation3 + $0x22f] sm:$0xff] }
 0x4d4   : > { %4024 = vmatmul.f32.gmra.mxu2 %v7179_v41  ;;  %v7510_v41 = vld [vmem:[#allocation3 + $0x211] sm:$0xff] }
 0x4d5   : > { %4219 = vmatmul.f32.gmra.mxu3 %v4096_v2 }
 0x4d6   : > { %4416 = vmatmul.f32.gmra.mxu0 %v5495_v23 }
 0x4d7   : > { %v7501_v12 = vpop.f32.mrf.mxu1 }
 0x4da   : > { %4562 = vmatmul.f32.gmra.mxu1 %v7375_v8  ;;  %v7519_v8 = vld [vmem:[%s7823_s4] ss:$0 sm:$0xff] }
 0x4dc   : > { %4027 = vmatmul.f32.gmra.mxu2 %v7504_v56 }
 0x4dd   : > { %4222 = vmatmul.f32.gmra.mxu3 %v4097_v27  ;;  %v7548_v27 = vpop.f32.mrf.mxu0 }
 0x4de   : > { %4419 = vmatmul.f32.gmra.mxu0 %v5495_v23 }
 0x4df   : > { %v7507_v38 = vpop.f32.mrf.mxu1 }
 0x4e2   : > { %4565 = vmatmul.f32.gmra.mxu1 %v7386_v43 }
 0x4e4   : > { %4030 = vmatmul.f32.gmra.mxu2 %v7510_v41 }
 0x4e5   : > { %4225 = vmatmul.f32.gmra.mxu3 %v4098_v32 }
 0x4e7   : > { %v4521_v35 = vpop.f32.mrf.mxu1 }
 0x4e8   : > { %v4617_v1 = vadd.f32 %v4521_v35, %v7389_v50  ;;  %v7552_v35 = vpop.f32.mrf.mxu2 }
 0x4ea   : > { %4568 = vmatmul.f32.gmra.mxu1 %v7397_v29  ;;  %v4653_v43 = vadd.f32 %v7519_v8, %v4617_v1 }
 0x4ec   : > { %v4685_v33 = vmax.f32 %v4653_v43, 0.0 }
 0x4ee   : > { %4717 = vst [vmem:[%s7527_s17] sm:$0xff] %v4685_v33 }
 0x4ef   : > { %v4524_v19 = vpop.f32.mrf.mxu1 }
 0x4f0   : > { %v4618_v49 = vadd.f32 %v4524_v19, %v7400_v6  ;;  %v7565_v14 = vpop.f32.mrf.mxu2 }
 0x4f2   : > { %4571 = vmatmul.f32.gmra.mxu1 %v7408_v37  ;;  %v4654_v50 = vadd.f32 %v7519_v8, %v4618_v49 }
 0x4f4   : > { %v4686_v29 = vmax.f32 %v4654_v50, 0.0 }
 0x4f6   : > { %4718 = vst [vmem:[%s7527_s17 + $0x8] sm:$0xff] %v4686_v29 }
 0x4f7   : > { %v4527_v60 = vpop.f32.mrf.mxu1 }
 0x4f8   : > { %v4619_v42 = vadd.f32 %v4527_v60, %v7411_v44 }
 0x4fa   : > { %4574 = vmatmul.f32.gmra.mxu1 %v7419_v34  ;;  %v4655_v6 = vadd.f32 %v7519_v8, %v4619_v42 }
 0x4fc   : > { %v4687_v37 = vmax.f32 %v4655_v6, 0.0 }
 0x4fe   : > { %4719 = vst [vmem:[%s7527_s17 + $0x10] sm:$0xff] %v4687_v37  ;;  %v4749_v2 = vmax.f32 %v4685_v33, %v4687_v37  ;;  %v7556_v33 = vpop.f32.mrf.mxu3 }
 0x4ff   : > { %v4530_v23 = vpop.f32.mrf.mxu1 }
 0x500   : > { %v4768_v32 = vperm.slane %v4749_v2, %v7543_v61  ;;  %v4620_v44 = vadd.f32 %v4530_v23, %v7422_v15 }
 0x502   : > { %4577 = vmatmul.f32.gmra.mxu1 %v7430_v62  ;;  %v4845_v34 = vrot.slane %v4768_v32, 4  ;;  %v4656_v1 = vadd.f32 %v7519_v8, %v4620_v44  ;;  %v7562_v62 = vpop.f32.mrf.mxu0  ;;  %v7576_v44 = vpop.f32.mrf.mxu2 }
 0x504   : > { %v4877_v43 = vmax.f32 %v4768_v32, %v4845_v34  ;;  %v4688_v19 = vmax.f32 %v4656_v1, 0.0 }
 0x506   : > { %4909 = vst [vmem:[#allocation1] ss:$2 sm:$0xff] %v4877_v43  ;;  %v4750_v49 = vmax.f32 %v4686_v29, %v4688_v19  ;;  %v7569_v23 = vpop.f32.mrf.mxu3 }
 0x507   : > { %4720 = vst [vmem:[%s7527_s17 + $0x18] sm:$0xff] %v4688_v19  ;;  %v4533_v50 = vpop.f32.mrf.mxu1  ;;  %v3848_v19 = vadd.f32 %v7276_v63, %v7113_v22 }
 0x508   : > { %v4772_v60 = vperm.slane %v4750_v49, %v7543_v61  ;;  %v4621_v15 = vadd.f32 %v4533_v50, %v7433_v39 }
 0x509   : > { %v4042_v50 = vadd.f32 %v7525_v25, %v3848_v19  ;;  %v7979_v25 = vld [vmem:[#allocation33_spill] sm:$0xff] }
 0x50a   : > { %4580 = vmatmul.f32.gmra.mxu1 %v7441_v55  ;;  %v4846_v42 = vrot.slane %v4772_v60, 4  ;;  %v4657_v4 = vadd.f32 %v7519_v8, %v4621_v15  ;;  %v7574_v55 = vpop.f32.mrf.mxu0 }
 0x50c   : > { %v4878_v29 = vmax.f32 %v4772_v60, %v4846_v42  ;;  %v4689_v6 = vmax.f32 %v4657_v4, 0.0  ;;  %v7593_v42 = vpop.f32.mrf.mxu2 }
 0x50e   : > { %4911 = vst [vmem:[#allocation1 + $0x1] ss:$2 sm:$0xff] %v4878_v29  ;;  %v7585_v43 = vpop.f32.mrf.mxu3  ;;  %v4237_v29 = vadd.f32 %v7533_v21, %v4042_v50  ;;  %v7981_v50 = vld [vmem:[#allocation35_spill] sm:$0xff] }
 0x50f   : > { %4721 = vst [vmem:[%s7527_s17 + $0x20] sm:$0xff] %v4689_v6  ;;  %v4536_v37 = vpop.f32.mrf.mxu1 }
 0x510   : > { %v4622_v2 = vadd.f32 %v4536_v37, %v7444_v45  ;;  %v3849_v37 = vadd.f32 %v7979_v25, %v7126_v13 }
 0x512   : > { %4583 = vmatmul.f32.gmra.mxu1 %v7452_v3  ;;  %v4658_v39 = vadd.f32 %v7519_v8, %v4622_v2  ;;  %v7590_v60 = vpop.f32.mrf.mxu0 }
 0x514   : > { %v4690_v32 = vmax.f32 %v4658_v39, 0.0  ;;  %v7610_v19 = vpop.f32.mrf.mxu2 }
 0x515   : > { %v4912_v34 = vld.sshfl [vmem:[#allocation1] sm:$0xff pattern:$0x75316420] }
 0x516   : > { %4722 = vst [vmem:[%s7527_s17 + $0x28] sm:$0xff] %v4690_v32  ;;  %v7602_v39 = vpop.f32.mrf.mxu3 }
 0x517   : > { %v4539_v1 = vpop.f32.mrf.mxu1  ;;  %4948 = vst [vmem:[%s7579_s19] sm:$0xff] %v4912_v34  ;;  %v4043_v34 = vadd.f32 %v7538_v17, %v3849_v37 }
 0x518   : > { %v4623_v45 = vadd.f32 %v4539_v1, %v7455_v10 }
 0x519   : > { %v4238_v13 = vadd.f32 %v7545_v36, %v4043_v34 }
 0x51a   : > { %4586 = vmatmul.f32.gmra.mxu1 %v7463_v18  ;;  %v4659_v3 = vadd.f32 %v7519_v8, %v4623_v45  ;;  %v7607_v21 = vpop.f32.mrf.mxu0 }
 0x51c   : > { %v4691_v49 = vmax.f32 %v4659_v3, 0.0  ;;  %v7627_v37 = vpop.f32.mrf.mxu2 }
 0x51e   : > { %4723 = vst [vmem:[%s7527_s17 + $0x30] sm:$0xff] %v4691_v49  ;;  %v4751_v15 = vmax.f32 %v4689_v6, %v4691_v49 }
 0x51f   : > { %v4542_v10 = vpop.f32.mrf.mxu1 }
 0x520   : > { %v4776_v18 = vperm.slane %v4751_v15, %v7543_v61  ;;  %v4624_v4 = vadd.f32 %v4542_v10, %v7466_v47  ;;  %v4431_v47 = vadd.f32 %v7535_v24, %v4237_v29  ;;  %v7619_v29 = vpop.f32.mrf.mxu3 }
 0x522   : > { %4589 = vmatmul.f32.gmra.mxu1 %v7472_v52  ;;  %v4847_v22 = vrot.slane %v4776_v18, 4  ;;  %v4660_v63 = vadd.f32 %v7519_v8, %v4624_v4  ;;  %v4432_v4 = vadd.f32 %v7548_v27, %v4238_v13  ;;  %v7984_v13 = vld [vmem:[#allocation26_spill] sm:$0xff] }
 0x524   : > { %v4879_v2 = vmax.f32 %v4776_v18, %v4847_v22  ;;  %v4692_v6 = vmax.f32 %v4660_v63, 0.0  ;;  %v7624_v63 = vpop.f32.mrf.mxu0 }
 0x526   : > { %4914 = vst [vmem:[#allocation1 + $0x10] ss:$2 sm:$0xff] %v4879_v2  ;;  %v4752_v1 = vmax.f32 %v4690_v32, %v4692_v6  ;;  %v7980_v32 = vld [vmem:[#allocation24_spill] sm:$0xff]  ;;  %v7983_v2 = vld [vmem:[#allocation37_spill] sm:$0xff] }
 0x527   : > { %4724 = vst [vmem:[%s7527_s17 + $0x38] sm:$0xff] %v4692_v6  ;;  %v4545_v52 = vpop.f32.mrf.mxu1  ;;  %v3850_v24 = vadd.f32 %v7981_v50, %v7980_v32  ;;  %v7644_v50 = vpop.f32.mrf.mxu2 }
 0x528   : > { %v4780_v45 = vperm.slane %v4752_v1, %v7543_v61  ;;  %v4625_v3 = vadd.f32 %v4545_v52, %v4431_v47  ;;  %v7635_v52 = vpop.f32.mrf.mxu3 }
 0x529   : > { %v4044_v18 = vadd.f32 %v7552_v35, %v3850_v24  ;;  %v7982_v35 = vld [vmem:[#allocation51_spill] sm:$0xff] }
 0x52a   : > { %4592 = vmatmul.f32.gmra.mxu1 %v7479_v16  ;;  %v4848_v49 = vrot.slane %v4780_v45, 4  ;;  %v4661_v17 = vadd.f32 %v7519_v8, %v4625_v3  ;;  %v3851_v6 = vadd.f32 %v7983_v2, %v7982_v35  ;;  %v7986_v35 = vld [vmem:[#allocation22_spill] sm:$0xff]  ;;  %v7987_v2 = vld [vmem:[#allocation41_spill] sm:$0xff] }
 0x52b   : > { %v4239_v22 = vadd.f32 %v7556_v33, %v4044_v18 }
 0x52c   : > { %v4880_v15 = vmax.f32 %v4780_v45, %v4848_v49  ;;  %v4693_v10 = vmax.f32 %v4661_v17, 0.0  ;;  %v4045_v1 = vadd.f32 %v7565_v14, %v3851_v6  ;;  %v7985_v49 = vld [vmem:[#allocation39_spill] sm:$0xff]  ;;  %v7642_v32 = vpop.f32.mrf.mxu0 }
 0x52d   : > { %v4433_v47 = vadd.f32 %v7562_v62, %v4239_v22  ;;  %v3852_v17 = vadd.f32 %v7985_v49, %v7984_v13  ;;  %v7988_v49 = vld [vmem:[#allocation23_spill] sm:$0xff] }
 0x52e   : > { %4916 = vst [vmem:[#allocation1 + $0x11] ss:$2 sm:$0xff] %v4880_v15  ;;  %v4240_v45 = vadd.f32 %v7569_v23, %v4045_v1 }
 0x52f   : > { %4725 = vst [vmem:[%s7527_s17 + $0x40] sm:$0xff] %v4693_v10  ;;  %v4548_v16 = vpop.f32.mrf.mxu1  ;;  %v4046_v62 = vadd.f32 %v7576_v44, %v3852_v17  ;;  %v3853_v44 = vadd.f32 %v7987_v2, %v7986_v35  ;;  %v7989_v17 = vld [vmem:[#allocation43_spill] sm:$0xff] }
 0x530   : > { %v4626_v36 = vadd.f32 %v4548_v16, %v4432_v4  ;;  %v4434_v15 = vadd.f32 %v7574_v55, %v4240_v45  ;;  %v4482_v4 = vld [vmem:[#allocation3 + $0x1f1] sm:$0xff]  ;;  %v4485_v2 = vld [vmem:[#allocation3 + $0x229] sm:$0xff] }
 0x531   : > { %v4241_v16 = vadd.f32 %v7585_v43, %v4046_v62  ;;  %v4047_v55 = vadd.f32 %v7593_v42, %v3853_v44 }
 0x532   : > { %4595 = vmatmul.f32.gmra.mxu1 %v7486_v7  ;;  %v4662_v25 = vadd.f32 %v7519_v8, %v4626_v36 }
 0x534   : > { %v4694_v27 = vmax.f32 %v4662_v25, 0.0  ;;  %v4181_v25 = vpop.f32.mrf.mxu3 }
 0x535   : > { %v4917_v34 = vld.sshfl [vmem:[#allocation1 + $0x10] sm:$0xff pattern:$0x75316420] }
 0x536   : > { %4726 = vst [vmem:[%s7527_s17 + $0x48] sm:$0xff] %v4694_v27 }
 0x537   : > { %v4551_v7 = vpop.f32.mrf.mxu1  ;;  %4949 = vst [vmem:[%s7579_s19 + $0x8] sm:$0xff] %v4917_v34  ;;  %v7655_v34 = vpop.f32.mrf.mxu0 }
 0x538   : > { %v4627_v33 = vadd.f32 %v4551_v7, %v4433_v47  ;;  %v4435_v47 = vadd.f32 %v7590_v60, %v4241_v16  ;;  %v3989_v7 = vpop.f32.mrf.mxu2  ;;  %v7990_v16 = vld [vmem:[#allocation28_spill] sm:$0xff] }
 0x53a   : > { %4598 = vmatmul.f32.gmra.mxu1 %v7493_v9  ;;  %v4663_v3 = vadd.f32 %v7519_v8, %v4627_v33 }
 0x53c   : > { %v4695_v14 = vmax.f32 %v4663_v3, 0.0  ;;  %v4242_v3 = vadd.f32 %v7602_v39, %v4047_v55  ;;  %v4184_v60 = vpop.f32.mrf.mxu3 }
 0x53e   : > { %4727 = vst [vmem:[%s7527_s17 + $0x50] sm:$0xff] %v4695_v14  ;;  %v4753_v24 = vmax.f32 %v4693_v10, %v4695_v14  ;;  %v3854_v14 = vadd.f32 %v7989_v17, %v7988_v49 }
 0x53f   : > { %v4554_v18 = vpop.f32.mrf.mxu1 }
 0x540   : > { %v4784_v9 = vperm.slane %v4753_v24, %v7543_v61  ;;  %v4628_v23 = vadd.f32 %v4554_v18, %v4434_v15  ;;  %v4048_v24 = vadd.f32 %v7610_v19, %v3854_v14  ;;  %v4436_v15 = vadd.f32 %v7607_v21, %v4242_v3 }
 0x542   : > { %4601 = vmatmul.f32.gmra.mxu1 %v4482_v4  ;;  %v4849_v36 = vrot.slane %v4784_v9, 4  ;;  %v4664_v22 = vadd.f32 %v7519_v8, %v4628_v23  ;;  %v4243_v23 = vadd.f32 %v7619_v29, %v4048_v24 }
 0x544   : > { %v4881_v6 = vmax.f32 %v4784_v9, %v4849_v36  ;;  %v4696_v10 = vmax.f32 %v4664_v22, 0.0  ;;  %v3992_v9 = vpop.f32.mrf.mxu2  ;;  %v3855_v36 = vadd.f32 %v7360_v57, %v7990_v16  ;;  %v4437_v21 = vadd.f32 %v7624_v63, %v4243_v23  ;;  %v4187_v44 = vpop.f32.mrf.mxu3 }
 0x546   : > { %4919 = vst [vmem:[#allocation1 + $0x20] ss:$2 sm:$0xff] %v4881_v6  ;;  %v4754_v1 = vmax.f32 %v4694_v27, %v4696_v10  ;;  %v4049_v35 = vadd.f32 %v7627_v37, %v3855_v36 }
 0x547   : > { %4728 = vst [vmem:[%s7527_s17 + $0x58] sm:$0xff] %v4696_v10  ;;  %v4557_v43 = vpop.f32.mrf.mxu1 }
 0x548   : > { %v4788_v33 = vperm.slane %v4754_v1, %v7543_v61  ;;  %v4629_v45 = vadd.f32 %v4557_v43, %v4435_v47  ;;  %v4244_v29 = vadd.f32 %v7635_v52, %v4049_v35  ;;  %v7991_v1 = vld [vmem:[#allocation25_spill] sm:$0xff]  ;;  %v7993_v35 = vld [vmem:[#allocation27_spill] sm:$0xff] }
 0x549   : > { %v3856_v47 = vadd.f32 %v7372_v48, %v7991_v1  ;;  %v7992_v48 = vld [vmem:[#allocation30_spill] sm:$0xff] }
 0x54a   : > { %4604 = vmatmul.f32.gmra.mxu1 %v7504_v56  ;;  %v4850_v13 = vrot.slane %v4788_v33, 4  ;;  %v4665_v42 = vadd.f32 %v7519_v8, %v4629_v45  ;;  %v4378_v56 = vpop.f32.mrf.mxu0  ;;  %v4486_v45 = vld [vmem:[#allocation3 + $0x231] sm:$0xff] }
 0x54b   : > { %v4050_v43 = vadd.f32 %v7644_v50, %v3856_v47  ;;  %v7994_v47 = vld [vmem:[#allocation32_spill] sm:$0xff] }
 0x54c   : > { %v4882_v27 = vmax.f32 %v4788_v33, %v4850_v13  ;;  %v4697_v62 = vmax.f32 %v4665_v42, 0.0  ;;  %v3995_v57 = vpop.f32.mrf.mxu2  ;;  %v4438_v33 = vadd.f32 %v7642_v32, %v4244_v29  ;;  %v4190_v42 = vpop.f32.mrf.mxu3 }
 0x54d   : > { %v4245_v49 = vadd.f32 %v4181_v25, %v4050_v43 }
 0x54e   : > { %4921 = vst [vmem:[#allocation1 + $0x21] ss:$2 sm:$0xff] %v4882_v27  ;;  %v3857_v27 = vadd.f32 %v7383_v40, %v7992_v48 }
 0x54f   : > { %4729 = vst [vmem:[%s7527_s17 + $0x60] sm:$0xff] %v4697_v62  ;;  %v4560_v18 = vpop.f32.mrf.mxu1 }
 0x550   : > { %v4630_v39 = vadd.f32 %v4560_v18, %v4436_v15  ;;  %v4051_v32 = vadd.f32 %v3989_v7, %v3857_v27 }
 0x552   : > { %4607 = vmatmul.f32.gmra.mxu1 %v7510_v41  ;;  %v4666_v4 = vadd.f32 %v7519_v8, %v4630_v39  ;;  %v4381_v10 = vpop.f32.mrf.mxu0  ;;  %v4439_v39 = vadd.f32 %v7655_v34, %v4245_v49  ;;  %v4246_v16 = vadd.f32 %v4184_v60, %v4051_v32  ;;  %v7995_v49 = vld [vmem:[#allocation29_spill] sm:$0xff] }
 0x554   : > { %v4698_v22 = vmax.f32 %v4666_v4, 0.0  ;;  %v3998_v15 = vpop.f32.mrf.mxu2  ;;  %v4193_v40 = vpop.f32.mrf.mxu3  ;;  %v4440_v34 = vadd.f32 %v4378_v56, %v4246_v16 }
 0x555   : > { %v4922_v19 = vld.sshfl [vmem:[#allocation1 + $0x20] sm:$0xff pattern:$0x75316420] }
 0x556   : > { %4730 = vst [vmem:[%s7527_s17 + $0x68] sm:$0xff] %v4698_v22 }
 0x557   : > { %v4563_v6 = vpop.f32.mrf.mxu1  ;;  %4950 = vst [vmem:[%s7579_s19 + $0x10] sm:$0xff] %v4922_v19 }
 0x558   : > { %v4631_v41 = vadd.f32 %v4563_v6, %v4437_v21  ;;  %v3858_v21 = vadd.f32 %v7394_v58, %v7993_v35 }
 0x55a   : > { %4610 = vmatmul.f32.gmra.mxu1 %v4485_v2  ;;  %v4667_v55 = vadd.f32 %v7519_v8, %v4631_v41  ;;  %v4384_v50 = vpop.f32.mrf.mxu0 }
 0x55c   : > { %v4699_v37 = vmax.f32 %v4667_v55, 0.0  ;;  %v4001_v41 = vpop.f32.mrf.mxu2  ;;  %v4196_v58 = vpop.f32.mrf.mxu3 }
 0x55e   : > { %4731 = vst [vmem:[%s7527_s17 + $0x70] sm:$0xff] %v4699_v37  ;;  %v4755_v63 = vmax.f32 %v4697_v62, %v4699_v37  ;;  %v3859_v37 = vadd.f32 %v7405_v51, %v7994_v47 }
 0x55f   : > { %v4566_v3 = vpop.f32.mrf.mxu1 }
 0x560   : > { %v4792_v13 = vperm.slane %v4755_v63, %v7543_v61  ;;  %v4632_v52 = vadd.f32 %v4566_v3, %v4438_v33  ;;  %v4053_v33 = vadd.f32 %v3995_v57, %v3859_v37 }
 0x562   : > { %4613 = vmatmul.f32.gmra.mxu1 %v4486_v45  ;;  %v4851_v17 = vrot.slane %v4792_v13, 4  ;;  %v4668_v14 = vadd.f32 %v7519_v8, %v4632_v52  ;;  %v4387_v6 = vpop.f32.mrf.mxu0  ;;  %v4248_v52 = vadd.f32 %v4190_v42, %v4053_v33  ;;  %v7998_v33 = vld [vmem:[#allocation36_spill] sm:$0xff] }
 0x564   : > { %v4883_v24 = vmax.f32 %v4792_v13, %v4851_v17  ;;  %v4700_v62 = vmax.f32 %v4668_v14, 0.0  ;;  %v4004_v13 = vpop.f32.mrf.mxu2  ;;  %v3860_v17 = vadd.f32 %v7416_v0, %v7995_v49  ;;  %v4442_v27 = vadd.f32 %v4384_v50, %v4248_v52 }
 0x566   : > { %4924 = vst [vmem:[#allocation1 + $0x30] ss:$2 sm:$0xff] %v4883_v24  ;;  %v4756_v18 = vmax.f32 %v4698_v22, %v4700_v62  ;;  %v4052_v22 = vadd.f32 %v3992_v9, %v3858_v21  ;;  %v4054_v51 = vadd.f32 %v3998_v15, %v3860_v17  ;;  %v4199_v24 = vpop.f32.mrf.mxu3 }
 0x567   : > { %4732 = vst [vmem:[%s7527_s17 + $0x78] sm:$0xff] %v4700_v62  ;;  %v4569_v23 = vpop.f32.mrf.mxu1 }
 0x568   : > { %v4796_v25 = vperm.slane %v4756_v18, %v7543_v61  ;;  %v4633_v4 = vadd.f32 %v4569_v23, %v4439_v39  ;;  %v4247_v60 = vadd.f32 %v4187_v44, %v4052_v22  ;;  %v4249_v32 = vadd.f32 %v4193_v40, %v4054_v51  ;;  %v7999_v51 = vld [vmem:[#allocation38_spill] sm:$0xff] }
 0x56a   : > { %v4852_v36 = vrot.slane %v4796_v25, 4  ;;  %v4669_v19 = vadd.f32 %v7519_v8, %v4633_v4  ;;  %v4441_v9 = vadd.f32 %v4381_v10, %v4247_v60  ;;  %v4390_v56 = vpop.f32.mrf.mxu0 }
 0x56c   : > { %v4884_v2 = vmax.f32 %v4796_v25, %v4852_v36  ;;  %v4701_v7 = vmax.f32 %v4669_v19, 0.0  ;;  %v4007_v23 = vpop.f32.mrf.mxu2  ;;  %v7996_v25 = vld [vmem:[#allocation34_spill] sm:$0xff]  ;;  %v4443_v36 = vadd.f32 %v4387_v6, %v4249_v32 }
 0x56d   : > { %v3861_v0 = vadd.f32 %v7427_v46, %v7996_v25 }
 0x56e   : > { %4926 = vst [vmem:[#allocation1 + $0x31] ss:$2 sm:$0xff] %v4884_v2  ;;  %v4202_v21 = vpop.f32.mrf.mxu3 }
 0x56f   : > { %4733 = vst [vmem:[%s7527_s17 + $0x80] sm:$0xff] %v4701_v7  ;;  %v4572_v29 = vpop.f32.mrf.mxu1  ;;  %v4055_v16 = vadd.f32 %v4001_v41, %v3861_v0 }
 0x570   : > { %v4634_v55 = vadd.f32 %v4572_v29, %v4440_v34  ;;  %v7997_v34 = vld [vmem:[#allocation31_spill] sm:$0xff] }
 0x571   : > { %v4250_v2 = vadd.f32 %v4196_v58, %v4055_v16  ;;  %v3862_v46 = vadd.f32 %v7438_v11, %v7997_v34 }
 0x572   : > { %v4670_v1 = vadd.f32 %v7519_v8, %v4634_v55  ;;  %v4393_v18 = vpop.f32.mrf.mxu0 }
 0x573   : > { %v4056_v6 = vadd.f32 %v4004_v13, %v3862_v46 }
 0x574   : > { %v4702_v43 = vmax.f32 %v4670_v1, 0.0  ;;  %v4010_v60 = vpop.f32.mrf.mxu2  ;;  %v4444_v1 = vadd.f32 %v4390_v56, %v4250_v2 }
 0x575   : > { %v4927_v63 = vld.sshfl [vmem:[#allocation1 + $0x30] sm:$0xff pattern:$0x75316420] }
 0x576   : > { %4734 = vst [vmem:[%s7527_s17 + $0x88] sm:$0xff] %v4702_v43 }
 0x577   : > { %v4575_v45 = vpop.f32.mrf.mxu1  ;;  %4951 = vst [vmem:[%s7579_s19 + $0x18] sm:$0xff] %v4927_v63  ;;  %v4205_v63 = vpop.f32.mrf.mxu3 }
 0x578   : > { %v4635_v3 = vadd.f32 %v4575_v45, %v4441_v9  ;;  %v3863_v9 = vadd.f32 %v7449_v5, %v7998_v33  ;;  %v8002_v33 = vld [vmem:[#allocation44_spill] sm:$0xff] }
 0x57a   : > { %v4671_v44 = vadd.f32 %v7519_v8, %v4635_v3  ;;  %v4396_v29 = vpop.f32.mrf.mxu0  ;;  %v4057_v52 = vadd.f32 %v4007_v23, %v3863_v9  ;;  %v3867_v9 = vadd.f32 %v7483_v54, %v8002_v33 }
 0x57c   : > { %v4703_v14 = vmax.f32 %v4671_v44, 0.0  ;;  %v4013_v44 = vpop.f32.mrf.mxu2  ;;  %v4252_v17 = vadd.f32 %v4202_v21, %v4057_v52 }
 0x57e   : > { %4735 = vst [vmem:[%s7527_s17 + $0x90] sm:$0xff] %v4703_v14  ;;  %v4757_v48 = vmax.f32 %v4701_v7, %v4703_v14 }
 0x57f   : > { %v4578_v57 = vpop.f32.mrf.mxu1 }
 0x580   : > { %v4800_v10 = vperm.slane %v4757_v48, %v7543_v61  ;;  %v4636_v62 = vadd.f32 %v4578_v57, %v4442_v27  ;;  %v3864_v48 = vadd.f32 %v7460_v26, %v7999_v51  ;;  %v8003_v51 = vld [vmem:[#allocation46_spill] sm:$0xff] }
 0x582   : > { %v4853_v39 = vrot.slane %v4800_v10, 4  ;;  %v4672_v42 = vadd.f32 %v7519_v8, %v4636_v62  ;;  %v4399_v3 = vpop.f32.mrf.mxu0  ;;  %v4058_v5 = vadd.f32 %v4010_v60, %v3864_v48  ;;  %v3868_v48 = vadd.f32 %v7490_v31, %v8003_v51 }
 0x584   : > { %v4885_v4 = vmax.f32 %v4800_v10, %v4853_v39  ;;  %v4704_v15 = vmax.f32 %v4672_v42, 0.0  ;;  %v4446_v10 = vadd.f32 %v4396_v29, %v4252_v17  ;;  %v4016_v42 = vpop.f32.mrf.mxu2  ;;  %v4253_v23 = vadd.f32 %v4205_v63, %v4058_v5 }
 0x586   : > { %4928 = vst [vmem:[#allocation1] ss:$2 sm:$0xff] %v4885_v4  ;;  %v4758_v50 = vmax.f32 %v4702_v43, %v4704_v15  ;;  %v4251_v43 = vadd.f32 %v4199_v24, %v4056_v6  ;;  %v4208_v24 = vpop.f32.mrf.mxu3  ;;  %v8000_v4 = vld [vmem:[#allocation40_spill] sm:$0xff] }
 0x587   : > { %4736 = vst [vmem:[%s7527_s17 + $0x98] sm:$0xff] %v4704_v15  ;;  %v4581_v19 = vpop.f32.mrf.mxu1  ;;  %v3865_v26 = vadd.f32 %v7469_v59, %v8000_v4  ;;  %v8001_v59 = vld [vmem:[#allocation42_spill] sm:$0xff] }
 0x588   : > { %v4804_v35 = vperm.slane %v4758_v50, %v7543_v61  ;;  %v4637_v40 = vadd.f32 %v4581_v19, %v4443_v36  ;;  %v4445_v13 = vadd.f32 %v4393_v18, %v4251_v43  ;;  %v4447_v19 = vadd.f32 %v4399_v3, %v4253_v23 }
 0x589   : > { %v4059_v50 = vadd.f32 %v4013_v44, %v3865_v26 }
 0x58a   : > { %v4854_v7 = vrot.slane %v4804_v35, 4  ;;  %v4673_v22 = vadd.f32 %v7519_v8, %v4637_v40  ;;  %v4402_v32 = vpop.f32.mrf.mxu0 }
 0x58c   : > { %v4886_v55 = vmax.f32 %v4804_v35, %v4854_v7  ;;  %v4705_v41 = vmax.f32 %v4673_v22, 0.0  ;;  %v4254_v22 = vadd.f32 %v4208_v24, %v4059_v50  ;;  %v4019_v29 = vpop.f32.mrf.mxu2 }
 0x58d   : > { %v4061_v52 = vadd.f32 %v4019_v29, %v3867_v9 }
 0x58e   : > { %4929 = vst [vmem:[#allocation1 + $0x1] ss:$2 sm:$0xff] %v4886_v55  ;;  %v4211_v35 = vpop.f32.mrf.mxu3  ;;  %v3866_v55 = vadd.f32 %v7476_v20, %v8001_v59 }
 0x58f   : > { %4737 = vst [vmem:[%s7527_s17 + $0xa0] sm:$0xff] %v4705_v41  ;;  %v4584_v47 = vpop.f32.mrf.mxu1 }
 0x590   : > { %v4638_v37 = vadd.f32 %v4584_v47, %v4444_v1  ;;  %v4060_v6 = vadd.f32 %v4016_v42, %v3866_v55  ;;  %v4448_v1 = vadd.f32 %v4402_v32, %v4254_v22 }
 0x592   : > { %v4674_v58 = vadd.f32 %v7519_v8, %v4638_v37  ;;  %v4405_v7 = vpop.f32.mrf.mxu0 }
 0x594   : > { %v4706_v11 = vmax.f32 %v4674_v58, 0.0  ;;  %v4255_v58 = vadd.f32 %v4211_v35, %v4060_v6  ;;  %v4022_v20 = vpop.f32.mrf.mxu2 }
 0x595   : > { %v4930_v45 = vld.sshfl [vmem:[#allocation1] sm:$0xff pattern:$0x75316420]  ;;  %v4062_v24 = vadd.f32 %v4022_v20, %v3868_v48 }
 0x596   : > { %4952 = vst [vmem:[%s7579_s19 + $0x20] sm:$0xff] %v4930_v45  ;;  %v4214_v43 = vpop.f32.mrf.mxu3 }
 0x597   : > { %4738 = vst [vmem:[%s7527_s17 + $0xa8] sm:$0xff] %v4706_v11  ;;  %v4587_v56 = vpop.f32.mrf.mxu1 }
 0x598   : > { %v4639_v49 = vadd.f32 %v4587_v56, %v4445_v13  ;;  %v4449_v13 = vadd.f32 %v4405_v7, %v4255_v58 }
 0x59a   : > { %v4675_v14 = vadd.f32 %v7519_v8, %v4639_v49  ;;  %v4256_v49 = vadd.f32 %v4214_v43, %v4061_v52 }
 0x59c   : > { %v4707_v27 = vmax.f32 %v4675_v14, 0.0 }
 0x59e   : > { %4739 = vst [vmem:[%s7527_s17 + $0xb0] sm:$0xff] %v4707_v27  ;;  %v4759_v57 = vmax.f32 %v4705_v41, %v4707_v27  ;;  %v4217_v14 = vpop.f32.mrf.mxu3 }
 0x59f   : > { %v4590_v62 = vpop.f32.mrf.mxu1 }
 0x5a0   : > { %v4808_v18 = vperm.slane %v4759_v57, %v7543_v61  ;;  %v4640_v39 = vadd.f32 %v4590_v62, %v4446_v10  ;;  %v4025_v10 = vpop.f32.mrf.mxu2 }
 0x5a2   : > { %v4855_v25 = vrot.slane %v4808_v18, 4  ;;  %v4676_v0 = vadd.f32 %v7519_v8, %v4640_v39  ;;  %v4257_v39 = vadd.f32 %v4217_v14, %v4062_v24 }
 0x5a4   : > { %v4887_v15 = vmax.f32 %v4808_v18, %v4855_v25  ;;  %v4708_v16 = vmax.f32 %v4676_v0, 0.0  ;;  %v3869_v25 = vadd.f32 %v7497_v30, %v7356_v28  ;;  %v8004_v28 = vld [vmem:[#allocation48_spill] sm:$0xff] }
 0x5a5   : > { %v3870_v30 = vadd.f32 %v7501_v12, %v8004_v28  ;;  %v3871_v12 = vadd.f32 %v7507_v38, %v7378_v53 }
 0x5a6   : > { %4931 = vst [vmem:[#allocation1 + $0x10] ss:$2 sm:$0xff] %v4887_v15  ;;  %v4760_v36 = vmax.f32 %v4706_v11, %v4708_v16  ;;  %v4408_v11 = vpop.f32.mrf.mxu0  ;;  %v4220_v4 = vpop.f32.mrf.mxu3  ;;  %v4063_v26 = vadd.f32 %v4025_v10, %v3869_v25 }
 0x5a7   : > { %4740 = vst [vmem:[%s7527_s17 + $0xb8] sm:$0xff] %v4708_v16  ;;  %v4593_v40 = vpop.f32.mrf.mxu1  ;;  %v4450_v57 = vadd.f32 %v4408_v11, %v4256_v49 }
 0x5a8   : > { %v4812_v21 = vperm.slane %v4760_v36, %v7543_v61  ;;  %v4641_v2 = vadd.f32 %v4593_v40, %v4447_v19  ;;  %v4028_v40 = vpop.f32.mrf.mxu2 }
 0x5a9   : > { %v4064_v29 = vadd.f32 %v4028_v40, %v3870_v30 }
 0x5aa   : > { %v4856_v34 = vrot.slane %v4812_v21, 4  ;;  %v4677_v46 = vadd.f32 %v7519_v8, %v4641_v2 }
 0x5ac   : > { %v4888_v41 = vmax.f32 %v4812_v21, %v4856_v34  ;;  %v4709_v60 = vmax.f32 %v4677_v46, 0.0  ;;  %v4258_v21 = vadd.f32 %v4220_v4, %v4063_v26 }
 0x5ae   : > { %4932 = vst [vmem:[#allocation1 + $0x11] ss:$2 sm:$0xff] %v4888_v41  ;;  %v4411_v54 = vpop.f32.mrf.mxu0  ;;  %v4223_v46 = vpop.f32.mrf.mxu3 }
 0x5af   : > { %4741 = vst [vmem:[%s7527_s17 + $0xc0] sm:$0xff] %v4709_v60  ;;  %v4596_v47 = vpop.f32.mrf.mxu1  ;;  %v4451_v16 = vadd.f32 %v4411_v54, %v4257_v39  ;;  %v4259_v6 = vadd.f32 %v4223_v46, %v4064_v29 }
 0x5b0   : > { %v4642_v37 = vadd.f32 %v4596_v47, %v4448_v1  ;;  %v4031_v47 = vpop.f32.mrf.mxu2 }
 0x5b2   : > { %v4678_v63 = vadd.f32 %v7519_v8, %v4642_v37 }
 0x5b4   : > { %v4710_v45 = vmax.f32 %v4678_v63, 0.0  ;;  %v4065_v63 = vadd.f32 %v4031_v47, %v3871_v12 }
 0x5b5   : > { %v4933_v3 = vld.sshfl [vmem:[#allocation1 + $0x10] sm:$0xff pattern:$0x75316420] }
 0x5b6   : > { %4953 = vst [vmem:[%s7579_s19 + $0x28] sm:$0xff] %v4933_v3  ;;  %v4414_v35 = vpop.f32.mrf.mxu0  ;;  %v4226_v33 = vpop.f32.mrf.mxu3 }
 0x5b7   : > { %4742 = vst [vmem:[%s7527_s17 + $0xc8] sm:$0xff] %v4710_v45  ;;  %v4599_v44 = vpop.f32.mrf.mxu1  ;;  %v4452_v59 = vadd.f32 %v4414_v35, %v4258_v21 }
 0x5b8   : > { %v4643_v56 = vadd.f32 %v4599_v44, %v4449_v13 }
 0x5ba   : > { %v4679_v17 = vadd.f32 %v7519_v8, %v4643_v56 }
 0x5bc   : > { %v4711_v27 = vmax.f32 %v4679_v17, 0.0 }
 0x5be   : > { %4743 = vst [vmem:[%s7527_s17 + $0xd0] sm:$0xff] %v4711_v27  ;;  %v4761_v5 = vmax.f32 %v4709_v60, %v4711_v27  ;;  %v4417_v60 = vpop.f32.mrf.mxu0 }
 0x5bf   : > { %v4602_v62 = vpop.f32.mrf.mxu1  ;;  %v4453_v58 = vadd.f32 %v4417_v60, %v4259_v6 }
 0x5c0   : > { %v4816_v32 = vperm.slane %v4761_v5, %v7543_v61  ;;  %v4644_v18 = vadd.f32 %v4602_v62, %v4450_v57 }
 0x5c2   : > { %v4857_v42 = vrot.slane %v4816_v32, 4  ;;  %v4680_v23 = vadd.f32 %v7519_v8, %v4644_v18 }
 0x5c4   : > { %v4889_v31 = vmax.f32 %v4816_v32, %v4857_v42  ;;  %v4712_v0 = vmax.f32 %v4680_v23, 0.0 }
 0x5c6   : > { %4934 = vst [vmem:[#allocation1 + $0x20] ss:$2 sm:$0xff] %v4889_v31  ;;  %v4762_v15 = vmax.f32 %v4710_v45, %v4712_v0  ;;  %v4260_v45 = vadd.f32 %v4226_v33, %v4065_v63  ;;  %v4420_v3 = vpop.f32.mrf.mxu0 }
 0x5c7   : > { %4744 = vst [vmem:[%s7527_s17 + $0xd8] sm:$0xff] %v4712_v0  ;;  %v4605_v50 = vpop.f32.mrf.mxu1 }
 0x5c8   : > { %v4820_v36 = vperm.slane %v4762_v15, %v7543_v61  ;;  %v4645_v19 = vadd.f32 %v4605_v50, %v4451_v16  ;;  %v4454_v13 = vadd.f32 %v4420_v3, %v4260_v45 }
 0x5ca   : > { %v4858_v2 = vrot.slane %v4820_v36, 4  ;;  %v4681_v7 = vadd.f32 %v7519_v8, %v4645_v19 }
 0x5cc   : > { %v4890_v22 = vmax.f32 %v4820_v36, %v4858_v2  ;;  %v4713_v34 = vmax.f32 %v4681_v7, 0.0 }
 0x5ce   : > { %4935 = vst [vmem:[#allocation1 + $0x21] ss:$2 sm:$0xff] %v4890_v22 }
 0x5cf   : > { %4745 = vst [vmem:[%s7527_s17 + $0xe0] sm:$0xff] %v4713_v34  ;;  %v4608_v55 = vpop.f32.mrf.mxu1 }
 0x5d0   : > { %v4646_v41 = vadd.f32 %v4608_v55, %v4452_v59 }
 0x5d2   : > { %v4682_v1 = vadd.f32 %v7519_v8, %v4646_v41 }
 0x5d4   : > { %v4714_v37 = vmax.f32 %v4682_v1, 0.0 }
 0x5d5   : > { %v4936_v43 = vld.sshfl [vmem:[#allocation1 + $0x20] sm:$0xff pattern:$0x75316420] }
 0x5d6   : > { %4954 = vst [vmem:[%s7579_s19 + $0x30] sm:$0xff] %v4936_v43 }
 0x5d7   : > { %4746 = vst [vmem:[%s7527_s17 + $0xe8] sm:$0xff] %v4714_v37  ;;  %v4611_v9 = vpop.f32.mrf.mxu1 }
 0x5d8   : > { %v4647_v11 = vadd.f32 %v4611_v9, %v4453_v58 }
 0x5da   : > { %v4683_v20 = vadd.f32 %v7519_v8, %v4647_v11 }
 0x5dc   : > { %v4715_v52 = vmax.f32 %v4683_v20, 0.0 }
 0x5de   : > { %4747 = vst [vmem:[%s7527_s17 + $0xf0] sm:$0xff] %v4715_v52  ;;  %v4763_v53 = vmax.f32 %v4713_v34, %v4715_v52 }
 0x5df   : > { %v4614_v38 = vpop.f32.mrf.mxu1 }
 0x5e0   : > { %v4824_v44 = vperm.slane %v4763_v53, %v7543_v61  ;;  %v4648_v56 = vadd.f32 %v4614_v38, %v4454_v13 }
 0x5e2   : > { %v4859_v49 = vrot.slane %v4824_v44, 4  ;;  %v4684_v17 = vadd.f32 %v7519_v8, %v4648_v56 }
 0x5e4   : > { %v4891_v14 = vmax.f32 %v4824_v44, %v4859_v49  ;;  %v4716_v51 = vmax.f32 %v4684_v17, 0.0 }
 0x5e6   : > { %4937 = vst [vmem:[#allocation1 + $0x30] ss:$2 sm:$0xff] %v4891_v14  ;;  %v4764_v48 = vmax.f32 %v4714_v37, %v4716_v51 }
 0x5e7   : > { %4748 = vst [vmem:[%s7527_s17 + $0xf8] sm:$0xff] %v4716_v51 }
 0x5e8   : > { %v4828_v27 = vperm.slane %v4764_v48, %v7543_v61 }
 0x5e9   : > { %5553 = shalt.err (!%p5550_p8)
}
 0x5ea   : > { %s5631_s17 = smov 128   ;;  %s5632_s28 = smov 8   ;;  %v4860_v8 = vrot.slane %v4828_v27, 4 }
 0x5eb   : > { %5434 = dma.vmem_to_hbm [thread:$0]  (%p5706_p5), %s4992_s9, 4096, %s4994_s10, %s4962_s11, %s5631_s17, %s5631_s17, %s5632_s28  }
 0x5ec   : > { %s5425_s29 = sshll.u32 %s5689_s25, 6  ;;  %v4892_v61 = vmax.f32 %v4828_v27, %v4860_v8  ;;  %s4974_s16 = sshll.u32 %s7579_s19, 4  ;;  %s4975_s16 = int_to_ptr.vmem [resolvable:$true] %s4974_s16 }
 0x5ed   : > { %s4973_s15 = scalar_lea.hbm %s7824_s5, %s5425_s29  ;;  %s4957_s20 = scalar_lea.sflag [#allocation6], %s7514_s13 }
 0x5ee   : > { %4938 = vst [vmem:[#allocation1 + $0x31] ss:$2 sm:$0xff] %v4892_v61  ;;  %s4976_s18 = sshll.u32 %s4973_s15, 4  ;;  %s5574_s10 = scalar_lea.hbm %s7824_s5, 128  ;;  %s4977_s18 = int_to_ptr.hbm [resolvable:$true] %s4976_s18 }
 0x5ef   : > { %s5568_s26 = sshra.s32 %s4977_s18, 4  ;;  %s5569_s26 = int_to_ptr.hbm [resolvable:$true] %s5568_s26 }
 0x5f0   : > { %s5570_s0 = scalar_lea.hbm %s5569_s26, 64  ;;  %p5575_p12 = scmp.lt.s32.totalorder %s5569_s26, %s7824_s5 }
 0x5f1   : > { %p5571_p9 = scmp.ne.s32.totalorder %s5569_s26, %s5570_s0  ;;  %p5576_p13 = scmp.lt.s32.totalorder %s5574_s10, %s5570_s0 }
 0x5f3   : > { %p5572_p10 = pnand %p5571_p9, %p5706_p5  ;;  %p5577_p0 = por %p5576_p13, %p5575_p12 }
 0x5f5   : > { %v4939_v54 = vld.sshfl [vmem:[#allocation1 + $0x30] sm:$0xff pattern:$0x75316420]  ;;  %p5573_p11 = pneg %p5572_p10 }
 0x5f6   : > { %4955 = vst [vmem:[%s7579_s19 + $0x38] sm:$0xff] %v4939_v54 }
 0x5f7   : > { %p5578_p1 = pnand %p5577_p0, %p5573_p11 }
 0x5f9   : > { %5581 = shalt.err (!%p5578_p1)
}
 0x5fa   : > { %5433 = dma.vmem_to_hbm [thread:$0]  (%p5706_p5), %s4975_s16, 1024, %s4977_s18, %s4957_s20, %s5631_s17, %s5631_s17, %s5632_s28  }
 0x5fb PF: > { %p5450_p2 = scmp.ge.s32.totalorder %s5624_s24, 2  ;;  %s5008_s13 = sand.u32 1, %s5612_s21  }
 0x5fc   : > { %s5009_s19 = scalar_lea.sflag [#allocation6], %s5008_s13 }
 0x5fd   : > { %p5442_p3 = pnand %p5450_p2, %p5710_p6 }
 0x5ff   : > { %p5443_p4 = pneg %p5442_p3 }
 0x601   : > { %5603 = dma.done.wait (%p5443_p4), %s5009_s19, 1024  }
 0x602   : > { %5605 = vsyncadd (%p5443_p4), %s5009_s19, 4294966272  ;;  %s5019_s0 = scalar_lea.sflag [#allocation9], %s5008_s13 }
 0x603   : > { %5607 = dma.done.wait (%p5443_p4), %s5019_s0, 4096  }
 0x604   : > { %5609 = vsyncadd (%p5443_p4), %s5019_s0, 4294963200  ;;  %p21_p5 = scmp.ge.s32.totalorder %s5693_s27, 4   ;;  %s8005_s21 = smov %s5616_s22 }
 0x605   : > { %s8006_s22 = smov %s5620_s23  ;;  %s8007_s23 = smov %s5704_s30 }
 0x606   : > { %s8008_s24 = smov %s5693_s27  ;;  %23 = sbr.rel (!%p21_p5) target bundleno = 8 (0x8), region = 126 }
 0x60b   :  { %5025 = vsyncpa [#allocation5], 1 }
 0x60c   :  { %5027 = vsyncpa [#allocation5 + $0x1], 1 }
 0x60d   :  { %5028 = vsyncpa [#allocation6], 1 }
 0x60e   :  { %5030 = vsyncpa [#allocation6 + $0x1], 1 }
 0x60f   :  { %5031 = vsyncpa [#allocation9], 1 }
 0x610   :  { %5033 = vsyncpa [#allocation9 + $0x1], 1 }

</bundles_post_ra>
